<compile_context>
chip_gen: v6e
topology: v6e:2x2x1
jax: 0.10.0
libtpu: 0.0.40
codegen_flags: <defaults>
</compile_context>

<pallas_src>
import functools
import math

import jax
import jax.numpy as jnp
from jax.experimental import pallas as pl
from jax.experimental.pallas import tpu as pltpu

_BN_EPS = 1e-5
_LANE = 128
_NEG_BIG = -1e30   # finite "-inf" for max-pool spatial padding
_KT_CAP = 2048     # max contraction-tile width per grid step


def _round_up(v, m):
    return ((v + m - 1) // m) * m


@functools.lru_cache(maxsize=1)
def _vmem_limit_bytes():
    # Generation-aware VMEM budget: ~96 MiB on v5e/v6e (128 MiB physical),
    # ~48 MiB on v7x (64 MiB physical); safe fallback if the query fails.
    cap = 64 * 1024 * 1024
    try:
        cap = int(pltpu.get_tpu_info().vmem_capacity_bytes)
    except Exception:
        pass
    return int(max(32 * 1024 * 1024, min(cap - 16 * 1024 * 1024, 96 * 1024 * 1024)))


def _compiler_params(semantics):
    return pltpu.CompilerParams(
        dimension_semantics=semantics,
        vmem_limit_bytes=_vmem_limit_bytes(),
    )


# ----------------------------------------------------------------------------
# Pallas kernels
# ----------------------------------------------------------------------------
def _gemm_bn_kernel(x_ref, w_ref, b_ref, o_ref, acc_ref, *, relu):
    """Packed conv as GEMM: (tm, kt) bf16 x (kt, tn) bf16 -> f32 accumulator.

    grid = (row_tiles i, cout_tiles j, k_tiles kk).  Epilogue (BN shift +
    optional ReLU, bf16 store) runs on the last k step."""
    kk = pl.program_id(2)

    @pl.when(kk == 0)
    def _init():
        acc_ref[...] = jnp.zeros_like(acc_ref)

    acc_ref[...] += jnp.dot(x_ref[...], w_ref[...],
                            preferred_element_type=jnp.float32)

    @pl.when(kk == pl.num_programs(2) - 1)
    def _finalize():
        y = acc_ref[...] + b_ref[...]
        if relu:
            y = jnp.maximum(y, 0.0)
        o_ref[...] = y.astype(o_ref.dtype)


def _gemm_bn_res_kernel(x_ref, w_ref, b_ref, r_ref, o_ref, acc_ref, *, relu):
    """Same as _gemm_bn_kernel with a residual add fused into the epilogue."""
    kk = pl.program_id(2)

    @pl.when(kk == 0)
    def _init():
        acc_ref[...] = jnp.zeros_like(acc_ref)

    acc_ref[...] += jnp.dot(x_ref[...], w_ref[...],
                            preferred_element_type=jnp.float32)

    @pl.when(kk == pl.num_programs(2) - 1)
    def _finalize():
        y = acc_ref[...] + b_ref[...] + r_ref[...].astype(jnp.float32)
        if relu:
            y = jnp.maximum(y, 0.0)
        o_ref[...] = y.astype(o_ref.dtype)


def _pool_conv_kernel(x_ref, w_ref, b_ref, o_ref):
    """Fused SparseMaxPool3D + 1x1 ConvModule (BN, no act).

    x_ref is the (taps, tm, cinp) bf16 window stack for this row tile; one
    VPU max-reduce over taps then a single MXU matmul + shift."""
    pooled = jnp.max(x_ref[...], axis=0)                      # (tm, cinp) bf16
    y = jnp.dot(pooled, w_ref[...], preferred_element_type=jnp.float32)
    o_ref[...] = (y + b_ref[...]).astype(o_ref.dtype)


# ----------------------------------------------------------------------------
# Geometry / layout helpers (plain-JAX glue)
# ----------------------------------------------------------------------------
def _out_dims(d, h, w, k, stride, padding):
    do = (d + 2 * padding - k) // stride + 1
    ho = (h + 2 * padding - k) // stride + 1
    wo = (w + 2 * padding - k) // stride + 1
    return do, ho, wo


def _window_slices(xp, k, stride, do, ho, wo):
    """k^3 strided window views (kd outer, kh, kw inner) of a spatially padded
    NDHWC array.  Pure static strided slices — XLA fuses them with the pad."""
    cols = []
    for kd in range(k):
        for kh in range(k):
            for kw in range(k):
                cols.append(xp[:, kd:kd + stride * do:stride,
                                  kh:kh + stride * ho:stride,
                                  kw:kw + stride * wo:stride, :])
    return cols


def _cout_tile(coutp):
    if coutp <= 256:
        return coutp            # collapse the cout grid axis to one tile
    return 256 if coutp % 256 == 0 else 128


# ----------------------------------------------------------------------------
# ConvModule / downsample wrappers around the Pallas kernels
# ----------------------------------------------------------------------------
def conv_bn(x, p, k, stride, padding, act, residual=None):
    """ConvModule forward: conv(k^3, stride, padding) + BN shift [+res][+ReLU].

    x: [N, D, H, W, Cin] (true channels); returns [N, Do, Ho, Wo, Cout] bf16."""
    n, d, h, w, cin = x.shape
    assert p["k"] == k and p["cin"] == cin, (p["k"], p["cin"], k, cin)
    kpad, coutp = p["w"].shape
    cout = p["cout"]
    taps = k ** 3
    ktrue = taps * cin

    do, ho, wo = _out_dims(d, h, w, k, stride, padding)
    rout = n * do * ho * wo

    # im2col: pack (taps x true Cin) into the contraction dim, only for the
    # real (strided) output voxels.
    xb = x.astype(jnp.bfloat16)
    xp = jnp.pad(xb, ((0, 0),) + ((padding, padding),) * 3 + ((0, 0),))
    packed = jnp.concatenate(_window_slices(xp, k, stride, do, ho, wo), axis=-1)
    packed = packed.reshape(rout, ktrue)

    # Tiling.
    tm = min(512, _round_up(rout, 16))
    rout_r = _round_up(rout, tm)
    tn = _cout_tile(coutp)
    nk = -(-kpad // _KT_CAP)
    kt = _round_up(-(-kpad // nk), _LANE)
    kfull = kt * nk

    packed = jnp.pad(packed, ((0, rout_r - rout), (0, kfull - ktrue)))
    wmat = p["w"]
    if kfull > kpad:
        wmat = jnp.pad(wmat, ((0, kfull - kpad), (0, 0)))

    in_specs = [
        pl.BlockSpec((tm, kt), lambda i, j, kk: (i, kk)),   # packed activation
        pl.BlockSpec((kt, tn), lambda i, j, kk: (kk, j)),   # packed weights
        pl.BlockSpec((1, tn), lambda i, j, kk: (0, j)),     # BN shift
    ]
    args = [packed, wmat, p["shift"]]
    if residual is not None:
        assert stride == 1 and residual.shape[:4] == (n, do, ho, wo)
        rc = residual.shape[-1]
        r2 = residual.astype(jnp.bfloat16).reshape(rout, rc)
        r2 = jnp.pad(r2, ((0, rout_r - rout), (0, coutp - rc)))
        in_specs.append(pl.BlockSpec((tm, tn), lambda i, j, kk: (i, j)))
        args.append(r2)
        kernel = functools.partial(_gemm_bn_res_kernel, relu=act)
    else:
        kernel = functools.partial(_gemm_bn_kernel, relu=act)

    out = pl.pallas_call(
        kernel,
        out_shape=jax.ShapeDtypeStruct((rout_r, coutp), jnp.bfloat16),
        grid_spec=pltpu.PrefetchScalarGridSpec(
            num_scalar_prefetch=0,
            grid=(rout_r // tm, coutp // tn, nk),
            in_specs=in_specs,
            out_specs=pl.BlockSpec((tm, tn), lambda i, j, kk: (i, j)),
            scratch_shapes=[pltpu.VMEM((tm, tn), jnp.float32)],
        ),
        compiler_params=_compiler_params(("parallel", "parallel", "arbitrary")),
    )(*args)

    return out[:rout, :cout].reshape(n, do, ho, wo, cout)


def maxpool_conv_bn(x, p, k, stride, padding):
    """Downsample path: SparseMaxPool3D(k, stride, padding) + 1x1 ConvModule
    (BN, no activation), fused into one Pallas kernel."""
    n, d, h, w, cin = x.shape
    assert p["k"] == 1 and p["cin"] == cin
    cinp, coutp = p["w"].shape
    cout = p["cout"]
    taps = k ** 3

    do, ho, wo = _out_dims(d, h, w, k, stride, padding)
    rout = n * do * ho * wo

    xb = x.astype(jnp.bfloat16)
    xp = jnp.pad(xb, ((0, 0),) + ((padding, padding),) * 3 + ((0, 0),),
                 constant_values=_NEG_BIG)     # "ignore padding" max semantics
    stack = jnp.stack(_window_slices(xp, k, stride, do, ho, wo), axis=0)
    stack = stack.reshape(taps, rout, cin)

    tm = min(128, _round_up(rout, 16))
    rout_r = _round_up(rout, tm)
    tn = _cout_tile(coutp)
    # Row / lane padding with zeros is harmless: padded weight rows are zero
    # and padded output rows are sliced off below.
    stack = jnp.pad(stack, ((0, 0), (0, rout_r - rout), (0, cinp - cin)))

    out = pl.pallas_call(
        _pool_conv_kernel,
        out_shape=jax.ShapeDtypeStruct((rout_r, coutp), jnp.bfloat16),
        grid_spec=pltpu.PrefetchScalarGridSpec(
            num_scalar_prefetch=0,
            grid=(rout_r // tm, coutp // tn),
            in_specs=[
                pl.BlockSpec((taps, tm, cinp), lambda i, j: (0, i, 0)),
                pl.BlockSpec((cinp, tn), lambda i, j: (0, j)),
                pl.BlockSpec((1, tn), lambda i, j: (0, j)),
            ],
            out_specs=pl.BlockSpec((tm, tn), lambda i, j: (i, j)),
        ),
        compiler_params=_compiler_params(("parallel", "parallel")),
    )(stack, p["w"], p["shift"])

    return out[:rout, :cout].reshape(n, do, ho, wo, cout)


# ----------------------------------------------------------------------------
# ConvModule / BasicBlock / ResNet (deterministic init + forward)
# ----------------------------------------------------------------------------
def init_convmodule(key, cin, cout, k):
    kw_, kg, kb = jax.random.split(key, 3)
    fan_in = cin * k ** 3
    w = jax.random.normal(kw_, (k, k, k, cin, cout), jnp.float32) / math.sqrt(fan_in)
    gamma = jax.random.uniform(kg, (cout,), jnp.float32, minval=0.5, maxval=1.5)
    beta = 0.1 * jax.random.normal(kb, (cout,), jnp.float32)
    # eval-mode BatchNorm (running_mean=0, running_var=1); fold scale into W.
    scale = gamma / jnp.sqrt(1.0 + _BN_EPS)
    shift = beta
    w = w * scale                                         # broadcast over cout
    taps = k ** 3
    ktrue, kpad = taps * cin, _round_up(taps * cin, _LANE)
    coutp = _round_up(cout, _LANE)
    w = w.reshape(ktrue, cout)                            # row = tap*cin + c
    w = jnp.pad(w, ((0, kpad - ktrue), (0, coutp - cout))).astype(jnp.bfloat16)
    shift = jnp.pad(shift, (0, coutp - cout)).reshape(1, coutp)
    return {"w": w, "shift": shift, "cin": cin, "cout": cout, "k": k}


def init_resnet(key, depth, in_channels, base_channels):
    arch = {18: (2, 2, 2, 2), 34: (3, 4, 6, 3)}
    assert depth in arch  # TODO(synk): Bottleneck (depth 50/101/152) is `pass` in the reference
    block_counts = arch[depth]
    keys = iter(jax.random.split(key, 64))

    params = {
        "layer0": init_convmodule(next(keys), in_channels, base_channels, 3),
        "layer1": init_convmodule(next(keys), base_channels, base_channels, 3),
    }
    inplanes = base_channels
    for li, (mult, nblocks) in enumerate(zip((1, 2, 4, 8), block_counts), start=2):
        planes = base_channels * mult
        blocks = []
        for b in range(nblocks):
            stride = 2 if b == 0 else 1
            bp = {
                "stride": stride,
                "conv1": init_convmodule(next(keys), inplanes, planes, 3),
                "conv2": init_convmodule(next(keys), planes, planes, 3),
            }
            if stride != 1 or inplanes != planes:
                bp["downsample"] = init_convmodule(next(keys), inplanes, planes, 1)
            blocks.append(bp)
            inplanes = planes
        params[f"layer{li}"] = blocks
    return params


def basic_block_forward(x, bp):
    stride = bp["stride"]
    # conv1: subm (s=1) or spconv (s=2), kernel 3 / padding 1, BN + ReLU
    out = conv_bn(x, bp["conv1"], 3, stride, 1, act=True)
    if "downsample" in bp:
        identity = maxpool_conv_bn(x, bp["downsample"], 3, stride, 1)
    else:
        identity = x
    # conv2: subm kernel 3, BN, no activation; residual add fused in-kernel
    out = conv_bn(out, bp["conv2"], 3, 1, 1, act=False, residual=identity)
    return out


def resnet_forward(x, params):
    # TODO(synk): dense-grid emulation of spconv (inactive voxels become active);
    # does not reproduce sparse indice bookkeeping on truly sparse inputs.
    out0 = conv_bn(x, params["layer0"], 3, 1, 1, act=True)
    out1 = conv_bn(out0, params["layer1"], 3, 2, 2, act=True)
    outs = [out0, out1]
    h = out1
    for li in range(2, 6):
        for bp in params[f"layer{li}"]:
            h = basic_block_forward(h, bp)
        outs.append(h)
    return tuple(o.astype(jnp.float32) for o in outs)


# ----------------------------------------------------------------------------
if __name__ == "__main__":
    key = jax.random.PRNGKey(0)
    k_params, k_x = jax.random.split(key)

    depth, in_channels, base_channels = 18, 4, 8
    params = init_resnet(k_params, depth, in_channels, base_channels)

    # NDHWC dense voxel grid (the sparse SparseConvTensor emulated densely)
    x = jax.random.normal(k_x, (1, 8, 8, 8, in_channels), jnp.float32)

    fwd = jax.jit(lambda v: resnet_forward(v, params))
    outs = jax.block_until_ready(fwd(x))

    expected_channels = (8, 8, 8, 16, 32, 64)
    expected_spatial = (8, 5, 3, 2, 1, 1)
    for o, ec, es in zip(outs, expected_channels, expected_spatial):
        assert o.shape == (1, es, es, es, ec), o.shape
        assert bool(jnp.all(jnp.isfinite(o)))

    print("KERNEL_OK")
</pallas_src>

<mosaic_0001>
module attributes {stable_mosaic.version = 11 : i64} {
  func.func @_gemm_bn_kernel(%arg0: i32, %arg1: i32, %arg2: i32, %arg3: memref<512x128xbf16, #tpu.memory_space<vmem>>, %arg4: memref<128x128xbf16, #tpu.memory_space<vmem>>, %arg5: memref<1x128xf32, #tpu.memory_space<vmem>>, %arg6: memref<512x128xbf16, #tpu.memory_space<vmem>>, %arg7: memref<512x128xf32, #tpu.memory_space<vmem>>) attributes {dimension_semantics = [#tpu.dimension_semantics<parallel>, #tpu.dimension_semantics<parallel>, #tpu.dimension_semantics<arbitrary>], iteration_bounds = array<i64: 1, 1, 1>, scalar_prefetch = 0 : i64, scratch_operands = 1 : i64, tpu.core_type = #tpu.core_type<tc>, window_params = [{transform_indices = @transform_0, window_bounds = array<i64: 512, 128>}, {transform_indices = @transform_1, window_bounds = array<i64: 128, 128>}, {transform_indices = @transform_2, window_bounds = array<i64: 1, 128>}, {transform_indices = @transform_3, window_bounds = array<i64: 512, 128>}]} {
    %c0_i32 = arith.constant 0 : i32
    %0 = arith.cmpi eq, %arg2, %c0_i32 : i32
    %1 = arith.extui %0 : i1 to i32
    %c0_i32_0 = arith.constant 0 : i32
    %2 = arith.cmpi ne, %1, %c0_i32_0 : i32
    scf.if %2 {
      %cst_10 = arith.constant 0.000000e+00 : f32
      %12 = vector.broadcast %cst_10 : f32 to vector<512x128xf32>
      %c0_11 = arith.constant 0 : index
      %c0_12 = arith.constant 0 : index
      %13 = vector.load %arg7[%c0_11, %c0_12] : memref<512x128xf32, #tpu.memory_space<vmem>>, vector<512x128xf32>
      tpu.vector_store %arg7[%c0_11, %c0_12], %12 {strides = array<i32>} : memref<512x128xf32, #tpu.memory_space<vmem>>, vector<512x128xf32>,
    } else {
    }
    %c0 = arith.constant 0 : index
    %c0_1 = arith.constant 0 : index
    %3 = vector.load %arg7[%c0, %c0_1] : memref<512x128xf32, #tpu.memory_space<vmem>>, vector<512x128xf32>
    %c0_2 = arith.constant 0 : index
    %c0_3 = arith.constant 0 : index
    %4 = vector.load %arg3[%c0_2, %c0_3] : memref<512x128xbf16, #tpu.memory_space<vmem>>, vector<512x128xbf16>
    %c0_4 = arith.constant 0 : index
    %c0_5 = arith.constant 0 : index
    %5 = vector.load %arg4[%c0_4, %c0_5] : memref<128x128xbf16, #tpu.memory_space<vmem>>, vector<128x128xbf16>
    %cst = arith.constant dense<0.000000e+00> : vector<512x128xf32>
    %6 = tpu.matmul %4, %5, %cst {dimension_numbers = #tpu.dot_dimension_numbers<[1], [0], [0], [1], [0, 0, 1, 1], [], []>} : vector<512x128xbf16>, vector<128x128xbf16>, vector<512x128xf32> -> vector<512x128xf32>
    %7 = arith.addf %3, %6 : vector<512x128xf32>
    %c0_6 = arith.constant 0 : index
    %c0_7 = arith.constant 0 : index
    %8 = vector.load %arg7[%c0_6, %c0_7] : memref<512x128xf32, #tpu.memory_space<vmem>>, vector<512x128xf32>
    tpu.vector_store %arg7[%c0_6, %c0_7], %7 {strides = array<i32>} : memref<512x128xf32, #tpu.memory_space<vmem>>, vector<512x128xf32>,
    %c0_i32_8 = arith.constant 0 : i32
    %9 = arith.cmpi eq, %arg2, %c0_i32_8 : i32
    %10 = arith.extui %9 : i1 to i32
    %c0_i32_9 = arith.constant 0 : i32
    %11 = arith.cmpi ne, %10, %c0_i32_9 : i32
    scf.if %11 {
      %c0_10 = arith.constant 0 : index
      %c0_11 = arith.constant 0 : index
      %12 = vector.load %arg7[%c0_10, %c0_11] : memref<512x128xf32, #tpu.memory_space<vmem>>, vector<512x128xf32>
      %c0_12 = arith.constant 0 : index
      %c0_13 = arith.constant 0 : index
      %13 = vector.load %arg5[%c0_12, %c0_13] : memref<1x128xf32, #tpu.memory_space<vmem>>, vector<1x128xf32>
      %14 = vector.broadcast %13 : vector<1x128xf32> to vector<512x128xf32>
      %15 = arith.addf %12, %14 : vector<512x128xf32>
      %cst_14 = arith.constant 0.000000e+00 : f32
      %16 = vector.broadcast %cst_14 : f32 to vector<512x128xf32>
      %17 = arith.maximumf %15, %16 : vector<512x128xf32>
      %18 = arith.truncf %17 : vector<512x128xf32> to vector<512x128xbf16>
      %c0_15 = arith.constant 0 : index
      %c0_16 = arith.constant 0 : index
      %19 = vector.load %arg6[%c0_15, %c0_16] : memref<512x128xbf16, #tpu.memory_space<vmem>>, vector<512x128xbf16>
      tpu.vector_store %arg6[%c0_15, %c0_16], %18 {strides = array<i32>} : memref<512x128xbf16, #tpu.memory_space<vmem>>, vector<512x128xbf16>,
    } else {
    }
    return
  }
  func.func @transform_0(%arg0: i32, %arg1: i32, %arg2: i32) -> (i32, i32) {
    %c0_i32 = arith.constant 0 : i32
    return %arg0, %arg2 : i32, i32
  }
  func.func @transform_1(%arg0: i32, %arg1: i32, %arg2: i32) -> (i32, i32) {
    %c0_i32 = arith.constant 0 : i32
    return %arg2, %arg1 : i32, i32
  }
  func.func @transform_2(%arg0: i32, %arg1: i32, %arg2: i32) -> (i32, i32) {
    %c0_i32 = arith.constant 0 : i32
    %c0_i32_0 = arith.constant 0 : i32
    return %c0_i32, %arg1 : i32, i32
  }
  func.func @transform_3(%arg0: i32, %arg1: i32, %arg2: i32) -> (i32, i32) {
    %c0_i32 = arith.constant 0 : i32
    return %arg0, %arg1 : i32, i32
  }
}

module attributes {stable_mosaic.version = 11 : i64} {
  func.func @_gemm_bn_kernel(%arg0: i32, %arg1: i32, %arg2: i32, %arg3: memref<128x256xbf16, #tpu.memory_space<vmem>>, %arg4: memref<256x128xbf16, #tpu.memory_space<vmem>>, %arg5: memref<1x128xf32, #tpu.memory_space<vmem>>, %arg6: memref<128x128xbf16, #tpu.memory_space<vmem>>, %arg7: memref<128x128xf32, #tpu.memory_space<vmem>>) attributes {dimension_semantics = [#tpu.dimension_semantics<parallel>, #tpu.dimension_semantics<parallel>, #tpu.dimension_semantics<arbitrary>], iteration_bounds = array<i64: 1, 1, 1>, scalar_prefetch = 0 : i64, scratch_operands = 1 : i64, tpu.core_type = #tpu.core_type<tc>, window_params = [{transform_indices = @transform_0, window_bounds = array<i64: 128, 256>}, {transform_indices = @transform_1, window_bounds = array<i64: 256, 128>}, {transform_indices = @transform_2, window_bounds = array<i64: 1, 128>}, {transform_indices = @transform_3, window_bounds = array<i64: 128, 128>}]} {
    %c0_i32 = arith.constant 0 : i32
    %0 = arith.cmpi eq, %arg2, %c0_i32 : i32
    %1 = arith.extui %0 : i1 to i32
    %c0_i32_0 = arith.constant 0 : i32
    %2 = arith.cmpi ne, %1, %c0_i32_0 : i32
    scf.if %2 {
      %cst_10 = arith.constant 0.000000e+00 : f32
      %12 = vector.broadcast %cst_10 : f32 to vector<128x128xf32>
      %c0_11 = arith.constant 0 : index
      %c0_12 = arith.constant 0 : index
      %13 = vector.load %arg7[%c0_11, %c0_12] : memref<128x128xf32, #tpu.memory_space<vmem>>, vector<128x128xf32>
      tpu.vector_store %arg7[%c0_11, %c0_12], %12 {strides = array<i32>} : memref<128x128xf32, #tpu.memory_space<vmem>>, vector<128x128xf32>,
    } else {
    }
    %c0 = arith.constant 0 : index
    %c0_1 = arith.constant 0 : index
    %3 = vector.load %arg7[%c0, %c0_1] : memref<128x128xf32, #tpu.memory_space<vmem>>, vector<128x128xf32>
    %c0_2 = arith.constant 0 : index
    %c0_3 = arith.constant 0 : index
    %4 = vector.load %arg3[%c0_2, %c0_3] : memref<128x256xbf16, #tpu.memory_space<vmem>>, vector<128x256xbf16>
    %c0_4 = arith.constant 0 : index
    %c0_5 = arith.constant 0 : index
    %5 = vector.load %arg4[%c0_4, %c0_5] : memref<256x128xbf16, #tpu.memory_space<vmem>>, vector<256x128xbf16>
    %cst = arith.constant dense<0.000000e+00> : vector<128x128xf32>
    %6 = tpu.matmul %4, %5, %cst {dimension_numbers = #tpu.dot_dimension_numbers<[1], [0], [0], [1], [0, 0, 1, 1], [], []>} : vector<128x256xbf16>, vector<256x128xbf16>, vector<128x128xf32> -> vector<128x128xf32>
    %7 = arith.addf %3, %6 : vector<128x128xf32>
    %c0_6 = arith.constant 0 : index
    %c0_7 = arith.constant 0 : index
    %8 = vector.load %arg7[%c0_6, %c0_7] : memref<128x128xf32, #tpu.memory_space<vmem>>, vector<128x128xf32>
    tpu.vector_store %arg7[%c0_6, %c0_7], %7 {strides = array<i32>} : memref<128x128xf32, #tpu.memory_space<vmem>>, vector<128x128xf32>,
    %c0_i32_8 = arith.constant 0 : i32
    %9 = arith.cmpi eq, %arg2, %c0_i32_8 : i32
    %10 = arith.extui %9 : i1 to i32
    %c0_i32_9 = arith.constant 0 : i32
    %11 = arith.cmpi ne, %10, %c0_i32_9 : i32
    scf.if %11 {
      %c0_10 = arith.constant 0 : index
      %c0_11 = arith.constant 0 : index
      %12 = vector.load %arg7[%c0_10, %c0_11] : memref<128x128xf32, #tpu.memory_space<vmem>>, vector<128x128xf32>
      %c0_12 = arith.constant 0 : index
      %c0_13 = arith.constant 0 : index
      %13 = vector.load %arg5[%c0_12, %c0_13] : memref<1x128xf32, #tpu.memory_space<vmem>>, vector<1x128xf32>
      %14 = vector.broadcast %13 : vector<1x128xf32> to vector<128x128xf32>
      %15 = arith.addf %12, %14 : vector<128x128xf32>
      %cst_14 = arith.constant 0.000000e+00 : f32
      %16 = vector.broadcast %cst_14 : f32 to vector<128x128xf32>
      %17 = arith.maximumf %15, %16 : vector<128x128xf32>
      %18 = arith.truncf %17 : vector<128x128xf32> to vector<128x128xbf16>
      %c0_15 = arith.constant 0 : index
      %c0_16 = arith.constant 0 : index
      %19 = vector.load %arg6[%c0_15, %c0_16] : memref<128x128xbf16, #tpu.memory_space<vmem>>, vector<128x128xbf16>
      tpu.vector_store %arg6[%c0_15, %c0_16], %18 {strides = array<i32>} : memref<128x128xbf16, #tpu.memory_space<vmem>>, vector<128x128xbf16>,
    } else {
    }
    return
  }
  func.func @transform_0(%arg0: i32, %arg1: i32, %arg2: i32) -> (i32, i32) {
    %c0_i32 = arith.constant 0 : i32
    return %arg0, %arg2 : i32, i32
  }
  func.func @transform_1(%arg0: i32, %arg1: i32, %arg2: i32) -> (i32, i32) {
    %c0_i32 = arith.constant 0 : i32
    return %arg2, %arg1 : i32, i32
  }
  func.func @transform_2(%arg0: i32, %arg1: i32, %arg2: i32) -> (i32, i32) {
    %c0_i32 = arith.constant 0 : i32
    %c0_i32_0 = arith.constant 0 : i32
    return %c0_i32, %arg1 : i32, i32
  }
  func.func @transform_3(%arg0: i32, %arg1: i32, %arg2: i32) -> (i32, i32) {
    %c0_i32 = arith.constant 0 : i32
    return %arg0, %arg1 : i32, i32
  }
}

module attributes {stable_mosaic.version = 11 : i64} {
  func.func @_pool_conv_kernel(%arg0: i32, %arg1: i32, %arg2: memref<27x32x128xbf16, #tpu.memory_space<vmem>>, %arg3: memref<128x128xbf16, #tpu.memory_space<vmem>>, %arg4: memref<1x128xf32, #tpu.memory_space<vmem>>, %arg5: memref<32x128xbf16, #tpu.memory_space<vmem>>) attributes {dimension_semantics = [#tpu.dimension_semantics<parallel>, #tpu.dimension_semantics<parallel>], iteration_bounds = array<i64: 1, 1>, scalar_prefetch = 0 : i64, scratch_operands = 0 : i64, tpu.core_type = #tpu.core_type<tc>, window_params = [{transform_indices = @transform_0, window_bounds = array<i64: 27, 32, 128>}, {transform_indices = @transform_1, window_bounds = array<i64: 128, 128>}, {transform_indices = @transform_2, window_bounds = array<i64: 1, 128>}, {transform_indices = @transform_3, window_bounds = array<i64: 32, 128>}]} {
    %c0 = arith.constant 0 : index
    %c0_0 = arith.constant 0 : index
    %c0_1 = arith.constant 0 : index
    %0 = vector.load %arg2[%c0, %c0_0, %c0_1] : memref<27x32x128xbf16, #tpu.memory_space<vmem>>, vector<27x32x128xbf16>
    %cst = arith.constant dense<0xFF80> : vector<32x128xbf16>
    %1 = vector.multi_reduction <maximumf>, %0, %cst [0] : vector<27x32x128xbf16> to vector<32x128xbf16>
    %c0_2 = arith.constant 0 : index
    %c0_3 = arith.constant 0 : index
    %2 = vector.load %arg3[%c0_2, %c0_3] : memref<128x128xbf16, #tpu.memory_space<vmem>>, vector<128x128xbf16>
    %cst_4 = arith.constant dense<0.000000e+00> : vector<32x128xf32>
    %3 = tpu.matmul %1, %2, %cst_4 {dimension_numbers = #tpu.dot_dimension_numbers<[1], [0], [0], [1], [0, 0, 1, 1], [], []>} : vector<32x128xbf16>, vector<128x128xbf16>, vector<32x128xf32> -> vector<32x128xf32>
    %c0_5 = arith.constant 0 : index
    %c0_6 = arith.constant 0 : index
    %4 = vector.load %arg4[%c0_5, %c0_6] : memref<1x128xf32, #tpu.memory_space<vmem>>, vector<1x128xf32>
    %5 = vector.broadcast %4 : vector<1x128xf32> to vector<32x128xf32>
    %6 = arith.addf %3, %5 : vector<32x128xf32>
    %7 = arith.truncf %6 : vector<32x128xf32> to vector<32x128xbf16>
    %c0_7 = arith.constant 0 : index
    %c0_8 = arith.constant 0 : index
    %8 = vector.load %arg5[%c0_7, %c0_8] : memref<32x128xbf16, #tpu.memory_space<vmem>>, vector<32x128xbf16>
    tpu.vector_store %arg5[%c0_7, %c0_8], %7 {strides = array<i32>} : memref<32x128xbf16, #tpu.memory_space<vmem>>, vector<32x128xbf16>,
    return
  }
  func.func @transform_0(%arg0: i32, %arg1: i32) -> (i32, i32, i32) {
    %c0_i32 = arith.constant 0 : i32
    %c0_i32_0 = arith.constant 0 : i32
    %c0_i32_1 = arith.constant 0 : i32
    return %c0_i32, %arg0, %c0_i32_0 : i32, i32, i32
  }
  func.func @transform_1(%arg0: i32, %arg1: i32) -> (i32, i32) {
    %c0_i32 = arith.constant 0 : i32
    %c0_i32_0 = arith.constant 0 : i32
    return %c0_i32, %arg1 : i32, i32
  }
  func.func @transform_2(%arg0: i32, %arg1: i32) -> (i32, i32) {
    %c0_i32 = arith.constant 0 : i32
    %c0_i32_0 = arith.constant 0 : i32
    return %c0_i32, %arg1 : i32, i32
  }
  func.func @transform_3(%arg0: i32, %arg1: i32) -> (i32, i32) {
    %c0_i32 = arith.constant 0 : i32
    return %arg0, %arg1 : i32, i32
  }
}

module attributes {stable_mosaic.version = 11 : i64} {
  func.func @_gemm_bn_kernel(%arg0: i32, %arg1: i32, %arg2: i32, %arg3: memref<32x256xbf16, #tpu.memory_space<vmem>>, %arg4: memref<256x128xbf16, #tpu.memory_space<vmem>>, %arg5: memref<1x128xf32, #tpu.memory_space<vmem>>, %arg6: memref<32x128xbf16, #tpu.memory_space<vmem>>, %arg7: memref<32x128xf32, #tpu.memory_space<vmem>>) attributes {dimension_semantics = [#tpu.dimension_semantics<parallel>, #tpu.dimension_semantics<parallel>, #tpu.dimension_semantics<arbitrary>], iteration_bounds = array<i64: 1, 1, 1>, scalar_prefetch = 0 : i64, scratch_operands = 1 : i64, tpu.core_type = #tpu.core_type<tc>, window_params = [{transform_indices = @transform_0, window_bounds = array<i64: 32, 256>}, {transform_indices = @transform_1, window_bounds = array<i64: 256, 128>}, {transform_indices = @transform_2, window_bounds = array<i64: 1, 128>}, {transform_indices = @transform_3, window_bounds = array<i64: 32, 128>}]} {
    %c0_i32 = arith.constant 0 : i32
    %0 = arith.cmpi eq, %arg2, %c0_i32 : i32
    %1 = arith.extui %0 : i1 to i32
    %c0_i32_0 = arith.constant 0 : i32
    %2 = arith.cmpi ne, %1, %c0_i32_0 : i32
    scf.if %2 {
      %cst_10 = arith.constant 0.000000e+00 : f32
      %12 = vector.broadcast %cst_10 : f32 to vector<32x128xf32>
      %c0_11 = arith.constant 0 : index
      %c0_12 = arith.constant 0 : index
      %13 = vector.load %arg7[%c0_11, %c0_12] : memref<32x128xf32, #tpu.memory_space<vmem>>, vector<32x128xf32>
      tpu.vector_store %arg7[%c0_11, %c0_12], %12 {strides = array<i32>} : memref<32x128xf32, #tpu.memory_space<vmem>>, vector<32x128xf32>,
    } else {
    }
    %c0 = arith.constant 0 : index
    %c0_1 = arith.constant 0 : index
    %3 = vector.load %arg7[%c0, %c0_1] : memref<32x128xf32, #tpu.memory_space<vmem>>, vector<32x128xf32>
    %c0_2 = arith.constant 0 : index
    %c0_3 = arith.constant 0 : index
    %4 = vector.load %arg3[%c0_2, %c0_3] : memref<32x256xbf16, #tpu.memory_space<vmem>>, vector<32x256xbf16>
    %c0_4 = arith.constant 0 : index
    %c0_5 = arith.constant 0 : index
    %5 = vector.load %arg4[%c0_4, %c0_5] : memref<256x128xbf16, #tpu.memory_space<vmem>>, vector<256x128xbf16>
    %cst = arith.constant dense<0.000000e+00> : vector<32x128xf32>
    %6 = tpu.matmul %4, %5, %cst {dimension_numbers = #tpu.dot_dimension_numbers<[1], [0], [0], [1], [0, 0, 1, 1], [], []>} : vector<32x256xbf16>, vector<256x128xbf16>, vector<32x128xf32> -> vector<32x128xf32>
    %7 = arith.addf %3, %6 : vector<32x128xf32>
    %c0_6 = arith.constant 0 : index
    %c0_7 = arith.constant 0 : index
    %8 = vector.load %arg7[%c0_6, %c0_7] : memref<32x128xf32, #tpu.memory_space<vmem>>, vector<32x128xf32>
    tpu.vector_store %arg7[%c0_6, %c0_7], %7 {strides = array<i32>} : memref<32x128xf32, #tpu.memory_space<vmem>>, vector<32x128xf32>,
    %c0_i32_8 = arith.constant 0 : i32
    %9 = arith.cmpi eq, %arg2, %c0_i32_8 : i32
    %10 = arith.extui %9 : i1 to i32
    %c0_i32_9 = arith.constant 0 : i32
    %11 = arith.cmpi ne, %10, %c0_i32_9 : i32
    scf.if %11 {
      %c0_10 = arith.constant 0 : index
      %c0_11 = arith.constant 0 : index
      %12 = vector.load %arg7[%c0_10, %c0_11] : memref<32x128xf32, #tpu.memory_space<vmem>>, vector<32x128xf32>
      %c0_12 = arith.constant 0 : index
      %c0_13 = arith.constant 0 : index
      %13 = vector.load %arg5[%c0_12, %c0_13] : memref<1x128xf32, #tpu.memory_space<vmem>>, vector<1x128xf32>
      %14 = vector.broadcast %13 : vector<1x128xf32> to vector<32x128xf32>
      %15 = arith.addf %12, %14 : vector<32x128xf32>
      %cst_14 = arith.constant 0.000000e+00 : f32
      %16 = vector.broadcast %cst_14 : f32 to vector<32x128xf32>
      %17 = arith.maximumf %15, %16 : vector<32x128xf32>
      %18 = arith.truncf %17 : vector<32x128xf32> to vector<32x128xbf16>
      %c0_15 = arith.constant 0 : index
      %c0_16 = arith.constant 0 : index
      %19 = vector.load %arg6[%c0_15, %c0_16] : memref<32x128xbf16, #tpu.memory_space<vmem>>, vector<32x128xbf16>
      tpu.vector_store %arg6[%c0_15, %c0_16], %18 {strides = array<i32>} : memref<32x128xbf16, #tpu.memory_space<vmem>>, vector<32x128xbf16>,
    } else {
    }
    return
  }
  func.func @transform_0(%arg0: i32, %arg1: i32, %arg2: i32) -> (i32, i32) {
    %c0_i32 = arith.constant 0 : i32
    return %arg0, %arg2 : i32, i32
  }
  func.func @transform_1(%arg0: i32, %arg1: i32, %arg2: i32) -> (i32, i32) {
    %c0_i32 = arith.constant 0 : i32
    return %arg2, %arg1 : i32, i32
  }
  func.func @transform_2(%arg0: i32, %arg1: i32, %arg2: i32) -> (i32, i32) {
    %c0_i32 = arith.constant 0 : i32
    %c0_i32_0 = arith.constant 0 : i32
    return %c0_i32, %arg1 : i32, i32
  }
  func.func @transform_3(%arg0: i32, %arg1: i32, %arg2: i32) -> (i32, i32) {
    %c0_i32 = arith.constant 0 : i32
    return %arg0, %arg1 : i32, i32
  }
}

module attributes {stable_mosaic.version = 11 : i64} {
  func.func @_gemm_bn_res_kernel(%arg0: i32, %arg1: i32, %arg2: i32, %arg3: memref<32x256xbf16, #tpu.memory_space<vmem>>, %arg4: memref<256x128xbf16, #tpu.memory_space<vmem>>, %arg5: memref<1x128xf32, #tpu.memory_space<vmem>>, %arg6: memref<32x128xbf16, #tpu.memory_space<vmem>>, %arg7: memref<32x128xbf16, #tpu.memory_space<vmem>>, %arg8: memref<32x128xf32, #tpu.memory_space<vmem>>) attributes {dimension_semantics = [#tpu.dimension_semantics<parallel>, #tpu.dimension_semantics<parallel>, #tpu.dimension_semantics<arbitrary>], iteration_bounds = array<i64: 1, 1, 1>, scalar_prefetch = 0 : i64, scratch_operands = 1 : i64, tpu.core_type = #tpu.core_type<tc>, window_params = [{transform_indices = @transform_0, window_bounds = array<i64: 32, 256>}, {transform_indices = @transform_1, window_bounds = array<i64: 256, 128>}, {transform_indices = @transform_2, window_bounds = array<i64: 1, 128>}, {transform_indices = @transform_3, window_bounds = array<i64: 32, 128>}, {transform_indices = @transform_4, window_bounds = array<i64: 32, 128>}]} {
    %c0_i32 = arith.constant 0 : i32
    %0 = arith.cmpi eq, %arg2, %c0_i32 : i32
    %1 = arith.extui %0 : i1 to i32
    %c0_i32_0 = arith.constant 0 : i32
    %2 = arith.cmpi ne, %1, %c0_i32_0 : i32
    scf.if %2 {
      %cst_10 = arith.constant 0.000000e+00 : f32
      %12 = vector.broadcast %cst_10 : f32 to vector<32x128xf32>
      %c0_11 = arith.constant 0 : index
      %c0_12 = arith.constant 0 : index
      %13 = vector.load %arg8[%c0_11, %c0_12] : memref<32x128xf32, #tpu.memory_space<vmem>>, vector<32x128xf32>
      tpu.vector_store %arg8[%c0_11, %c0_12], %12 {strides = array<i32>} : memref<32x128xf32, #tpu.memory_space<vmem>>, vector<32x128xf32>,
    } else {
    }
    %c0 = arith.constant 0 : index
    %c0_1 = arith.constant 0 : index
    %3 = vector.load %arg8[%c0, %c0_1] : memref<32x128xf32, #tpu.memory_space<vmem>>, vector<32x128xf32>
    %c0_2 = arith.constant 0 : index
    %c0_3 = arith.constant 0 : index
    %4 = vector.load %arg3[%c0_2, %c0_3] : memref<32x256xbf16, #tpu.memory_space<vmem>>, vector<32x256xbf16>
    %c0_4 = arith.constant 0 : index
    %c0_5 = arith.constant 0 : index
    %5 = vector.load %arg4[%c0_4, %c0_5] : memref<256x128xbf16, #tpu.memory_space<vmem>>, vector<256x128xbf16>
    %cst = arith.constant dense<0.000000e+00> : vector<32x128xf32>
    %6 = tpu.matmul %4, %5, %cst {dimension_numbers = #tpu.dot_dimension_numbers<[1], [0], [0], [1], [0, 0, 1, 1], [], []>} : vector<32x256xbf16>, vector<256x128xbf16>, vector<32x128xf32> -> vector<32x128xf32>
    %7 = arith.addf %3, %6 : vector<32x128xf32>
    %c0_6 = arith.constant 0 : index
    %c0_7 = arith.constant 0 : index
    %8 = vector.load %arg8[%c0_6, %c0_7] : memref<32x128xf32, #tpu.memory_space<vmem>>, vector<32x128xf32>
    tpu.vector_store %arg8[%c0_6, %c0_7], %7 {strides = array<i32>} : memref<32x128xf32, #tpu.memory_space<vmem>>, vector<32x128xf32>,
    %c0_i32_8 = arith.constant 0 : i32
    %9 = arith.cmpi eq, %arg2, %c0_i32_8 : i32
    %10 = arith.extui %9 : i1 to i32
    %c0_i32_9 = arith.constant 0 : i32
    %11 = arith.cmpi ne, %10, %c0_i32_9 : i32
    scf.if %11 {
      %c0_10 = arith.constant 0 : index
      %c0_11 = arith.constant 0 : index
      %12 = vector.load %arg8[%c0_10, %c0_11] : memref<32x128xf32, #tpu.memory_space<vmem>>, vector<32x128xf32>
      %c0_12 = arith.constant 0 : index
      %c0_13 = arith.constant 0 : index
      %13 = vector.load %arg5[%c0_12, %c0_13] : memref<1x128xf32, #tpu.memory_space<vmem>>, vector<1x128xf32>
      %14 = vector.broadcast %13 : vector<1x128xf32> to vector<32x128xf32>
      %15 = arith.addf %12, %14 : vector<32x128xf32>
      %c0_14 = arith.constant 0 : index
      %c0_15 = arith.constant 0 : index
      %16 = vector.load %arg6[%c0_14, %c0_15] : memref<32x128xbf16, #tpu.memory_space<vmem>>, vector<32x128xbf16>
      %17 = arith.extf %16 : vector<32x128xbf16> to vector<32x128xf32>
      %18 = arith.addf %15, %17 : vector<32x128xf32>
      %19 = arith.truncf %18 : vector<32x128xf32> to vector<32x128xbf16>
      %c0_16 = arith.constant 0 : index
      %c0_17 = arith.constant 0 : index
      %20 = vector.load %arg7[%c0_16, %c0_17] : memref<32x128xbf16, #tpu.memory_space<vmem>>, vector<32x128xbf16>
      tpu.vector_store %arg7[%c0_16, %c0_17], %19 {strides = array<i32>} : memref<32x128xbf16, #tpu.memory_space<vmem>>, vector<32x128xbf16>,
    } else {
    }
    return
  }
  func.func @transform_0(%arg0: i32, %arg1: i32, %arg2: i32) -> (i32, i32) {
    %c0_i32 = arith.constant 0 : i32
    return %arg0, %arg2 : i32, i32
  }
  func.func @transform_1(%arg0: i32, %arg1: i32, %arg2: i32) -> (i32, i32) {
    %c0_i32 = arith.constant 0 : i32
    return %arg2, %arg1 : i32, i32
  }
  func.func @transform_2(%arg0: i32, %arg1: i32, %arg2: i32) -> (i32, i32) {
    %c0_i32 = arith.constant 0 : i32
    %c0_i32_0 = arith.constant 0 : i32
    return %c0_i32, %arg1 : i32, i32
  }
  func.func @transform_3(%arg0: i32, %arg1: i32, %arg2: i32) -> (i32, i32) {
    %c0_i32 = arith.constant 0 : i32
    return %arg0, %arg1 : i32, i32
  }
  func.func @transform_4(%arg0: i32, %arg1: i32, %arg2: i32) -> (i32, i32) {
    %c0_i32 = arith.constant 0 : i32
    return %arg0, %arg1 : i32, i32
  }
}

module attributes {stable_mosaic.version = 11 : i64} {
  func.func @_pool_conv_kernel(%arg0: i32, %arg1: i32, %arg2: memref<27x16x128xbf16, #tpu.memory_space<vmem>>, %arg3: memref<128x128xbf16, #tpu.memory_space<vmem>>, %arg4: memref<1x128xf32, #tpu.memory_space<vmem>>, %arg5: memref<16x128xbf16, #tpu.memory_space<vmem>>) attributes {dimension_semantics = [#tpu.dimension_semantics<parallel>, #tpu.dimension_semantics<parallel>], iteration_bounds = array<i64: 1, 1>, scalar_prefetch = 0 : i64, scratch_operands = 0 : i64, tpu.core_type = #tpu.core_type<tc>, window_params = [{transform_indices = @transform_0, window_bounds = array<i64: 27, 16, 128>}, {transform_indices = @transform_1, window_bounds = array<i64: 128, 128>}, {transform_indices = @transform_2, window_bounds = array<i64: 1, 128>}, {transform_indices = @transform_3, window_bounds = array<i64: 16, 128>}]} {
    %c0 = arith.constant 0 : index
    %c0_0 = arith.constant 0 : index
    %c0_1 = arith.constant 0 : index
    %0 = vector.load %arg2[%c0, %c0_0, %c0_1] : memref<27x16x128xbf16, #tpu.memory_space<vmem>>, vector<27x16x128xbf16>
    %cst = arith.constant dense<0xFF80> : vector<16x128xbf16>
    %1 = vector.multi_reduction <maximumf>, %0, %cst [0] : vector<27x16x128xbf16> to vector<16x128xbf16>
    %c0_2 = arith.constant 0 : index
    %c0_3 = arith.constant 0 : index
    %2 = vector.load %arg3[%c0_2, %c0_3] : memref<128x128xbf16, #tpu.memory_space<vmem>>, vector<128x128xbf16>
    %cst_4 = arith.constant dense<0.000000e+00> : vector<16x128xf32>
    %3 = tpu.matmul %1, %2, %cst_4 {dimension_numbers = #tpu.dot_dimension_numbers<[1], [0], [0], [1], [0, 0, 1, 1], [], []>} : vector<16x128xbf16>, vector<128x128xbf16>, vector<16x128xf32> -> vector<16x128xf32>
    %c0_5 = arith.constant 0 : index
    %c0_6 = arith.constant 0 : index
    %4 = vector.load %arg4[%c0_5, %c0_6] : memref<1x128xf32, #tpu.memory_space<vmem>>, vector<1x128xf32>
    %5 = vector.broadcast %4 : vector<1x128xf32> to vector<16x128xf32>
    %6 = arith.addf %3, %5 : vector<16x128xf32>
    %7 = arith.truncf %6 : vector<16x128xf32> to vector<16x128xbf16>
    %c0_7 = arith.constant 0 : index
    %c0_8 = arith.constant 0 : index
    %8 = vector.load %arg5[%c0_7, %c0_8] : memref<16x128xbf16, #tpu.memory_space<vmem>>, vector<16x128xbf16>
    tpu.vector_store %arg5[%c0_7, %c0_8], %7 {strides = array<i32>} : memref<16x128xbf16, #tpu.memory_space<vmem>>, vector<16x128xbf16>,
    return
  }
  func.func @transform_0(%arg0: i32, %arg1: i32) -> (i32, i32, i32) {
    %c0_i32 = arith.constant 0 : i32
    %c0_i32_0 = arith.constant 0 : i32
    %c0_i32_1 = arith.constant 0 : i32
    return %c0_i32, %arg0, %c0_i32_0 : i32, i32, i32
  }
  func.func @transform_1(%arg0: i32, %arg1: i32) -> (i32, i32) {
    %c0_i32 = arith.constant 0 : i32
    %c0_i32_0 = arith.constant 0 : i32
    return %c0_i32, %arg1 : i32, i32
  }
  func.func @transform_2(%arg0: i32, %arg1: i32) -> (i32, i32) {
    %c0_i32 = arith.constant 0 : i32
    %c0_i32_0 = arith.constant 0 : i32
    return %c0_i32, %arg1 : i32, i32
  }
  func.func @transform_3(%arg0: i32, %arg1: i32) -> (i32, i32) {
    %c0_i32 = arith.constant 0 : i32
    return %arg0, %arg1 : i32, i32
  }
}

module attributes {stable_mosaic.version = 11 : i64} {
  func.func @_gemm_bn_kernel(%arg0: i32, %arg1: i32, %arg2: i32, %arg3: memref<16x256xbf16, #tpu.memory_space<vmem>>, %arg4: memref<256x128xbf16, #tpu.memory_space<vmem>>, %arg5: memref<1x128xf32, #tpu.memory_space<vmem>>, %arg6: memref<16x128xbf16, #tpu.memory_space<vmem>>, %arg7: memref<16x128xf32, #tpu.memory_space<vmem>>) attributes {dimension_semantics = [#tpu.dimension_semantics<parallel>, #tpu.dimension_semantics<parallel>, #tpu.dimension_semantics<arbitrary>], iteration_bounds = array<i64: 1, 1, 1>, scalar_prefetch = 0 : i64, scratch_operands = 1 : i64, tpu.core_type = #tpu.core_type<tc>, window_params = [{transform_indices = @transform_0, window_bounds = array<i64: 16, 256>}, {transform_indices = @transform_1, window_bounds = array<i64: 256, 128>}, {transform_indices = @transform_2, window_bounds = array<i64: 1, 128>}, {transform_indices = @transform_3, window_bounds = array<i64: 16, 128>}]} {
    %c0_i32 = arith.constant 0 : i32
    %0 = arith.cmpi eq, %arg2, %c0_i32 : i32
    %1 = arith.extui %0 : i1 to i32
    %c0_i32_0 = arith.constant 0 : i32
    %2 = arith.cmpi ne, %1, %c0_i32_0 : i32
    scf.if %2 {
      %cst_10 = arith.constant 0.000000e+00 : f32
      %12 = vector.broadcast %cst_10 : f32 to vector<16x128xf32>
      %c0_11 = arith.constant 0 : index
      %c0_12 = arith.constant 0 : index
      %13 = vector.load %arg7[%c0_11, %c0_12] : memref<16x128xf32, #tpu.memory_space<vmem>>, vector<16x128xf32>
      tpu.vector_store %arg7[%c0_11, %c0_12], %12 {strides = array<i32>} : memref<16x128xf32, #tpu.memory_space<vmem>>, vector<16x128xf32>,
    } else {
    }
    %c0 = arith.constant 0 : index
    %c0_1 = arith.constant 0 : index
    %3 = vector.load %arg7[%c0, %c0_1] : memref<16x128xf32, #tpu.memory_space<vmem>>, vector<16x128xf32>
    %c0_2 = arith.constant 0 : index
    %c0_3 = arith.constant 0 : index
    %4 = vector.load %arg3[%c0_2, %c0_3] : memref<16x256xbf16, #tpu.memory_space<vmem>>, vector<16x256xbf16>
    %c0_4 = arith.constant 0 : index
    %c0_5 = arith.constant 0 : index
    %5 = vector.load %arg4[%c0_4, %c0_5] : memref<256x128xbf16, #tpu.memory_space<vmem>>, vector<256x128xbf16>
    %cst = arith.constant dense<0.000000e+00> : vector<16x128xf32>
    %6 = tpu.matmul %4, %5, %cst {dimension_numbers = #tpu.dot_dimension_numbers<[1], [0], [0], [1], [0, 0, 1, 1], [], []>} : vector<16x256xbf16>, vector<256x128xbf16>, vector<16x128xf32> -> vector<16x128xf32>
    %7 = arith.addf %3, %6 : vector<16x128xf32>
    %c0_6 = arith.constant 0 : index
    %c0_7 = arith.constant 0 : index
    %8 = vector.load %arg7[%c0_6, %c0_7] : memref<16x128xf32, #tpu.memory_space<vmem>>, vector<16x128xf32>
    tpu.vector_store %arg7[%c0_6, %c0_7], %7 {strides = array<i32>} : memref<16x128xf32, #tpu.memory_space<vmem>>, vector<16x128xf32>,
    %c0_i32_8 = arith.constant 0 : i32
    %9 = arith.cmpi eq, %arg2, %c0_i32_8 : i32
    %10 = arith.extui %9 : i1 to i32
    %c0_i32_9 = arith.constant 0 : i32
    %11 = arith.cmpi ne, %10, %c0_i32_9 : i32
    scf.if %11 {
      %c0_10 = arith.constant 0 : index
      %c0_11 = arith.constant 0 : index
      %12 = vector.load %arg7[%c0_10, %c0_11] : memref<16x128xf32, #tpu.memory_space<vmem>>, vector<16x128xf32>
      %c0_12 = arith.constant 0 : index
      %c0_13 = arith.constant 0 : index
      %13 = vector.load %arg5[%c0_12, %c0_13] : memref<1x128xf32, #tpu.memory_space<vmem>>, vector<1x128xf32>
      %14 = vector.broadcast %13 : vector<1x128xf32> to vector<16x128xf32>
      %15 = arith.addf %12, %14 : vector<16x128xf32>
      %cst_14 = arith.constant 0.000000e+00 : f32
      %16 = vector.broadcast %cst_14 : f32 to vector<16x128xf32>
      %17 = arith.maximumf %15, %16 : vector<16x128xf32>
      %18 = arith.truncf %17 : vector<16x128xf32> to vector<16x128xbf16>
      %c0_15 = arith.constant 0 : index
      %c0_16 = arith.constant 0 : index
      %19 = vector.load %arg6[%c0_15, %c0_16] : memref<16x128xbf16, #tpu.memory_space<vmem>>, vector<16x128xbf16>
      tpu.vector_store %arg6[%c0_15, %c0_16], %18 {strides = array<i32>} : memref<16x128xbf16, #tpu.memory_space<vmem>>, vector<16x128xbf16>,
    } else {
    }
    return
  }
  func.func @transform_0(%arg0: i32, %arg1: i32, %arg2: i32) -> (i32, i32) {
    %c0_i32 = arith.constant 0 : i32
    return %arg0, %arg2 : i32, i32
  }
  func.func @transform_1(%arg0: i32, %arg1: i32, %arg2: i32) -> (i32, i32) {
    %c0_i32 = arith.constant 0 : i32
    return %arg2, %arg1 : i32, i32
  }
  func.func @transform_2(%arg0: i32, %arg1: i32, %arg2: i32) -> (i32, i32) {
    %c0_i32 = arith.constant 0 : i32
    %c0_i32_0 = arith.constant 0 : i32
    return %c0_i32, %arg1 : i32, i32
  }
  func.func @transform_3(%arg0: i32, %arg1: i32, %arg2: i32) -> (i32, i32) {
    %c0_i32 = arith.constant 0 : i32
    return %arg0, %arg1 : i32, i32
  }
}

module attributes {stable_mosaic.version = 11 : i64} {
  func.func @_gemm_bn_kernel(%arg0: i32, %arg1: i32, %arg2: i32, %arg3: memref<16x512xbf16, #tpu.memory_space<vmem>>, %arg4: memref<512x128xbf16, #tpu.memory_space<vmem>>, %arg5: memref<1x128xf32, #tpu.memory_space<vmem>>, %arg6: memref<16x128xbf16, #tpu.memory_space<vmem>>, %arg7: memref<16x128xf32, #tpu.memory_space<vmem>>) attributes {dimension_semantics = [#tpu.dimension_semantics<parallel>, #tpu.dimension_semantics<parallel>, #tpu.dimension_semantics<arbitrary>], iteration_bounds = array<i64: 1, 1, 1>, scalar_prefetch = 0 : i64, scratch_operands = 1 : i64, tpu.core_type = #tpu.core_type<tc>, window_params = [{transform_indices = @transform_0, window_bounds = array<i64: 16, 512>}, {transform_indices = @transform_1, window_bounds = array<i64: 512, 128>}, {transform_indices = @transform_2, window_bounds = array<i64: 1, 128>}, {transform_indices = @transform_3, window_bounds = array<i64: 16, 128>}]} {
    %c0_i32 = arith.constant 0 : i32
    %0 = arith.cmpi eq, %arg2, %c0_i32 : i32
    %1 = arith.extui %0 : i1 to i32
    %c0_i32_0 = arith.constant 0 : i32
    %2 = arith.cmpi ne, %1, %c0_i32_0 : i32
    scf.if %2 {
      %cst_10 = arith.constant 0.000000e+00 : f32
      %12 = vector.broadcast %cst_10 : f32 to vector<16x128xf32>
      %c0_11 = arith.constant 0 : index
      %c0_12 = arith.constant 0 : index
      %13 = vector.load %arg7[%c0_11, %c0_12] : memref<16x128xf32, #tpu.memory_space<vmem>>, vector<16x128xf32>
      tpu.vector_store %arg7[%c0_11, %c0_12], %12 {strides = array<i32>} : memref<16x128xf32, #tpu.memory_space<vmem>>, vector<16x128xf32>,
    } else {
    }
    %c0 = arith.constant 0 : index
    %c0_1 = arith.constant 0 : index
    %3 = vector.load %arg7[%c0, %c0_1] : memref<16x128xf32, #tpu.memory_space<vmem>>, vector<16x128xf32>
    %c0_2 = arith.constant 0 : index
    %c0_3 = arith.constant 0 : index
    %4 = vector.load %arg3[%c0_2, %c0_3] : memref<16x512xbf16, #tpu.memory_space<vmem>>, vector<16x512xbf16>
    %c0_4 = arith.constant 0 : index
    %c0_5 = arith.constant 0 : index
    %5 = vector.load %arg4[%c0_4, %c0_5] : memref<512x128xbf16, #tpu.memory_space<vmem>>, vector<512x128xbf16>
    %cst = arith.constant dense<0.000000e+00> : vector<16x128xf32>
    %6 = tpu.matmul %4, %5, %cst {dimension_numbers = #tpu.dot_dimension_numbers<[1], [0], [0], [1], [0, 0, 1, 1], [], []>} : vector<16x512xbf16>, vector<512x128xbf16>, vector<16x128xf32> -> vector<16x128xf32>
    %7 = arith.addf %3, %6 : vector<16x128xf32>
    %c0_6 = arith.constant 0 : index
    %c0_7 = arith.constant 0 : index
    %8 = vector.load %arg7[%c0_6, %c0_7] : memref<16x128xf32, #tpu.memory_space<vmem>>, vector<16x128xf32>
    tpu.vector_store %arg7[%c0_6, %c0_7], %7 {strides = array<i32>} : memref<16x128xf32, #tpu.memory_space<vmem>>, vector<16x128xf32>,
    %c0_i32_8 = arith.constant 0 : i32
    %9 = arith.cmpi eq, %arg2, %c0_i32_8 : i32
    %10 = arith.extui %9 : i1 to i32
    %c0_i32_9 = arith.constant 0 : i32
    %11 = arith.cmpi ne, %10, %c0_i32_9 : i32
    scf.if %11 {
      %c0_10 = arith.constant 0 : index
      %c0_11 = arith.constant 0 : index
      %12 = vector.load %arg7[%c0_10, %c0_11] : memref<16x128xf32, #tpu.memory_space<vmem>>, vector<16x128xf32>
      %c0_12 = arith.constant 0 : index
      %c0_13 = arith.constant 0 : index
      %13 = vector.load %arg5[%c0_12, %c0_13] : memref<1x128xf32, #tpu.memory_space<vmem>>, vector<1x128xf32>
      %14 = vector.broadcast %13 : vector<1x128xf32> to vector<16x128xf32>
      %15 = arith.addf %12, %14 : vector<16x128xf32>
      %cst_14 = arith.constant 0.000000e+00 : f32
      %16 = vector.broadcast %cst_14 : f32 to vector<16x128xf32>
      %17 = arith.maximumf %15, %16 : vector<16x128xf32>
      %18 = arith.truncf %17 : vector<16x128xf32> to vector<16x128xbf16>
      %c0_15 = arith.constant 0 : index
      %c0_16 = arith.constant 0 : index
      %19 = vector.load %arg6[%c0_15, %c0_16] : memref<16x128xbf16, #tpu.memory_space<vmem>>, vector<16x128xbf16>
      tpu.vector_store %arg6[%c0_15, %c0_16], %18 {strides = array<i32>} : memref<16x128xbf16, #tpu.memory_space<vmem>>, vector<16x128xbf16>,
    } else {
    }
    return
  }
  func.func @transform_0(%arg0: i32, %arg1: i32, %arg2: i32) -> (i32, i32) {
    %c0_i32 = arith.constant 0 : i32
    return %arg0, %arg2 : i32, i32
  }
  func.func @transform_1(%arg0: i32, %arg1: i32, %arg2: i32) -> (i32, i32) {
    %c0_i32 = arith.constant 0 : i32
    return %arg2, %arg1 : i32, i32
  }
  func.func @transform_2(%arg0: i32, %arg1: i32, %arg2: i32) -> (i32, i32) {
    %c0_i32 = arith.constant 0 : i32
    %c0_i32_0 = arith.constant 0 : i32
    return %c0_i32, %arg1 : i32, i32
  }
  func.func @transform_3(%arg0: i32, %arg1: i32, %arg2: i32) -> (i32, i32) {
    %c0_i32 = arith.constant 0 : i32
    return %arg0, %arg1 : i32, i32
  }
}

module attributes {stable_mosaic.version = 11 : i64} {
  func.func @_gemm_bn_res_kernel(%arg0: i32, %arg1: i32, %arg2: i32, %arg3: memref<16x512xbf16, #tpu.memory_space<vmem>>, %arg4: memref<512x128xbf16, #tpu.memory_space<vmem>>, %arg5: memref<1x128xf32, #tpu.memory_space<vmem>>, %arg6: memref<16x128xbf16, #tpu.memory_space<vmem>>, %arg7: memref<16x128xbf16, #tpu.memory_space<vmem>>, %arg8: memref<16x128xf32, #tpu.memory_space<vmem>>) attributes {dimension_semantics = [#tpu.dimension_semantics<parallel>, #tpu.dimension_semantics<parallel>, #tpu.dimension_semantics<arbitrary>], iteration_bounds = array<i64: 1, 1, 1>, scalar_prefetch = 0 : i64, scratch_operands = 1 : i64, tpu.core_type = #tpu.core_type<tc>, window_params = [{transform_indices = @transform_0, window_bounds = array<i64: 16, 512>}, {transform_indices = @transform_1, window_bounds = array<i64: 512, 128>}, {transform_indices = @transform_2, window_bounds = array<i64: 1, 128>}, {transform_indices = @transform_3, window_bounds = array<i64: 16, 128>}, {transform_indices = @transform_4, window_bounds = array<i64: 16, 128>}]} {
    %c0_i32 = arith.constant 0 : i32
    %0 = arith.cmpi eq, %arg2, %c0_i32 : i32
    %1 = arith.extui %0 : i1 to i32
    %c0_i32_0 = arith.constant 0 : i32
    %2 = arith.cmpi ne, %1, %c0_i32_0 : i32
    scf.if %2 {
      %cst_10 = arith.constant 0.000000e+00 : f32
      %12 = vector.broadcast %cst_10 : f32 to vector<16x128xf32>
      %c0_11 = arith.constant 0 : index
      %c0_12 = arith.constant 0 : index
      %13 = vector.load %arg8[%c0_11, %c0_12] : memref<16x128xf32, #tpu.memory_space<vmem>>, vector<16x128xf32>
      tpu.vector_store %arg8[%c0_11, %c0_12], %12 {strides = array<i32>} : memref<16x128xf32, #tpu.memory_space<vmem>>, vector<16x128xf32>,
    } else {
    }
    %c0 = arith.constant 0 : index
    %c0_1 = arith.constant 0 : index
    %3 = vector.load %arg8[%c0, %c0_1] : memref<16x128xf32, #tpu.memory_space<vmem>>, vector<16x128xf32>
    %c0_2 = arith.constant 0 : index
    %c0_3 = arith.constant 0 : index
    %4 = vector.load %arg3[%c0_2, %c0_3] : memref<16x512xbf16, #tpu.memory_space<vmem>>, vector<16x512xbf16>
    %c0_4 = arith.constant 0 : index
    %c0_5 = arith.constant 0 : index
    %5 = vector.load %arg4[%c0_4, %c0_5] : memref<512x128xbf16, #tpu.memory_space<vmem>>, vector<512x128xbf16>
    %cst = arith.constant dense<0.000000e+00> : vector<16x128xf32>
    %6 = tpu.matmul %4, %5, %cst {dimension_numbers = #tpu.dot_dimension_numbers<[1], [0], [0], [1], [0, 0, 1, 1], [], []>} : vector<16x512xbf16>, vector<512x128xbf16>, vector<16x128xf32> -> vector<16x128xf32>
    %7 = arith.addf %3, %6 : vector<16x128xf32>
    %c0_6 = arith.constant 0 : index
    %c0_7 = arith.constant 0 : index
    %8 = vector.load %arg8[%c0_6, %c0_7] : memref<16x128xf32, #tpu.memory_space<vmem>>, vector<16x128xf32>
    tpu.vector_store %arg8[%c0_6, %c0_7], %7 {strides = array<i32>} : memref<16x128xf32, #tpu.memory_space<vmem>>, vector<16x128xf32>,
    %c0_i32_8 = arith.constant 0 : i32
    %9 = arith.cmpi eq, %arg2, %c0_i32_8 : i32
    %10 = arith.extui %9 : i1 to i32
    %c0_i32_9 = arith.constant 0 : i32
    %11 = arith.cmpi ne, %10, %c0_i32_9 : i32
    scf.if %11 {
      %c0_10 = arith.constant 0 : index
      %c0_11 = arith.constant 0 : index
      %12 = vector.load %arg8[%c0_10, %c0_11] : memref<16x128xf32, #tpu.memory_space<vmem>>, vector<16x128xf32>
      %c0_12 = arith.constant 0 : index
      %c0_13 = arith.constant 0 : index
      %13 = vector.load %arg5[%c0_12, %c0_13] : memref<1x128xf32, #tpu.memory_space<vmem>>, vector<1x128xf32>
      %14 = vector.broadcast %13 : vector<1x128xf32> to vector<16x128xf32>
      %15 = arith.addf %12, %14 : vector<16x128xf32>
      %c0_14 = arith.constant 0 : index
      %c0_15 = arith.constant 0 : index
      %16 = vector.load %arg6[%c0_14, %c0_15] : memref<16x128xbf16, #tpu.memory_space<vmem>>, vector<16x128xbf16>
      %17 = arith.extf %16 : vector<16x128xbf16> to vector<16x128xf32>
      %18 = arith.addf %15, %17 : vector<16x128xf32>
      %19 = arith.truncf %18 : vector<16x128xf32> to vector<16x128xbf16>
      %c0_16 = arith.constant 0 : index
      %c0_17 = arith.constant 0 : index
      %20 = vector.load %arg7[%c0_16, %c0_17] : memref<16x128xbf16, #tpu.memory_space<vmem>>, vector<16x128xbf16>
      tpu.vector_store %arg7[%c0_16, %c0_17], %19 {strides = array<i32>} : memref<16x128xbf16, #tpu.memory_space<vmem>>, vector<16x128xbf16>,
    } else {
    }
    return
  }
  func.func @transform_0(%arg0: i32, %arg1: i32, %arg2: i32) -> (i32, i32) {
    %c0_i32 = arith.constant 0 : i32
    return %arg0, %arg2 : i32, i32
  }
  func.func @transform_1(%arg0: i32, %arg1: i32, %arg2: i32) -> (i32, i32) {
    %c0_i32 = arith.constant 0 : i32
    return %arg2, %arg1 : i32, i32
  }
  func.func @transform_2(%arg0: i32, %arg1: i32, %arg2: i32) -> (i32, i32) {
    %c0_i32 = arith.constant 0 : i32
    %c0_i32_0 = arith.constant 0 : i32
    return %c0_i32, %arg1 : i32, i32
  }
  func.func @transform_3(%arg0: i32, %arg1: i32, %arg2: i32) -> (i32, i32) {
    %c0_i32 = arith.constant 0 : i32
    return %arg0, %arg1 : i32, i32
  }
  func.func @transform_4(%arg0: i32, %arg1: i32, %arg2: i32) -> (i32, i32) {
    %c0_i32 = arith.constant 0 : i32
    return %arg0, %arg1 : i32, i32
  }
}

module attributes {stable_mosaic.version = 11 : i64} {
  func.func @_gemm_bn_res_kernel(%arg0: i32, %arg1: i32, %arg2: i32, %arg3: memref<16x896xbf16, #tpu.memory_space<vmem>>, %arg4: memref<896x128xbf16, #tpu.memory_space<vmem>>, %arg5: memref<1x128xf32, #tpu.memory_space<vmem>>, %arg6: memref<16x128xbf16, #tpu.memory_space<vmem>>, %arg7: memref<16x128xbf16, #tpu.memory_space<vmem>>, %arg8: memref<16x128xf32, #tpu.memory_space<vmem>>) attributes {dimension_semantics = [#tpu.dimension_semantics<parallel>, #tpu.dimension_semantics<parallel>, #tpu.dimension_semantics<arbitrary>], iteration_bounds = array<i64: 1, 1, 1>, scalar_prefetch = 0 : i64, scratch_operands = 1 : i64, tpu.core_type = #tpu.core_type<tc>, window_params = [{transform_indices = @transform_0, window_bounds = array<i64: 16, 896>}, {transform_indices = @transform_1, window_bounds = array<i64: 896, 128>}, {transform_indices = @transform_2, window_bounds = array<i64: 1, 128>}, {transform_indices = @transform_3, window_bounds = array<i64: 16, 128>}, {transform_indices = @transform_4, window_bounds = array<i64: 16, 128>}]} {
    %c0_i32 = arith.constant 0 : i32
    %0 = arith.cmpi eq, %arg2, %c0_i32 : i32
    %1 = arith.extui %0 : i1 to i32
    %c0_i32_0 = arith.constant 0 : i32
    %2 = arith.cmpi ne, %1, %c0_i32_0 : i32
    scf.if %2 {
      %cst_10 = arith.constant 0.000000e+00 : f32
      %12 = vector.broadcast %cst_10 : f32 to vector<16x128xf32>
      %c0_11 = arith.constant 0 : index
      %c0_12 = arith.constant 0 : index
      %13 = vector.load %arg8[%c0_11, %c0_12] : memref<16x128xf32, #tpu.memory_space<vmem>>, vector<16x128xf32>
      tpu.vector_store %arg8[%c0_11, %c0_12], %12 {strides = array<i32>} : memref<16x128xf32, #tpu.memory_space<vmem>>, vector<16x128xf32>,
    } else {
    }
    %c0 = arith.constant 0 : index
    %c0_1 = arith.constant 0 : index
    %3 = vector.load %arg8[%c0, %c0_1] : memref<16x128xf32, #tpu.memory_space<vmem>>, vector<16x128xf32>
    %c0_2 = arith.constant 0 : index
    %c0_3 = arith.constant 0 : index
    %4 = vector.load %arg3[%c0_2, %c0_3] : memref<16x896xbf16, #tpu.memory_space<vmem>>, vector<16x896xbf16>
    %c0_4 = arith.constant 0 : index
    %c0_5 = arith.constant 0 : index
    %5 = vector.load %arg4[%c0_4, %c0_5] : memref<896x128xbf16, #tpu.memory_space<vmem>>, vector<896x128xbf16>
    %cst = arith.constant dense<0.000000e+00> : vector<16x128xf32>
    %6 = tpu.matmul %4, %5, %cst {dimension_numbers = #tpu.dot_dimension_numbers<[1], [0], [0], [1], [0, 0, 1, 1], [], []>} : vector<16x896xbf16>, vector<896x128xbf16>, vector<16x128xf32> -> vector<16x128xf32>
    %7 = arith.addf %3, %6 : vector<16x128xf32>
    %c0_6 = arith.constant 0 : index
    %c0_7 = arith.constant 0 : index
    %8 = vector.load %arg8[%c0_6, %c0_7] : memref<16x128xf32, #tpu.memory_space<vmem>>, vector<16x128xf32>
    tpu.vector_store %arg8[%c0_6, %c0_7], %7 {strides = array<i32>} : memref<16x128xf32, #tpu.memory_space<vmem>>, vector<16x128xf32>,
    %c0_i32_8 = arith.constant 0 : i32
    %9 = arith.cmpi eq, %arg2, %c0_i32_8 : i32
    %10 = arith.extui %9 : i1 to i32
    %c0_i32_9 = arith.constant 0 : i32
    %11 = arith.cmpi ne, %10, %c0_i32_9 : i32
    scf.if %11 {
      %c0_10 = arith.constant 0 : index
      %c0_11 = arith.constant 0 : index
      %12 = vector.load %arg8[%c0_10, %c0_11] : memref<16x128xf32, #tpu.memory_space<vmem>>, vector<16x128xf32>
      %c0_12 = arith.constant 0 : index
      %c0_13 = arith.constant 0 : index
      %13 = vector.load %arg5[%c0_12, %c0_13] : memref<1x128xf32, #tpu.memory_space<vmem>>, vector<1x128xf32>
      %14 = vector.broadcast %13 : vector<1x128xf32> to vector<16x128xf32>
      %15 = arith.addf %12, %14 : vector<16x128xf32>
      %c0_14 = arith.constant 0 : index
      %c0_15 = arith.constant 0 : index
      %16 = vector.load %arg6[%c0_14, %c0_15] : memref<16x128xbf16, #tpu.memory_space<vmem>>, vector<16x128xbf16>
      %17 = arith.extf %16 : vector<16x128xbf16> to vector<16x128xf32>
      %18 = arith.addf %15, %17 : vector<16x128xf32>
      %19 = arith.truncf %18 : vector<16x128xf32> to vector<16x128xbf16>
      %c0_16 = arith.constant 0 : index
      %c0_17 = arith.constant 0 : index
      %20 = vector.load %arg7[%c0_16, %c0_17] : memref<16x128xbf16, #tpu.memory_space<vmem>>, vector<16x128xbf16>
      tpu.vector_store %arg7[%c0_16, %c0_17], %19 {strides = array<i32>} : memref<16x128xbf16, #tpu.memory_space<vmem>>, vector<16x128xbf16>,
    } else {
    }
    return
  }
  func.func @transform_0(%arg0: i32, %arg1: i32, %arg2: i32) -> (i32, i32) {
    %c0_i32 = arith.constant 0 : i32
    return %arg0, %arg2 : i32, i32
  }
  func.func @transform_1(%arg0: i32, %arg1: i32, %arg2: i32) -> (i32, i32) {
    %c0_i32 = arith.constant 0 : i32
    return %arg2, %arg1 : i32, i32
  }
  func.func @transform_2(%arg0: i32, %arg1: i32, %arg2: i32) -> (i32, i32) {
    %c0_i32 = arith.constant 0 : i32
    %c0_i32_0 = arith.constant 0 : i32
    return %c0_i32, %arg1 : i32, i32
  }
  func.func @transform_3(%arg0: i32, %arg1: i32, %arg2: i32) -> (i32, i32) {
    %c0_i32 = arith.constant 0 : i32
    return %arg0, %arg1 : i32, i32
  }
  func.func @transform_4(%arg0: i32, %arg1: i32, %arg2: i32) -> (i32, i32) {
    %c0_i32 = arith.constant 0 : i32
    return %arg0, %arg1 : i32, i32
  }
}

module attributes {stable_mosaic.version = 11 : i64} {
  func.func @_gemm_bn_kernel(%arg0: i32, %arg1: i32, %arg2: i32, %arg3: memref<16x896xbf16, #tpu.memory_space<vmem>>, %arg4: memref<896x128xbf16, #tpu.memory_space<vmem>>, %arg5: memref<1x128xf32, #tpu.memory_space<vmem>>, %arg6: memref<16x128xbf16, #tpu.memory_space<vmem>>, %arg7: memref<16x128xf32, #tpu.memory_space<vmem>>) attributes {dimension_semantics = [#tpu.dimension_semantics<parallel>, #tpu.dimension_semantics<parallel>, #tpu.dimension_semantics<arbitrary>], iteration_bounds = array<i64: 1, 1, 1>, scalar_prefetch = 0 : i64, scratch_operands = 1 : i64, tpu.core_type = #tpu.core_type<tc>, window_params = [{transform_indices = @transform_0, window_bounds = array<i64: 16, 896>}, {transform_indices = @transform_1, window_bounds = array<i64: 896, 128>}, {transform_indices = @transform_2, window_bounds = array<i64: 1, 128>}, {transform_indices = @transform_3, window_bounds = array<i64: 16, 128>}]} {
    %c0_i32 = arith.constant 0 : i32
    %0 = arith.cmpi eq, %arg2, %c0_i32 : i32
    %1 = arith.extui %0 : i1 to i32
    %c0_i32_0 = arith.constant 0 : i32
    %2 = arith.cmpi ne, %1, %c0_i32_0 : i32
    scf.if %2 {
      %cst_10 = arith.constant 0.000000e+00 : f32
      %12 = vector.broadcast %cst_10 : f32 to vector<16x128xf32>
      %c0_11 = arith.constant 0 : index
      %c0_12 = arith.constant 0 : index
      %13 = vector.load %arg7[%c0_11, %c0_12] : memref<16x128xf32, #tpu.memory_space<vmem>>, vector<16x128xf32>
      tpu.vector_store %arg7[%c0_11, %c0_12], %12 {strides = array<i32>} : memref<16x128xf32, #tpu.memory_space<vmem>>, vector<16x128xf32>,
    } else {
    }
    %c0 = arith.constant 0 : index
    %c0_1 = arith.constant 0 : index
    %3 = vector.load %arg7[%c0, %c0_1] : memref<16x128xf32, #tpu.memory_space<vmem>>, vector<16x128xf32>
    %c0_2 = arith.constant 0 : index
    %c0_3 = arith.constant 0 : index
    %4 = vector.load %arg3[%c0_2, %c0_3] : memref<16x896xbf16, #tpu.memory_space<vmem>>, vector<16x896xbf16>
    %c0_4 = arith.constant 0 : index
    %c0_5 = arith.constant 0 : index
    %5 = vector.load %arg4[%c0_4, %c0_5] : memref<896x128xbf16, #tpu.memory_space<vmem>>, vector<896x128xbf16>
    %cst = arith.constant dense<0.000000e+00> : vector<16x128xf32>
    %6 = tpu.matmul %4, %5, %cst {dimension_numbers = #tpu.dot_dimension_numbers<[1], [0], [0], [1], [0, 0, 1, 1], [], []>} : vector<16x896xbf16>, vector<896x128xbf16>, vector<16x128xf32> -> vector<16x128xf32>
    %7 = arith.addf %3, %6 : vector<16x128xf32>
    %c0_6 = arith.constant 0 : index
    %c0_7 = arith.constant 0 : index
    %8 = vector.load %arg7[%c0_6, %c0_7] : memref<16x128xf32, #tpu.memory_space<vmem>>, vector<16x128xf32>
    tpu.vector_store %arg7[%c0_6, %c0_7], %7 {strides = array<i32>} : memref<16x128xf32, #tpu.memory_space<vmem>>, vector<16x128xf32>,
    %c0_i32_8 = arith.constant 0 : i32
    %9 = arith.cmpi eq, %arg2, %c0_i32_8 : i32
    %10 = arith.extui %9 : i1 to i32
    %c0_i32_9 = arith.constant 0 : i32
    %11 = arith.cmpi ne, %10, %c0_i32_9 : i32
    scf.if %11 {
      %c0_10 = arith.constant 0 : index
      %c0_11 = arith.constant 0 : index
      %12 = vector.load %arg7[%c0_10, %c0_11] : memref<16x128xf32, #tpu.memory_space<vmem>>, vector<16x128xf32>
      %c0_12 = arith.constant 0 : index
      %c0_13 = arith.constant 0 : index
      %13 = vector.load %arg5[%c0_12, %c0_13] : memref<1x128xf32, #tpu.memory_space<vmem>>, vector<1x128xf32>
      %14 = vector.broadcast %13 : vector<1x128xf32> to vector<16x128xf32>
      %15 = arith.addf %12, %14 : vector<16x128xf32>
      %cst_14 = arith.constant 0.000000e+00 : f32
      %16 = vector.broadcast %cst_14 : f32 to vector<16x128xf32>
      %17 = arith.maximumf %15, %16 : vector<16x128xf32>
      %18 = arith.truncf %17 : vector<16x128xf32> to vector<16x128xbf16>
      %c0_15 = arith.constant 0 : index
      %c0_16 = arith.constant 0 : index
      %19 = vector.load %arg6[%c0_15, %c0_16] : memref<16x128xbf16, #tpu.memory_space<vmem>>, vector<16x128xbf16>
      tpu.vector_store %arg6[%c0_15, %c0_16], %18 {strides = array<i32>} : memref<16x128xbf16, #tpu.memory_space<vmem>>, vector<16x128xbf16>,
    } else {
    }
    return
  }
  func.func @transform_0(%arg0: i32, %arg1: i32, %arg2: i32) -> (i32, i32) {
    %c0_i32 = arith.constant 0 : i32
    return %arg0, %arg2 : i32, i32
  }
  func.func @transform_1(%arg0: i32, %arg1: i32, %arg2: i32) -> (i32, i32) {
    %c0_i32 = arith.constant 0 : i32
    return %arg2, %arg1 : i32, i32
  }
  func.func @transform_2(%arg0: i32, %arg1: i32, %arg2: i32) -> (i32, i32) {
    %c0_i32 = arith.constant 0 : i32
    %c0_i32_0 = arith.constant 0 : i32
    return %c0_i32, %arg1 : i32, i32
  }
  func.func @transform_3(%arg0: i32, %arg1: i32, %arg2: i32) -> (i32, i32) {
    %c0_i32 = arith.constant 0 : i32
    return %arg0, %arg1 : i32, i32
  }
}

module attributes {stable_mosaic.version = 11 : i64} {
  func.func @_gemm_bn_res_kernel(%arg0: i32, %arg1: i32, %arg2: i32, %arg3: memref<16x1792xbf16, #tpu.memory_space<vmem>>, %arg4: memref<1792x128xbf16, #tpu.memory_space<vmem>>, %arg5: memref<1x128xf32, #tpu.memory_space<vmem>>, %arg6: memref<16x128xbf16, #tpu.memory_space<vmem>>, %arg7: memref<16x128xbf16, #tpu.memory_space<vmem>>, %arg8: memref<16x128xf32, #tpu.memory_space<vmem>>) attributes {dimension_semantics = [#tpu.dimension_semantics<parallel>, #tpu.dimension_semantics<parallel>, #tpu.dimension_semantics<arbitrary>], iteration_bounds = array<i64: 1, 1, 1>, scalar_prefetch = 0 : i64, scratch_operands = 1 : i64, tpu.core_type = #tpu.core_type<tc>, window_params = [{transform_indices = @transform_0, window_bounds = array<i64: 16, 1792>}, {transform_indices = @transform_1, window_bounds = array<i64: 1792, 128>}, {transform_indices = @transform_2, window_bounds = array<i64: 1, 128>}, {transform_indices = @transform_3, window_bounds = array<i64: 16, 128>}, {transform_indices = @transform_4, window_bounds = array<i64: 16, 128>}]} {
    %c0_i32 = arith.constant 0 : i32
    %0 = arith.cmpi eq, %arg2, %c0_i32 : i32
    %1 = arith.extui %0 : i1 to i32
    %c0_i32_0 = arith.constant 0 : i32
    %2 = arith.cmpi ne, %1, %c0_i32_0 : i32
    scf.if %2 {
      %cst_10 = arith.constant 0.000000e+00 : f32
      %12 = vector.broadcast %cst_10 : f32 to vector<16x128xf32>
      %c0_11 = arith.constant 0 : index
      %c0_12 = arith.constant 0 : index
      %13 = vector.load %arg8[%c0_11, %c0_12] : memref<16x128xf32, #tpu.memory_space<vmem>>, vector<16x128xf32>
      tpu.vector_store %arg8[%c0_11, %c0_12], %12 {strides = array<i32>} : memref<16x128xf32, #tpu.memory_space<vmem>>, vector<16x128xf32>,
    } else {
    }
    %c0 = arith.constant 0 : index
    %c0_1 = arith.constant 0 : index
    %3 = vector.load %arg8[%c0, %c0_1] : memref<16x128xf32, #tpu.memory_space<vmem>>, vector<16x128xf32>
    %c0_2 = arith.constant 0 : index
    %c0_3 = arith.constant 0 : index
    %4 = vector.load %arg3[%c0_2, %c0_3] : memref<16x1792xbf16, #tpu.memory_space<vmem>>, vector<16x1792xbf16>
    %c0_4 = arith.constant 0 : index
    %c0_5 = arith.constant 0 : index
    %5 = vector.load %arg4[%c0_4, %c0_5] : memref<1792x128xbf16, #tpu.memory_space<vmem>>, vector<1792x128xbf16>
    %cst = arith.constant dense<0.000000e+00> : vector<16x128xf32>
    %6 = tpu.matmul %4, %5, %cst {dimension_numbers = #tpu.dot_dimension_numbers<[1], [0], [0], [1], [0, 0, 1, 1], [], []>} : vector<16x1792xbf16>, vector<1792x128xbf16>, vector<16x128xf32> -> vector<16x128xf32>
    %7 = arith.addf %3, %6 : vector<16x128xf32>
    %c0_6 = arith.constant 0 : index
    %c0_7 = arith.constant 0 : index
    %8 = vector.load %arg8[%c0_6, %c0_7] : memref<16x128xf32, #tpu.memory_space<vmem>>, vector<16x128xf32>
    tpu.vector_store %arg8[%c0_6, %c0_7], %7 {strides = array<i32>} : memref<16x128xf32, #tpu.memory_space<vmem>>, vector<16x128xf32>,
    %c0_i32_8 = arith.constant 0 : i32
    %9 = arith.cmpi eq, %arg2, %c0_i32_8 : i32
    %10 = arith.extui %9 : i1 to i32
    %c0_i32_9 = arith.constant 0 : i32
    %11 = arith.cmpi ne, %10, %c0_i32_9 : i32
    scf.if %11 {
      %c0_10 = arith.constant 0 : index
      %c0_11 = arith.constant 0 : index
      %12 = vector.load %arg8[%c0_10, %c0_11] : memref<16x128xf32, #tpu.memory_space<vmem>>, vector<16x128xf32>
      %c0_12 = arith.constant 0 : index
      %c0_13 = arith.constant 0 : index
      %13 = vector.load %arg5[%c0_12, %c0_13] : memref<1x128xf32, #tpu.memory_space<vmem>>, vector<1x128xf32>
      %14 = vector.broadcast %13 : vector<1x128xf32> to vector<16x128xf32>
      %15 = arith.addf %12, %14 : vector<16x128xf32>
      %c0_14 = arith.constant 0 : index
      %c0_15 = arith.constant 0 : index
      %16 = vector.load %arg6[%c0_14, %c0_15] : memref<16x128xbf16, #tpu.memory_space<vmem>>, vector<16x128xbf16>
      %17 = arith.extf %16 : vector<16x128xbf16> to vector<16x128xf32>
      %18 = arith.addf %15, %17 : vector<16x128xf32>
      %19 = arith.truncf %18 : vector<16x128xf32> to vector<16x128xbf16>
      %c0_16 = arith.constant 0 : index
      %c0_17 = arith.constant 0 : index
      %20 = vector.load %arg7[%c0_16, %c0_17] : memref<16x128xbf16, #tpu.memory_space<vmem>>, vector<16x128xbf16>
      tpu.vector_store %arg7[%c0_16, %c0_17], %19 {strides = array<i32>} : memref<16x128xbf16, #tpu.memory_space<vmem>>, vector<16x128xbf16>,
    } else {
    }
    return
  }
  func.func @transform_0(%arg0: i32, %arg1: i32, %arg2: i32) -> (i32, i32) {
    %c0_i32 = arith.constant 0 : i32
    return %arg0, %arg2 : i32, i32
  }
  func.func @transform_1(%arg0: i32, %arg1: i32, %arg2: i32) -> (i32, i32) {
    %c0_i32 = arith.constant 0 : i32
    return %arg2, %arg1 : i32, i32
  }
  func.func @transform_2(%arg0: i32, %arg1: i32, %arg2: i32) -> (i32, i32) {
    %c0_i32 = arith.constant 0 : i32
    %c0_i32_0 = arith.constant 0 : i32
    return %c0_i32, %arg1 : i32, i32
  }
  func.func @transform_3(%arg0: i32, %arg1: i32, %arg2: i32) -> (i32, i32) {
    %c0_i32 = arith.constant 0 : i32
    return %arg0, %arg1 : i32, i32
  }
  func.func @transform_4(%arg0: i32, %arg1: i32, %arg2: i32) -> (i32, i32) {
    %c0_i32 = arith.constant 0 : i32
    return %arg0, %arg1 : i32, i32
  }
}

module attributes {stable_mosaic.version = 11 : i64} {
  func.func @_gemm_bn_kernel(%arg0: i32, %arg1: i32, %arg2: i32, %arg3: memref<16x1792xbf16, #tpu.memory_space<vmem>>, %arg4: memref<1792x128xbf16, #tpu.memory_space<vmem>>, %arg5: memref<1x128xf32, #tpu.memory_space<vmem>>, %arg6: memref<16x128xbf16, #tpu.memory_space<vmem>>, %arg7: memref<16x128xf32, #tpu.memory_space<vmem>>) attributes {dimension_semantics = [#tpu.dimension_semantics<parallel>, #tpu.dimension_semantics<parallel>, #tpu.dimension_semantics<arbitrary>], iteration_bounds = array<i64: 1, 1, 1>, scalar_prefetch = 0 : i64, scratch_operands = 1 : i64, tpu.core_type = #tpu.core_type<tc>, window_params = [{transform_indices = @transform_0, window_bounds = array<i64: 16, 1792>}, {transform_indices = @transform_1, window_bounds = array<i64: 1792, 128>}, {transform_indices = @transform_2, window_bounds = array<i64: 1, 128>}, {transform_indices = @transform_3, window_bounds = array<i64: 16, 128>}]} {
    %c0_i32 = arith.constant 0 : i32
    %0 = arith.cmpi eq, %arg2, %c0_i32 : i32
    %1 = arith.extui %0 : i1 to i32
    %c0_i32_0 = arith.constant 0 : i32
    %2 = arith.cmpi ne, %1, %c0_i32_0 : i32
    scf.if %2 {
      %cst_10 = arith.constant 0.000000e+00 : f32
      %12 = vector.broadcast %cst_10 : f32 to vector<16x128xf32>
      %c0_11 = arith.constant 0 : index
      %c0_12 = arith.constant 0 : index
      %13 = vector.load %arg7[%c0_11, %c0_12] : memref<16x128xf32, #tpu.memory_space<vmem>>, vector<16x128xf32>
      tpu.vector_store %arg7[%c0_11, %c0_12], %12 {strides = array<i32>} : memref<16x128xf32, #tpu.memory_space<vmem>>, vector<16x128xf32>,
    } else {
    }
    %c0 = arith.constant 0 : index
    %c0_1 = arith.constant 0 : index
    %3 = vector.load %arg7[%c0, %c0_1] : memref<16x128xf32, #tpu.memory_space<vmem>>, vector<16x128xf32>
    %c0_2 = arith.constant 0 : index
    %c0_3 = arith.constant 0 : index
    %4 = vector.load %arg3[%c0_2, %c0_3] : memref<16x1792xbf16, #tpu.memory_space<vmem>>, vector<16x1792xbf16>
    %c0_4 = arith.constant 0 : index
    %c0_5 = arith.constant 0 : index
    %5 = vector.load %arg4[%c0_4, %c0_5] : memref<1792x128xbf16, #tpu.memory_space<vmem>>, vector<1792x128xbf16>
    %cst = arith.constant dense<0.000000e+00> : vector<16x128xf32>
    %6 = tpu.matmul %4, %5, %cst {dimension_numbers = #tpu.dot_dimension_numbers<[1], [0], [0], [1], [0, 0, 1, 1], [], []>} : vector<16x1792xbf16>, vector<1792x128xbf16>, vector<16x128xf32> -> vector<16x128xf32>
    %7 = arith.addf %3, %6 : vector<16x128xf32>
    %c0_6 = arith.constant 0 : index
    %c0_7 = arith.constant 0 : index
    %8 = vector.load %arg7[%c0_6, %c0_7] : memref<16x128xf32, #tpu.memory_space<vmem>>, vector<16x128xf32>
    tpu.vector_store %arg7[%c0_6, %c0_7], %7 {strides = array<i32>} : memref<16x128xf32, #tpu.memory_space<vmem>>, vector<16x128xf32>,
    %c0_i32_8 = arith.constant 0 : i32
    %9 = arith.cmpi eq, %arg2, %c0_i32_8 : i32
    %10 = arith.extui %9 : i1 to i32
    %c0_i32_9 = arith.constant 0 : i32
    %11 = arith.cmpi ne, %10, %c0_i32_9 : i32
    scf.if %11 {
      %c0_10 = arith.constant 0 : index
      %c0_11 = arith.constant 0 : index
      %12 = vector.load %arg7[%c0_10, %c0_11] : memref<16x128xf32, #tpu.memory_space<vmem>>, vector<16x128xf32>
      %c0_12 = arith.constant 0 : index
      %c0_13 = arith.constant 0 : index
      %13 = vector.load %arg5[%c0_12, %c0_13] : memref<1x128xf32, #tpu.memory_space<vmem>>, vector<1x128xf32>
      %14 = vector.broadcast %13 : vector<1x128xf32> to vector<16x128xf32>
      %15 = arith.addf %12, %14 : vector<16x128xf32>
      %cst_14 = arith.constant 0.000000e+00 : f32
      %16 = vector.broadcast %cst_14 : f32 to vector<16x128xf32>
      %17 = arith.maximumf %15, %16 : vector<16x128xf32>
      %18 = arith.truncf %17 : vector<16x128xf32> to vector<16x128xbf16>
      %c0_15 = arith.constant 0 : index
      %c0_16 = arith.constant 0 : index
      %19 = vector.load %arg6[%c0_15, %c0_16] : memref<16x128xbf16, #tpu.memory_space<vmem>>, vector<16x128xbf16>
      tpu.vector_store %arg6[%c0_15, %c0_16], %18 {strides = array<i32>} : memref<16x128xbf16, #tpu.memory_space<vmem>>, vector<16x128xbf16>,
    } else {
    }
    return
  }
  func.func @transform_0(%arg0: i32, %arg1: i32, %arg2: i32) -> (i32, i32) {
    %c0_i32 = arith.constant 0 : i32
    return %arg0, %arg2 : i32, i32
  }
  func.func @transform_1(%arg0: i32, %arg1: i32, %arg2: i32) -> (i32, i32) {
    %c0_i32 = arith.constant 0 : i32
    return %arg2, %arg1 : i32, i32
  }
  func.func @transform_2(%arg0: i32, %arg1: i32, %arg2: i32) -> (i32, i32) {
    %c0_i32 = arith.constant 0 : i32
    %c0_i32_0 = arith.constant 0 : i32
    return %c0_i32, %arg1 : i32, i32
  }
  func.func @transform_3(%arg0: i32, %arg1: i32, %arg2: i32) -> (i32, i32) {
    %c0_i32 = arith.constant 0 : i32
    return %arg0, %arg1 : i32, i32
  }
}

</mosaic_0001>

<bundles_post_ra>
// kernel: _lambda_.22
= control target key start
LH: loop header
LB: loop body
LE: loop exit
PB: predicated region body
PF: predicated region fallthrough
CT: control target
= control target key end

     0   :  { %s2251_s1 = inlined_call_operand.vmem [shape: bf16[128,128], index: 1, kind: input, shape index: {}]   ;;  %s2252_s0 = inlined_call_operand.vmem [shape: bf16[512,128], index: 0, kind: input, shape index: {}]   ;;  %s2253_s2 = inlined_call_operand.vmem [shape: f32[1,128], index: 2, kind: input, shape index: {}]   ;;  %s2254_s3 = inlined_call_operand.vmem [shape: bf16[512,128], index: 3, kind: output, shape index: {}]  }
   0x1   :  { %v1906_v0 = vld [vmem:[%s2251_s1 + $0x38] sm:$0xff]   ;;  %v1907_v1 = vld [vmem:[%s2251_s1 + $0x30] sm:$0xff]   ;;  %v1908_v2 = vld [vmem:[%s2251_s1 + $0x28] sm:$0xff]  }
   0x2   :  { %1810 = vmatprep.subr.bf16.mxu0 %v1906_v0  ;;  %1890 = vmatprep.subr.bf16.mxu1 %v1906_v0  ;;  %v1909_v3 = vld [vmem:[%s2251_s1 + $0x20] sm:$0xff]   ;;  %v1910_v6 = vld [vmem:[%s2251_s1 + $0x18] sm:$0xff]   ;;  %v1911_v7 = vld [vmem:[%s2251_s1 + $0x10] sm:$0xff]  }
   0x3   :  { %1811 = vmatpush3.bf16.msra.mxu0 %v1906_v0  ;;  %1898 = vmatpush3.bf16.msra.mxu1 %v1906_v0  ;;  %v1914_v4 = vld [vmem:[%s2252_s0] sm:$0xff]   ;;  %v1912_v8 = vld [vmem:[%s2251_s1 + $0x8] sm:$0xff]   ;;  %v1918_v12 = vld [vmem:[%s2252_s0 + $0x10] sm:$0xff]  }
   0x4   :  { %1812 = vmatprep.subr.bf16.mxu0 %v1907_v1  ;;  %1891 = vmatprep.subr.bf16.mxu1 %v1907_v1  ;;  %v1915_v5 = vld [vmem:[%s2252_s0 + $0x80] sm:$0xff]   ;;  %v1916_v10 = vld [vmem:[%s2252_s0 + $0x8] sm:$0xff]   ;;  %v1919_v13 = vld [vmem:[%s2252_s0 + $0x90] sm:$0xff]  }
   0x5   :  { %1826 = vmatprep.mubr.bf16.mxu0 %v1914_v4  ;;  %1858 = vmatprep.mubr.bf16.mxu1 %v1915_v5  ;;  %v1913_v9 = vld [vmem:[%s2251_s1] sm:$0xff]   ;;  %v1917_v11 = vld [vmem:[%s2252_s0 + $0x88] sm:$0xff]   ;;  %v1920_v14 = vld [vmem:[%s2252_s0 + $0x18] sm:$0xff]  }
   0x6   :  { %v1921_v15 = vld [vmem:[%s2252_s0 + $0x98] sm:$0xff]   ;;  %v1922_v16 = vld [vmem:[%s2252_s0 + $0x20] sm:$0xff]   ;;  %v1924_v18 = vld [vmem:[%s2252_s0 + $0x28] sm:$0xff]  }
   0x7   :  { %1813 = vmatpush3.bf16.msra.mxu0 %v1907_v1  ;;  %1899 = vmatpush3.bf16.msra.mxu1 %v1907_v1  ;;  %v1923_v17 = vld [vmem:[%s2252_s0 + $0xa0] sm:$0xff]   ;;  %v1925_v19 = vld [vmem:[%s2252_s0 + $0xa8] sm:$0xff]   ;;  %v1926_v20 = vld [vmem:[%s2252_s0 + $0x30] sm:$0xff]  }
   0x8   :  { %1814 = vmatprep.subr.bf16.mxu0 %v1908_v2  ;;  %1892 = vmatprep.subr.bf16.mxu1 %v1908_v2  ;;  %v1927_v21 = vld [vmem:[%s2252_s0 + $0xb0] sm:$0xff]   ;;  %v1928_v22 = vld [vmem:[%s2252_s0 + $0x38] sm:$0xff]   ;;  %v1930_v24 = vld [vmem:[%s2252_s0 + $0x40] sm:$0xff]  }
   0x9   :  { %v1929_v23 = vld [vmem:[%s2252_s0 + $0xb8] sm:$0xff]   ;;  %v1931_v25 = vld [vmem:[%s2252_s0 + $0xc0] sm:$0xff]   ;;  %v1932_v26 = vld [vmem:[%s2252_s0 + $0x48] sm:$0xff]  }
   0xa   :  { %v1933_v27 = vld [vmem:[%s2252_s0 + $0xc8] sm:$0xff]   ;;  %v1934_v28 = vld [vmem:[%s2252_s0 + $0x50] sm:$0xff]   ;;  %v1936_v30 = vld [vmem:[%s2252_s0 + $0x58] sm:$0xff]  }
   0xb   :  { %1815 = vmatpush3.bf16.msra.mxu0 %v1908_v2  ;;  %1900 = vmatpush3.bf16.msra.mxu1 %v1908_v2  ;;  %v1935_v29 = vld [vmem:[%s2252_s0 + $0xd0] sm:$0xff]   ;;  %v1937_v31 = vld [vmem:[%s2252_s0 + $0xd8] sm:$0xff]   ;;  %v1938_v32 = vld [vmem:[%s2252_s0 + $0x60] sm:$0xff]  }
   0xc   :  { %1816 = vmatprep.subr.bf16.mxu0 %v1909_v3  ;;  %1893 = vmatprep.subr.bf16.mxu1 %v1909_v3  ;;  %v1939_v33 = vld [vmem:[%s2252_s0 + $0xe0] sm:$0xff]   ;;  %v1940_v34 = vld [vmem:[%s2252_s0 + $0x68] sm:$0xff]   ;;  %v1942_v36 = vld [vmem:[%s2252_s0 + $0x70] sm:$0xff]  }
   0xd   :  { %v1941_v35 = vld [vmem:[%s2252_s0 + $0xe8] sm:$0xff]   ;;  %v1943_v37 = vld [vmem:[%s2252_s0 + $0xf0] sm:$0xff]   ;;  %v1944_v38 = vld [vmem:[%s2252_s0 + $0x78] sm:$0xff]  }
   0xe   :  { %v1945_v39 = vld [vmem:[%s2252_s0 + $0xf8] sm:$0xff]   ;;  %v2089_v40 = vld [vmem:[%s2253_s2] ss:$0 sm:$0xff] }
   0xf   :  { %1817 = vmatpush3.bf16.msra.mxu0 %v1909_v3  ;;  %1901 = vmatpush3.bf16.msra.mxu1 %v1909_v3 }
  0x10   :  { %1818 = vmatprep.subr.bf16.mxu0 %v1910_v6  ;;  %1894 = vmatprep.subr.bf16.mxu1 %v1910_v6 }
  0x13   :  { %1819 = vmatpush3.bf16.msra.mxu0 %v1910_v6  ;;  %1902 = vmatpush3.bf16.msra.mxu1 %v1910_v6 }
  0x14   :  { %1820 = vmatprep.subr.bf16.mxu0 %v1911_v7  ;;  %1895 = vmatprep.subr.bf16.mxu1 %v1911_v7 }
  0x17   :  { %1821 = vmatpush3.bf16.msra.mxu0 %v1911_v7  ;;  %1903 = vmatpush3.bf16.msra.mxu1 %v1911_v7 }
  0x18   :  { %1822 = vmatprep.subr.bf16.mxu0 %v1912_v8  ;;  %1896 = vmatprep.subr.bf16.mxu1 %v1912_v8 }
  0x1b   :  { %1823 = vmatpush3.bf16.msra.mxu0 %v1912_v8  ;;  %1904 = vmatpush3.bf16.msra.mxu1 %v1912_v8 }
  0x1c   :  { %1824 = vmatprep.subr.bf16.mxu0 %v1913_v9  ;;  %1897 = vmatprep.subr.bf16.mxu1 %v1913_v9 }
  0x1f   :  { %1825 = vmatpush3.bf16.msra.mxu0 %v1913_v9  ;;  %1905 = vmatpush3.bf16.msra.mxu1 %v1913_v9 }
  0x22   :  { %1827 = vmatmul.mubr.bf16.vlgmr.msra.gmra.mxu0 %v1916_v10  ;;  %1859 = vmatmul.mubr.bf16.vlgmr.msra.gmra.mxu1 %v1917_v11 }
  0x23   :  { %1830 = vmatprep.mubr.bf16.mxu0 %v1918_v12  ;;  %1862 = vmatprep.mubr.bf16.mxu1 %v1919_v13 }
  0x2a   :  { %1831 = vmatmul.mubr.bf16.gmra.mxu0 %v1920_v14  ;;  %1863 = vmatmul.mubr.bf16.gmra.mxu1 %v1921_v15 }
  0x2b   :  { %1834 = vmatprep.mubr.bf16.mxu0 %v1922_v16  ;;  %1866 = vmatprep.mubr.bf16.mxu1 %v1923_v17 }
  0x32   :  { %1835 = vmatmul.mubr.bf16.gmra.mxu0 %v1924_v18  ;;  %1867 = vmatmul.mubr.bf16.gmra.mxu1 %v1925_v19 }
  0x33   :  { %1838 = vmatprep.mubr.bf16.mxu0 %v1926_v20  ;;  %1870 = vmatprep.mubr.bf16.mxu1 %v1927_v21 }
  0x3a   :  { %1839 = vmatmul.mubr.bf16.gmra.mxu0 %v1928_v22  ;;  %1871 = vmatmul.mubr.bf16.gmra.mxu1 %v1929_v23 }
  0x3b   :  { %1842 = vmatprep.mubr.bf16.mxu0 %v1930_v24  ;;  %1874 = vmatprep.mubr.bf16.mxu1 %v1931_v25 }
  0x42   :  { %1843 = vmatmul.mubr.bf16.gmra.mxu0 %v1932_v26  ;;  %1875 = vmatmul.mubr.bf16.gmra.mxu1 %v1933_v27 }
  0x43   :  { %1846 = vmatprep.mubr.bf16.mxu0 %v1934_v28  ;;  %1878 = vmatprep.mubr.bf16.mxu1 %v1935_v29 }
  0x4a   :  { %1847 = vmatmul.mubr.bf16.gmra.mxu0 %v1936_v30  ;;  %1879 = vmatmul.mubr.bf16.gmra.mxu1 %v1937_v31 }
  0x4b   :  { %1850 = vmatprep.mubr.bf16.mxu0 %v1938_v32  ;;  %1882 = vmatprep.mubr.bf16.mxu1 %v1939_v33 }
  0x52   :  { %1851 = vmatmul.mubr.bf16.gmra.mxu0 %v1940_v34  ;;  %1883 = vmatmul.mubr.bf16.gmra.mxu1 %v1941_v35 }
  0x53   :  { %1854 = vmatprep.mubr.bf16.mxu0 %v1942_v36  ;;  %1886 = vmatprep.mubr.bf16.mxu1 %v1943_v37 }
  0x5a   :  { %1855 = vmatmul.mubr.bf16.gmra.mxu0 %v1944_v38  ;;  %1887 = vmatmul.mubr.bf16.gmra.mxu1 %v1945_v39 }
  0xe2   :  { %v1828_v41 = vpop.f32.mrf.mxu0  ;;  %v1860_v42 = vpop.f32.mrf.mxu1 }
  0xe3   :  { %v960_v43 = vadd.f32 %v1828_v41, %v2089_v40  ;;  %v992_v44 = vadd.f32 %v1860_v42, %v2089_v40 }
  0xe4   :  { %v501_v45 = vpop.f32.mrf.mxu0  ;;  %v629_v46 = vpop.f32.mrf.mxu1 }
  0xe5   :  { %v958_v47 = vadd.f32 %v2089_v40, %v501_v45  ;;  %v990_v48 = vadd.f32 %v2089_v40, %v629_v46  ;;  %v1024_v53 = vmax.f32 %v960_v43, 0.0  ;;  %v1056_v54 = vmax.f32 %v992_v44, 0.0 }
  0xe6   :  { %v1829_v49 = vpop.f32.mrf.mxu0  ;;  %v1861_v50 = vpop.f32.mrf.mxu1 }
  0xe7   :  { %v961_v51 = vadd.f32 %v1829_v49, %v2089_v40  ;;  %v993_v52 = vadd.f32 %v1861_v50, %v2089_v40  ;;  %v1022_v61 = vmax.f32 %v958_v47, 0.0  ;;  %v1054_v62 = vmax.f32 %v990_v48, 0.0 }
  0xe8   :  { %v504_v55 = vpop.f32.mrf.mxu0  ;;  %v632_v56 = vpop.f32.mrf.mxu1 }
  0xe9   :  { %v1025_v57 = vmax.f32 %v961_v51, 0.0  ;;  %v1057_v58 = vmax.f32 %v993_v52, 0.0  ;;  %v959_v59 = vadd.f32 %v2089_v40, %v504_v55  ;;  %v991_v60 = vadd.f32 %v2089_v40, %v632_v56 }
  0xea   :  { %v1832_v63 = vpop.f32.mrf.mxu0  ;;  %v1864_v0 = vpop.f32.mrf.mxu1 }
  0xeb   :  { %v1587_v1 = vpack.c.bf16 %v1025_v57, %v1024_v53  ;;  %v1667_v2 = vpack.c.bf16 %v1057_v58, %v1056_v54  ;;  %v1023_v3 = vmax.f32 %v959_v59, 0.0  ;;  %v1055_v4 = vmax.f32 %v991_v60, 0.0 }
  0xec   :  { %v964_v5 = vadd.f32 %v1832_v63, %v2089_v40  ;;  %v996_v6 = vadd.f32 %v1864_v0, %v2089_v40  ;;  %v517_v7 = vpop.f32.mrf.mxu0  ;;  %v645_v8 = vpop.f32.mrf.mxu1 }
  0xed   :  { %1739 = vst [vmem:[%s2254_s3 + $0x8] sm:$0xff] %v1587_v1   ;;  %1755 = vst [vmem:[%s2254_s3 + $0x88] sm:$0xff] %v1667_v2   ;;  %v1582_v9 = vpack.c.bf16 %v1023_v3, %v1022_v61  ;;  %v1662_v10 = vpack.c.bf16 %v1055_v4, %v1054_v62  ;;  %v962_v11 = vadd.f32 %v2089_v40, %v517_v7 }
  0xee   :  { %v994_v12 = vadd.f32 %v2089_v40, %v645_v8  ;;  %v1833_v13 = vpop.f32.mrf.mxu0  ;;  %v1865_v14 = vpop.f32.mrf.mxu1  ;;  %v1028_v17 = vmax.f32 %v964_v5, 0.0  ;;  %v1060_v18 = vmax.f32 %v996_v6, 0.0 }
  0xef   :  { %1583 = vst [vmem:[%s2254_s3] sm:$0xff] %v1582_v9   ;;  %1754 = vst [vmem:[%s2254_s3 + $0x80] sm:$0xff] %v1662_v10   ;;  %v965_v15 = vadd.f32 %v1833_v13, %v2089_v40  ;;  %v997_v16 = vadd.f32 %v1865_v14, %v2089_v40  ;;  %v1026_v25 = vmax.f32 %v962_v11, 0.0 }
  0xf0   :  { %v520_v19 = vpop.f32.mrf.mxu0  ;;  %v648_v20 = vpop.f32.mrf.mxu1  ;;  %v1058_v26 = vmax.f32 %v994_v12, 0.0 }
  0xf1   :  { %v1029_v21 = vmax.f32 %v965_v15, 0.0  ;;  %v1061_v22 = vmax.f32 %v997_v16, 0.0  ;;  %v963_v23 = vadd.f32 %v2089_v40, %v520_v19  ;;  %v995_v24 = vadd.f32 %v2089_v40, %v648_v20 }
  0xf2   :  { %v1836_v27 = vpop.f32.mrf.mxu0  ;;  %v1868_v28 = vpop.f32.mrf.mxu1 }
  0xf3   :  { %v1597_v29 = vpack.c.bf16 %v1029_v21, %v1028_v17  ;;  %v1677_v30 = vpack.c.bf16 %v1061_v22, %v1060_v18  ;;  %v1027_v31 = vmax.f32 %v963_v23, 0.0  ;;  %v1059_v32 = vmax.f32 %v995_v24, 0.0 }
  0xf4   :  { %v968_v33 = vadd.f32 %v1836_v27, %v2089_v40  ;;  %v1000_v34 = vadd.f32 %v1868_v28, %v2089_v40  ;;  %v533_v35 = vpop.f32.mrf.mxu0  ;;  %v661_v36 = vpop.f32.mrf.mxu1 }
  0xf5   :  { %1741 = vst [vmem:[%s2254_s3 + $0x18] sm:$0xff] %v1597_v29   ;;  %1757 = vst [vmem:[%s2254_s3 + $0x98] sm:$0xff] %v1677_v30   ;;  %v1592_v37 = vpack.c.bf16 %v1027_v31, %v1026_v25  ;;  %v1672_v38 = vpack.c.bf16 %v1059_v32, %v1058_v26  ;;  %v966_v39 = vadd.f32 %v2089_v40, %v533_v35 }
  0xf6   :  { %v998_v41 = vadd.f32 %v2089_v40, %v661_v36  ;;  %v1837_v42 = vpop.f32.mrf.mxu0  ;;  %v1869_v43 = vpop.f32.mrf.mxu1  ;;  %v1032_v46 = vmax.f32 %v968_v33, 0.0  ;;  %v1064_v47 = vmax.f32 %v1000_v34, 0.0 }
  0xf7   :  { %1740 = vst [vmem:[%s2254_s3 + $0x10] sm:$0xff] %v1592_v37   ;;  %1756 = vst [vmem:[%s2254_s3 + $0x90] sm:$0xff] %v1672_v38   ;;  %v969_v44 = vadd.f32 %v1837_v42, %v2089_v40  ;;  %v1001_v45 = vadd.f32 %v1869_v43, %v2089_v40  ;;  %v1030_v54 = vmax.f32 %v966_v39, 0.0 }
  0xf8   :  { %v536_v48 = vpop.f32.mrf.mxu0  ;;  %v664_v49 = vpop.f32.mrf.mxu1  ;;  %v1062_v55 = vmax.f32 %v998_v41, 0.0 }
  0xf9   :  { %v1033_v50 = vmax.f32 %v969_v44, 0.0  ;;  %v1065_v51 = vmax.f32 %v1001_v45, 0.0  ;;  %v967_v52 = vadd.f32 %v2089_v40, %v536_v48  ;;  %v999_v53 = vadd.f32 %v2089_v40, %v664_v49 }
  0xfa   :  { %v1840_v56 = vpop.f32.mrf.mxu0  ;;  %v1872_v57 = vpop.f32.mrf.mxu1 }
  0xfb   :  { %v1607_v58 = vpack.c.bf16 %v1033_v50, %v1032_v46  ;;  %v1687_v59 = vpack.c.bf16 %v1065_v51, %v1064_v47  ;;  %v1031_v60 = vmax.f32 %v967_v52, 0.0  ;;  %v1063_v61 = vmax.f32 %v999_v53, 0.0 }
  0xfc   :  { %v972_v62 = vadd.f32 %v1840_v56, %v2089_v40  ;;  %v1004_v63 = vadd.f32 %v1872_v57, %v2089_v40  ;;  %v549_v0 = vpop.f32.mrf.mxu0  ;;  %v677_v1 = vpop.f32.mrf.mxu1 }
  0xfd   :  { %1743 = vst [vmem:[%s2254_s3 + $0x28] sm:$0xff] %v1607_v58   ;;  %1759 = vst [vmem:[%s2254_s3 + $0xa8] sm:$0xff] %v1687_v59   ;;  %v1602_v2 = vpack.c.bf16 %v1031_v60, %v1030_v54  ;;  %v1682_v3 = vpack.c.bf16 %v1063_v61, %v1062_v55  ;;  %v970_v4 = vadd.f32 %v2089_v40, %v549_v0 }
  0xfe   :  { %v1002_v5 = vadd.f32 %v2089_v40, %v677_v1  ;;  %v1841_v6 = vpop.f32.mrf.mxu0  ;;  %v1873_v7 = vpop.f32.mrf.mxu1  ;;  %v1036_v10 = vmax.f32 %v972_v62, 0.0  ;;  %v1068_v11 = vmax.f32 %v1004_v63, 0.0 }
  0xff   :  { %1742 = vst [vmem:[%s2254_s3 + $0x20] sm:$0xff] %v1602_v2   ;;  %1758 = vst [vmem:[%s2254_s3 + $0xa0] sm:$0xff] %v1682_v3   ;;  %v973_v8 = vadd.f32 %v1841_v6, %v2089_v40  ;;  %v1005_v9 = vadd.f32 %v1873_v7, %v2089_v40  ;;  %v1034_v18 = vmax.f32 %v970_v4, 0.0 }
 0x100   :  { %v552_v12 = vpop.f32.mrf.mxu0  ;;  %v680_v13 = vpop.f32.mrf.mxu1  ;;  %v1066_v19 = vmax.f32 %v1002_v5, 0.0 }
 0x101   :  { %v1037_v14 = vmax.f32 %v973_v8, 0.0  ;;  %v1069_v15 = vmax.f32 %v1005_v9, 0.0  ;;  %v971_v16 = vadd.f32 %v2089_v40, %v552_v12  ;;  %v1003_v17 = vadd.f32 %v2089_v40, %v680_v13 }
 0x102   :  { %v1844_v20 = vpop.f32.mrf.mxu0  ;;  %v1876_v21 = vpop.f32.mrf.mxu1 }
 0x103   :  { %v1617_v22 = vpack.c.bf16 %v1037_v14, %v1036_v10  ;;  %v1697_v23 = vpack.c.bf16 %v1069_v15, %v1068_v11  ;;  %v1035_v24 = vmax.f32 %v971_v16, 0.0  ;;  %v1067_v25 = vmax.f32 %v1003_v17, 0.0 }
 0x104   :  { %v976_v26 = vadd.f32 %v1844_v20, %v2089_v40  ;;  %v1008_v27 = vadd.f32 %v1876_v21, %v2089_v40  ;;  %v565_v28 = vpop.f32.mrf.mxu0  ;;  %v693_v29 = vpop.f32.mrf.mxu1 }
 0x105   :  { %1745 = vst [vmem:[%s2254_s3 + $0x38] sm:$0xff] %v1617_v22   ;;  %1761 = vst [vmem:[%s2254_s3 + $0xb8] sm:$0xff] %v1697_v23   ;;  %v1612_v30 = vpack.c.bf16 %v1035_v24, %v1034_v18  ;;  %v1692_v31 = vpack.c.bf16 %v1067_v25, %v1066_v19  ;;  %v974_v32 = vadd.f32 %v2089_v40, %v565_v28 }
 0x106   :  { %v1006_v33 = vadd.f32 %v2089_v40, %v693_v29  ;;  %v1845_v34 = vpop.f32.mrf.mxu0  ;;  %v1877_v35 = vpop.f32.mrf.mxu1  ;;  %v1040_v38 = vmax.f32 %v976_v26, 0.0  ;;  %v1072_v39 = vmax.f32 %v1008_v27, 0.0 }
 0x107   :  { %1744 = vst [vmem:[%s2254_s3 + $0x30] sm:$0xff] %v1612_v30   ;;  %1760 = vst [vmem:[%s2254_s3 + $0xb0] sm:$0xff] %v1692_v31   ;;  %v977_v36 = vadd.f32 %v1845_v34, %v2089_v40  ;;  %v1009_v37 = vadd.f32 %v1877_v35, %v2089_v40  ;;  %v1038_v47 = vmax.f32 %v974_v32, 0.0 }
 0x108   :  { %v568_v41 = vpop.f32.mrf.mxu0  ;;  %v696_v42 = vpop.f32.mrf.mxu1  ;;  %v1070_v48 = vmax.f32 %v1006_v33, 0.0 }
 0x109   :  { %v1041_v43 = vmax.f32 %v977_v36, 0.0  ;;  %v1073_v44 = vmax.f32 %v1009_v37, 0.0  ;;  %v975_v45 = vadd.f32 %v2089_v40, %v568_v41  ;;  %v1007_v46 = vadd.f32 %v2089_v40, %v696_v42 }
 0x10a   :  { %v1848_v49 = vpop.f32.mrf.mxu0  ;;  %v1880_v50 = vpop.f32.mrf.mxu1 }
 0x10b   :  { %v1627_v51 = vpack.c.bf16 %v1041_v43, %v1040_v38  ;;  %v1707_v52 = vpack.c.bf16 %v1073_v44, %v1072_v39  ;;  %v1039_v53 = vmax.f32 %v975_v45, 0.0  ;;  %v1071_v54 = vmax.f32 %v1007_v46, 0.0 }
 0x10c   :  { %v980_v55 = vadd.f32 %v1848_v49, %v2089_v40  ;;  %v1012_v56 = vadd.f32 %v1880_v50, %v2089_v40  ;;  %v581_v57 = vpop.f32.mrf.mxu0  ;;  %v709_v58 = vpop.f32.mrf.mxu1 }
 0x10d   :  { %1747 = vst [vmem:[%s2254_s3 + $0x48] sm:$0xff] %v1627_v51   ;;  %1763 = vst [vmem:[%s2254_s3 + $0xc8] sm:$0xff] %v1707_v52   ;;  %v1622_v59 = vpack.c.bf16 %v1039_v53, %v1038_v47  ;;  %v1702_v60 = vpack.c.bf16 %v1071_v54, %v1070_v48  ;;  %v978_v61 = vadd.f32 %v2089_v40, %v581_v57 }
 0x10e   :  { %v1010_v62 = vadd.f32 %v2089_v40, %v709_v58  ;;  %v1849_v63 = vpop.f32.mrf.mxu0  ;;  %v1881_v0 = vpop.f32.mrf.mxu1  ;;  %v1044_v3 = vmax.f32 %v980_v55, 0.0  ;;  %v1076_v4 = vmax.f32 %v1012_v56, 0.0 }
 0x10f   :  { %1746 = vst [vmem:[%s2254_s3 + $0x40] sm:$0xff] %v1622_v59   ;;  %1762 = vst [vmem:[%s2254_s3 + $0xc0] sm:$0xff] %v1702_v60   ;;  %v981_v1 = vadd.f32 %v1849_v63, %v2089_v40  ;;  %v1013_v2 = vadd.f32 %v1881_v0, %v2089_v40  ;;  %v1042_v11 = vmax.f32 %v978_v61, 0.0 }
 0x110   :  { %v584_v5 = vpop.f32.mrf.mxu0  ;;  %v712_v6 = vpop.f32.mrf.mxu1  ;;  %v1074_v12 = vmax.f32 %v1010_v62, 0.0 }
 0x111   :  { %v1045_v7 = vmax.f32 %v981_v1, 0.0  ;;  %v1077_v8 = vmax.f32 %v1013_v2, 0.0  ;;  %v979_v9 = vadd.f32 %v2089_v40, %v584_v5  ;;  %v1011_v10 = vadd.f32 %v2089_v40, %v712_v6 }
 0x112   :  { %v1852_v13 = vpop.f32.mrf.mxu0  ;;  %v1884_v14 = vpop.f32.mrf.mxu1 }
 0x113   :  { %v1637_v15 = vpack.c.bf16 %v1045_v7, %v1044_v3  ;;  %v1717_v16 = vpack.c.bf16 %v1077_v8, %v1076_v4  ;;  %v1043_v17 = vmax.f32 %v979_v9, 0.0  ;;  %v1075_v18 = vmax.f32 %v1011_v10, 0.0 }
 0x114   :  { %v984_v19 = vadd.f32 %v1852_v13, %v2089_v40  ;;  %v1016_v20 = vadd.f32 %v1884_v14, %v2089_v40  ;;  %v597_v21 = vpop.f32.mrf.mxu0  ;;  %v725_v22 = vpop.f32.mrf.mxu1 }
 0x115   :  { %1749 = vst [vmem:[%s2254_s3 + $0x58] sm:$0xff] %v1637_v15   ;;  %1765 = vst [vmem:[%s2254_s3 + $0xd8] sm:$0xff] %v1717_v16   ;;  %v1632_v23 = vpack.c.bf16 %v1043_v17, %v1042_v11  ;;  %v1712_v24 = vpack.c.bf16 %v1075_v18, %v1074_v12  ;;  %v982_v25 = vadd.f32 %v2089_v40, %v597_v21 }
 0x116   :  { %v1014_v26 = vadd.f32 %v2089_v40, %v725_v22  ;;  %v1853_v27 = vpop.f32.mrf.mxu0  ;;  %v1885_v28 = vpop.f32.mrf.mxu1  ;;  %v1048_v31 = vmax.f32 %v984_v19, 0.0  ;;  %v1080_v32 = vmax.f32 %v1016_v20, 0.0 }
 0x117   :  { %1748 = vst [vmem:[%s2254_s3 + $0x50] sm:$0xff] %v1632_v23   ;;  %1764 = vst [vmem:[%s2254_s3 + $0xd0] sm:$0xff] %v1712_v24   ;;  %v985_v29 = vadd.f32 %v1853_v27, %v2089_v40  ;;  %v1017_v30 = vadd.f32 %v1885_v28, %v2089_v40  ;;  %v1046_v39 = vmax.f32 %v982_v25, 0.0 }
 0x118   :  { %v600_v33 = vpop.f32.mrf.mxu0  ;;  %v728_v34 = vpop.f32.mrf.mxu1  ;;  %v1078_v41 = vmax.f32 %v1014_v26, 0.0 }
 0x119   :  { %v1049_v35 = vmax.f32 %v985_v29, 0.0  ;;  %v1081_v36 = vmax.f32 %v1017_v30, 0.0  ;;  %v983_v37 = vadd.f32 %v2089_v40, %v600_v33  ;;  %v1015_v38 = vadd.f32 %v2089_v40, %v728_v34 }
 0x11a   :  { %v1856_v42 = vpop.f32.mrf.mxu0  ;;  %v1888_v43 = vpop.f32.mrf.mxu1 }
 0x11b   :  { %v1647_v44 = vpack.c.bf16 %v1049_v35, %v1048_v31  ;;  %v1727_v45 = vpack.c.bf16 %v1081_v36, %v1080_v32  ;;  %v1047_v46 = vmax.f32 %v983_v37, 0.0  ;;  %v1079_v47 = vmax.f32 %v1015_v38, 0.0 }
 0x11c   :  { %v988_v48 = vadd.f32 %v1856_v42, %v2089_v40  ;;  %v1020_v49 = vadd.f32 %v1888_v43, %v2089_v40  ;;  %v613_v50 = vpop.f32.mrf.mxu0  ;;  %v741_v51 = vpop.f32.mrf.mxu1 }
 0x11d   :  { %1751 = vst [vmem:[%s2254_s3 + $0x68] sm:$0xff] %v1647_v44   ;;  %1767 = vst [vmem:[%s2254_s3 + $0xe8] sm:$0xff] %v1727_v45   ;;  %v1642_v52 = vpack.c.bf16 %v1047_v46, %v1046_v39  ;;  %v1722_v53 = vpack.c.bf16 %v1079_v47, %v1078_v41  ;;  %v986_v54 = vadd.f32 %v2089_v40, %v613_v50 }
 0x11e   :  { %v1018_v55 = vadd.f32 %v2089_v40, %v741_v51  ;;  %v1857_v56 = vpop.f32.mrf.mxu0  ;;  %v1889_v57 = vpop.f32.mrf.mxu1  ;;  %v1052_v60 = vmax.f32 %v988_v48, 0.0  ;;  %v1084_v61 = vmax.f32 %v1020_v49, 0.0 }
 0x11f   :  { %1750 = vst [vmem:[%s2254_s3 + $0x60] sm:$0xff] %v1642_v52   ;;  %1766 = vst [vmem:[%s2254_s3 + $0xe0] sm:$0xff] %v1722_v53   ;;  %v989_v58 = vadd.f32 %v1857_v56, %v2089_v40  ;;  %v1021_v59 = vadd.f32 %v1889_v57, %v2089_v40  ;;  %v1050_v4 = vmax.f32 %v986_v54, 0.0 }
 0x120   :  { %v616_v62 = vpop.f32.mrf.mxu0  ;;  %v744_v63 = vpop.f32.mrf.mxu1  ;;  %v1082_v5 = vmax.f32 %v1018_v55, 0.0 }
 0x121   :  { %v1053_v0 = vmax.f32 %v989_v58, 0.0  ;;  %v1085_v1 = vmax.f32 %v1021_v59, 0.0  ;;  %v987_v2 = vadd.f32 %v2089_v40, %v616_v62  ;;  %v1019_v3 = vadd.f32 %v2089_v40, %v744_v63 }
 0x123   :  { %v1657_v6 = vpack.c.bf16 %v1053_v0, %v1052_v60  ;;  %v1737_v7 = vpack.c.bf16 %v1085_v1, %v1084_v61  ;;  %v1051_v8 = vmax.f32 %v987_v2, 0.0  ;;  %v1083_v9 = vmax.f32 %v1019_v3, 0.0 }
 0x125   :  { %1753 = vst [vmem:[%s2254_s3 + $0x78] sm:$0xff] %v1657_v6   ;;  %1769 = vst [vmem:[%s2254_s3 + $0xf8] sm:$0xff] %v1737_v7   ;;  %v1652_v10 = vpack.c.bf16 %v1051_v8, %v1050_v4  ;;  %v1732_v11 = vpack.c.bf16 %v1083_v9, %v1082_v5 }
 0x127   :  { %1752 = vst [vmem:[%s2254_s3 + $0x70] sm:$0xff] %v1652_v10   ;;  %1768 = vst [vmem:[%s2254_s3 + $0xf0] sm:$0xff] %v1732_v11  }

// kernel: _lambda_.23
= control target key start
LH: loop header
LB: loop body
LE: loop exit
PB: predicated region body
PF: predicated region fallthrough
CT: control target
= control target key end

     0   :  { %s939_s1 = inlined_call_operand.vmem [shape: bf16[256,128], index: 1, kind: input, shape index: {}]   ;;  %s940_s0 = inlined_call_operand.vmem [shape: bf16[128,256], index: 0, kind: input, shape index: {}]   ;;  %s941_s2 = inlined_call_operand.vmem [shape: f32[1,128], index: 2, kind: input, shape index: {}]   ;;  %s942_s3 = inlined_call_operand.vmem [shape: bf16[128,128], index: 3, kind: output, shape index: {}]  }
   0x1   :  { %v738_v0 = vld [vmem:[%s939_s1 + $0x78] sm:$0xff]   ;;  %v740_v2 = vld [vmem:[%s939_s1 + $0x70] sm:$0xff]   ;;  %v742_v4 = vld [vmem:[%s939_s1 + $0x68] sm:$0xff]  }
   0x2   :  { %v739_v1 = vld [vmem:[%s939_s1 + $0x38] sm:$0xff]   ;;  %658 = vmatprep.subr.bf16.mxu0 %v738_v0  ;;  %722 = vmatprep.subr.bf16.mxu1 %v738_v0  ;;  %v741_v3 = vld [vmem:[%s939_s1 + $0x30] sm:$0xff]   ;;  %v743_v5 = vld [vmem:[%s939_s1 + $0x28] sm:$0xff]  }
   0x3   :  { %659 = vmatpush3.bf16.msra.mxu0 %v739_v1  ;;  %730 = vmatpush3.bf16.msra.mxu1 %v739_v1  ;;  %v744_v6 = vld [vmem:[%s939_s1 + $0x60] sm:$0xff]   ;;  %v746_v8 = vld [vmem:[%s939_s1 + $0x58] sm:$0xff]   ;;  %v748_v10 = vld [vmem:[%s939_s1 + $0x50] sm:$0xff]  }
   0x4   :  { %660 = vmatprep.subr.bf16.mxu0 %v740_v2  ;;  %723 = vmatprep.subr.bf16.mxu1 %v740_v2  ;;  %v745_v7 = vld [vmem:[%s939_s1 + $0x20] sm:$0xff]   ;;  %v747_v9 = vld [vmem:[%s939_s1 + $0x18] sm:$0xff]   ;;  %v749_v13 = vld [vmem:[%s939_s1 + $0x10] sm:$0xff]  }
   0x5   :  { %v756_v11 = vld [vmem:[%s940_s0 + $0x4] ss:$8 sps:$4 sm:$0xff]   ;;  %v754_v18 = vld [vmem:[%s940_s0] ss:$8 sps:$4 sm:$0xff]   ;;  %v760_v20 = vld [vmem:[%s940_s0 + $0x14] ss:$8 sps:$4 sm:$0xff]  }
   0x6   :  { %v759_v12 = vld [vmem:[%s940_s0 + $0x44] ss:$8 sps:$4 sm:$0xff]   ;;  %307 = vmatprep.mubr.bf16.mxu0 %v756_v11  ;;  %v757_v19 = vld [vmem:[%s940_s0 + $0x40] ss:$8 sps:$4 sm:$0xff]   ;;  %v762_v21 = vld [vmem:[%s940_s0 + $0x54] ss:$8 sps:$4 sm:$0xff]  }
   0x7   :  { %661 = vmatpush3.bf16.msra.mxu0 %v741_v3  ;;  %731 = vmatpush3.bf16.msra.mxu1 %v741_v3  ;;  %v750_v14 = vld [vmem:[%s939_s1 + $0x48] sm:$0xff]   ;;  %v752_v16 = vld [vmem:[%s939_s1 + $0x40] sm:$0xff]   ;;  %v764_v22 = vld [vmem:[%s940_s0 + $0x10] ss:$8 sps:$4 sm:$0xff]  }
   0x8   :  { %662 = vmatprep.subr.bf16.mxu0 %v742_v4  ;;  %724 = vmatprep.subr.bf16.mxu1 %v742_v4  ;;  %v751_v15 = vld [vmem:[%s939_s1 + $0x8] sm:$0xff]   ;;  %v753_v17 = vld [vmem:[%s939_s1] sm:$0xff]   ;;  %v765_v23 = vld [vmem:[%s940_s0 + $0x50] ss:$8 sps:$4 sm:$0xff]  }
   0x9   :  { %339 = vmatprep.mubr.bf16.mxu1 %v759_v12  ;;  %v766_v24 = vld [vmem:[%s940_s0 + $0x24] ss:$8 sps:$4 sm:$0xff]   ;;  %v770_v26 = vld [vmem:[%s940_s0 + $0x20] ss:$8 sps:$4 sm:$0xff]   ;;  %v772_v28 = vld [vmem:[%s940_s0 + $0x34] ss:$8 sps:$4 sm:$0xff]  }
   0xa   :  { %v768_v25 = vld [vmem:[%s940_s0 + $0x64] ss:$8 sps:$4 sm:$0xff]   ;;  %v771_v27 = vld [vmem:[%s940_s0 + $0x60] ss:$8 sps:$4 sm:$0xff]   ;;  %v774_v29 = vld [vmem:[%s940_s0 + $0x74] ss:$8 sps:$4 sm:$0xff]  }
   0xb   :  { %663 = vmatpush3.bf16.msra.mxu0 %v743_v5  ;;  %732 = vmatpush3.bf16.msra.mxu1 %v743_v5  ;;  %v776_v30 = vld [vmem:[%s940_s0 + $0x30] ss:$8 sps:$4 sm:$0xff]   ;;  %v897_v37 = vld [vmem:[%s941_s2] ss:$0 sm:$0xff] }
   0xc   :  { %664 = vmatprep.subr.bf16.mxu0 %v744_v6  ;;  %725 = vmatprep.subr.bf16.mxu1 %v744_v6  ;;  %v777_v31 = vld [vmem:[%s940_s0 + $0x70] ss:$8 sps:$4 sm:$0xff]  }
   0xf   :  { %665 = vmatpush3.bf16.msra.mxu0 %v745_v7  ;;  %733 = vmatpush3.bf16.msra.mxu1 %v745_v7 }
  0x10   :  { %666 = vmatprep.subr.bf16.mxu0 %v746_v8  ;;  %726 = vmatprep.subr.bf16.mxu1 %v746_v8 }
  0x13   :  { %667 = vmatpush3.bf16.msra.mxu0 %v747_v9  ;;  %734 = vmatpush3.bf16.msra.mxu1 %v747_v9 }
  0x14   :  { %668 = vmatprep.subr.bf16.mxu0 %v748_v10  ;;  %727 = vmatprep.subr.bf16.mxu1 %v748_v10 }
  0x17   :  { %669 = vmatpush3.bf16.msra.mxu0 %v749_v13  ;;  %735 = vmatpush3.bf16.msra.mxu1 %v749_v13 }
  0x18   :  { %670 = vmatprep.subr.bf16.mxu0 %v750_v14  ;;  %728 = vmatprep.subr.bf16.mxu1 %v750_v14 }
  0x1b   :  { %671 = vmatpush3.bf16.msra.mxu0 %v751_v15  ;;  %736 = vmatpush3.bf16.msra.mxu1 %v751_v15 }
  0x1c   :  { %672 = vmatprep.subr.bf16.mxu0 %v752_v16  ;;  %729 = vmatprep.subr.bf16.mxu1 %v752_v16 }
  0x1f   :  { %673 = vmatpush3.bf16.msra.mxu0 %v753_v17  ;;  %737 = vmatpush3.bf16.msra.mxu1 %v753_v17 }
  0x22   :  { %308 = vmatmul.mubr.bf16.vlgmr.msra.gmra.mxu0 %v754_v18  ;;  %340 = vmatmul.mubr.bf16.vlgmr.msra.gmra.mxu1 %v757_v19 }
  0x23   :  { %315 = vmatprep.mubr.bf16.mxu0 %v760_v20  ;;  %347 = vmatprep.mubr.bf16.mxu1 %v762_v21 }
  0x2a   :  { %316 = vmatmul.mubr.bf16.gmra.mxu0 %v764_v22  ;;  %348 = vmatmul.mubr.bf16.gmra.mxu1 %v765_v23 }
  0x2b   :  { %323 = vmatprep.mubr.bf16.mxu0 %v766_v24  ;;  %355 = vmatprep.mubr.bf16.mxu1 %v768_v25 }
  0x32   :  { %324 = vmatmul.mubr.bf16.gmra.mxu0 %v770_v26  ;;  %356 = vmatmul.mubr.bf16.gmra.mxu1 %v771_v27 }
  0x33   :  { %331 = vmatprep.mubr.bf16.mxu0 %v772_v28  ;;  %363 = vmatprep.mubr.bf16.mxu1 %v774_v29 }
  0x3a   :  { %332 = vmatmul.mubr.bf16.gmra.mxu0 %v776_v30  ;;  %364 = vmatmul.mubr.bf16.gmra.mxu1 %v777_v31 }
  0xe2   :  { %v674_v32 = vpop.f32.mrf.mxu0  ;;  %v698_v33 = vpop.f32.mrf.mxu1 }
  0xe4   :  { %v675_v34 = vpop.f32.mrf.mxu0  ;;  %v699_v35 = vpop.f32.mrf.mxu1 }
  0xe5   :  { %v676_v36 = vadd.f32 %v675_v34, %v674_v32  ;;  %v700_v38 = vadd.f32 %v699_v35, %v698_v33 }
  0xe6   :  { %v677_v39 = vpop.f32.mrf.mxu0  ;;  %v701_v40 = vpop.f32.mrf.mxu1 }
  0xe7   :  { %v430_v41 = vadd.f32 %v676_v36, %v897_v37  ;;  %v438_v42 = vadd.f32 %v700_v38, %v897_v37 }
  0xe8   :  { %v678_v43 = vpop.f32.mrf.mxu0  ;;  %v702_v44 = vpop.f32.mrf.mxu1 }
  0xe9   :  { %v679_v45 = vadd.f32 %v678_v43, %v677_v39  ;;  %v703_v46 = vadd.f32 %v702_v44, %v701_v40  ;;  %v446_v51 = vmax.f32 %v430_v41, 0.0  ;;  %v454_v52 = vmax.f32 %v438_v42, 0.0 }
  0xea   :  { %v680_v47 = vpop.f32.mrf.mxu0  ;;  %v704_v48 = vpop.f32.mrf.mxu1 }
  0xeb   :  { %v431_v49 = vadd.f32 %v679_v45, %v897_v37  ;;  %v439_v50 = vadd.f32 %v703_v46, %v897_v37 }
  0xec   :  { %v681_v53 = vpop.f32.mrf.mxu0  ;;  %v705_v54 = vpop.f32.mrf.mxu1 }
  0xed   :  { %v447_v55 = vmax.f32 %v431_v49, 0.0  ;;  %v455_v56 = vmax.f32 %v439_v50, 0.0  ;;  %v682_v57 = vadd.f32 %v681_v53, %v680_v47  ;;  %v706_v58 = vadd.f32 %v705_v54, %v704_v48 }
  0xee   :  { %v683_v59 = vpop.f32.mrf.mxu0  ;;  %v707_v60 = vpop.f32.mrf.mxu1 }
  0xef   :  { %v614_v61 = vpack.c.bf16 %v447_v55, %v446_v51  ;;  %v634_v62 = vpack.c.bf16 %v455_v56, %v454_v52  ;;  %v432_v63 = vadd.f32 %v682_v57, %v897_v37  ;;  %v440_v0 = vadd.f32 %v706_v58, %v897_v37 }
  0xf0   :  { %v684_v1 = vpop.f32.mrf.mxu0  ;;  %v708_v2 = vpop.f32.mrf.mxu1 }
  0xf1   :  { %615 = vst [vmem:[%s942_s3] sm:$0xff] %v614_v61   ;;  %654 = vst [vmem:[%s942_s3 + $0x20] sm:$0xff] %v634_v62   ;;  %v685_v3 = vadd.f32 %v684_v1, %v683_v59  ;;  %v709_v4 = vadd.f32 %v708_v2, %v707_v60  ;;  %v448_v9 = vmax.f32 %v432_v63, 0.0  ;;  %v456_v10 = vmax.f32 %v440_v0, 0.0 }
  0xf2   :  { %v686_v5 = vpop.f32.mrf.mxu0  ;;  %v710_v6 = vpop.f32.mrf.mxu1 }
  0xf3   :  { %v433_v7 = vadd.f32 %v685_v3, %v897_v37  ;;  %v441_v8 = vadd.f32 %v709_v4, %v897_v37 }
  0xf4   :  { %v687_v11 = vpop.f32.mrf.mxu0  ;;  %v711_v12 = vpop.f32.mrf.mxu1 }
  0xf5   :  { %v449_v13 = vmax.f32 %v433_v7, 0.0  ;;  %v457_v14 = vmax.f32 %v441_v8, 0.0  ;;  %v688_v15 = vadd.f32 %v687_v11, %v686_v5  ;;  %v712_v16 = vadd.f32 %v711_v12, %v710_v6 }
  0xf6   :  { %v689_v17 = vpop.f32.mrf.mxu0  ;;  %v713_v18 = vpop.f32.mrf.mxu1 }
  0xf7   :  { %v619_v19 = vpack.c.bf16 %v449_v13, %v448_v9  ;;  %v639_v20 = vpack.c.bf16 %v457_v14, %v456_v10  ;;  %v434_v21 = vadd.f32 %v688_v15, %v897_v37  ;;  %v442_v22 = vadd.f32 %v712_v16, %v897_v37 }
  0xf8   :  { %v690_v23 = vpop.f32.mrf.mxu0  ;;  %v714_v24 = vpop.f32.mrf.mxu1 }
  0xf9   :  { %651 = vst [vmem:[%s942_s3 + $0x8] sm:$0xff] %v619_v19   ;;  %655 = vst [vmem:[%s942_s3 + $0x28] sm:$0xff] %v639_v20   ;;  %v691_v25 = vadd.f32 %v690_v23, %v689_v17  ;;  %v715_v26 = vadd.f32 %v714_v24, %v713_v18  ;;  %v450_v31 = vmax.f32 %v434_v21, 0.0  ;;  %v458_v32 = vmax.f32 %v442_v22, 0.0 }
  0xfa   :  { %v692_v27 = vpop.f32.mrf.mxu0  ;;  %v716_v28 = vpop.f32.mrf.mxu1 }
  0xfb   :  { %v435_v29 = vadd.f32 %v691_v25, %v897_v37  ;;  %v443_v30 = vadd.f32 %v715_v26, %v897_v37 }
  0xfc   :  { %v693_v33 = vpop.f32.mrf.mxu0  ;;  %v717_v34 = vpop.f32.mrf.mxu1 }
  0xfd   :  { %v451_v35 = vmax.f32 %v435_v29, 0.0  ;;  %v459_v36 = vmax.f32 %v443_v30, 0.0  ;;  %v694_v38 = vadd.f32 %v693_v33, %v692_v27  ;;  %v718_v39 = vadd.f32 %v717_v34, %v716_v28 }
  0xfe   :  { %v695_v40 = vpop.f32.mrf.mxu0  ;;  %v719_v41 = vpop.f32.mrf.mxu1 }
  0xff   :  { %v624_v42 = vpack.c.bf16 %v451_v35, %v450_v31  ;;  %v644_v43 = vpack.c.bf16 %v459_v36, %v458_v32  ;;  %v436_v46 = vadd.f32 %v694_v38, %v897_v37  ;;  %v444_v47 = vadd.f32 %v718_v39, %v897_v37 }
 0x100   :  { %v696_v44 = vpop.f32.mrf.mxu0  ;;  %v720_v45 = vpop.f32.mrf.mxu1 }
 0x101   :  { %652 = vst [vmem:[%s942_s3 + $0x10] sm:$0xff] %v624_v42   ;;  %656 = vst [vmem:[%s942_s3 + $0x30] sm:$0xff] %v644_v43   ;;  %v697_v48 = vadd.f32 %v696_v44, %v695_v40  ;;  %v721_v49 = vadd.f32 %v720_v45, %v719_v41  ;;  %v452_v52 = vmax.f32 %v436_v46, 0.0  ;;  %v460_v53 = vmax.f32 %v444_v47, 0.0 }
 0x103   :  { %v437_v50 = vadd.f32 %v697_v48, %v897_v37  ;;  %v445_v51 = vadd.f32 %v721_v49, %v897_v37 }
 0x105   :  { %v453_v54 = vmax.f32 %v437_v50, 0.0  ;;  %v461_v55 = vmax.f32 %v445_v51, 0.0 }
 0x107   :  { %v629_v56 = vpack.c.bf16 %v453_v54, %v452_v52  ;;  %v649_v57 = vpack.c.bf16 %v461_v55, %v460_v53 }
 0x109   :  { %653 = vst [vmem:[%s942_s3 + $0x18] sm:$0xff] %v629_v56   ;;  %657 = vst [vmem:[%s942_s3 + $0x38] sm:$0xff] %v649_v57  }

// kernel: _lambda_.25
= control target key start
LH: loop header
LB: loop body
LE: loop exit
PB: predicated region body
PF: predicated region fallthrough
CT: control target
= control target key end

     0   :  { %vm124_vm0 = vcmask 1043456   ;;  %s1353_s1 = inlined_call_operand.vmem [shape: bf16[128,128], index: 1, kind: input, shape index: {}]   ;;  %s1354_s0 = inlined_call_operand.vmem [shape: bf16[27,32,128], index: 0, kind: input, shape index: {}]   ;;  %s1355_s2 = inlined_call_operand.vmem [shape: f32[1,128], index: 2, kind: input, shape index: {}]   ;;  %s1356_s3 = inlined_call_operand.vmem [shape: bf16[32,128], index: 3, kind: output, shape index: {}]  }
   0x1   :  { %v770_v0 = vld [vmem:[%s1353_s1 + $0x38] sm:$0xff]   ;;  %v771_v1 = vld [vmem:[%s1353_s1 + $0x30] sm:$0xff]   ;;  %v772_v2 = vld [vmem:[%s1353_s1 + $0x28] sm:$0xff]  }
   0x2   :  { %750 = vmatprep.subr.bf16.mxu0 %v770_v0  ;;  %v773_v3 = vld [vmem:[%s1353_s1 + $0x20] sm:$0xff]   ;;  %v774_v4 = vld [vmem:[%s1353_s1 + $0x18] sm:$0xff]   ;;  %v775_v5 = vld [vmem:[%s1353_s1 + $0x10] sm:$0xff]  }
   0x3   :  { %751 = vmatpush3.bf16.msra.mxu0 %v770_v0  ;;  %v776_v6 = vld [vmem:[%s1353_s1 + $0x8] sm:$0xff]   ;;  %v16_v7 = vld [vmem:[%s1354_s0] sm:$0xf]  ;;  %v20_v8 = vld [vmem:[%s1354_s0 + $0x10] sm:$0xf] }
   0x4   :  { %752 = vmatprep.subr.bf16.mxu0 %v771_v1  ;;  %v24_v9 = vld [vmem:[%s1354_s0 + $0x20] sm:$0xf]  ;;  %v28_v11 = vld [vmem:[%s1354_s0 + $0x30] sm:$0xf]  ;;  %v127_v12 = vsel %vm124_vm0, %v16_v7, 4286644096 }
   0x5   :  { %v777_v10 = vld [vmem:[%s1353_s1] sm:$0xff]   ;;  %v130_v13 = vsel %vm124_vm0, %v20_v8, 4286644096  ;;  %v134_v14 = vsel %vm124_vm0, %v24_v9, 4286644096 }
   0x6   :  { %v32_v15 = vld [vmem:[%s1354_s0 + $0x40] sm:$0xf]  ;;  %v132_v16 = vmax.bf16 %v130_v13, %v127_v12  ;;  %v138_v17 = vsel %vm124_vm0, %v28_v11, 4286644096  ;;  %v36_v18 = vld [vmem:[%s1354_s0 + $0x50] sm:$0xf] }
   0x7   :  { %753 = vmatpush3.bf16.msra.mxu0 %v771_v1  ;;  %v142_v20 = vsel %vm124_vm0, %v32_v15, 4286644096  ;;  %v17_v21 = vld [vmem:[%s1354_s0 + $0x4] sm:$0xf]  ;;  %v40_v22 = vld [vmem:[%s1354_s0 + $0x60] sm:$0xf] }
   0x8   :  { %754 = vmatprep.subr.bf16.mxu0 %v772_v2  ;;  %v136_v19 = vmax.bf16 %v134_v14, %v132_v16  ;;  %v21_v24 = vld [vmem:[%s1354_s0 + $0x14] sm:$0xf]  ;;  %v25_v25 = vld [vmem:[%s1354_s0 + $0x24] sm:$0xf]  ;;  %v146_v26 = vsel %vm124_vm0, %v36_v18, 4286644096 }
   0x9   :  { %v44_v27 = vld [vmem:[%s1354_s0 + $0x70] sm:$0xf]  ;;  %v29_v29 = vld [vmem:[%s1354_s0 + $0x34] sm:$0xf]  ;;  %v48_v30 = vld [vmem:[%s1354_s0 + $0x80] sm:$0xf] }
   0xa   :  { %v140_v23 = vmax.bf16 %v138_v17, %v136_v19  ;;  %v150_v31 = vsel %vm124_vm0, %v40_v22, 4286644096  ;;  %v234_v33 = vsel %vm124_vm0, %v17_v21, 4286644096  ;;  %v237_v34 = vsel %vm124_vm0, %v21_v24, 4286644096 }
   0xb   :  { %755 = vmatpush3.bf16.msra.mxu0 %v772_v2  ;;  %v241_v35 = vsel %vm124_vm0, %v25_v25, 4286644096  ;;  %v33_v36 = vld [vmem:[%s1354_s0 + $0x44] sm:$0xf]  ;;  %v154_v37 = vsel %vm124_vm0, %v44_v27, 4286644096  ;;  %v239_v38 = vmax.bf16 %v237_v34, %v234_v33 }
   0xc   :  { %756 = vmatprep.subr.bf16.mxu0 %v773_v3  ;;  %v144_v28 = vmax.bf16 %v142_v20, %v140_v23  ;;  %v52_v39 = vld [vmem:[%s1354_s0 + $0x90] sm:$0xf]  ;;  %v245_v41 = vsel %vm124_vm0, %v29_v29, 4286644096  ;;  %v37_v42 = vld [vmem:[%s1354_s0 + $0x54] sm:$0xf] }
   0xd   :  { %v158_v43 = vsel %vm124_vm0, %v48_v30, 4286644096  ;;  %v243_v44 = vmax.bf16 %v241_v35, %v239_v38  ;;  %v56_v45 = vld [vmem:[%s1354_s0 + $0xa0] sm:$0xf]  ;;  %v249_v47 = vsel %vm124_vm0, %v33_v36, 4286644096 }
   0xe   :  { %v148_v32 = vmax.bf16 %v146_v26, %v144_v28  ;;  %v41_v48 = vld [vmem:[%s1354_s0 + $0x64] sm:$0xf]  ;;  %v162_v49 = vsel %vm124_vm0, %v52_v39, 4286644096  ;;  %v60_v51 = vld [vmem:[%s1354_s0 + $0xb0] sm:$0xf] }
   0xf   :  { %757 = vmatpush3.bf16.msra.mxu0 %v773_v3  ;;  %v247_v50 = vmax.bf16 %v245_v41, %v243_v44  ;;  %v253_v53 = vsel %vm124_vm0, %v37_v42, 4286644096  ;;  %v45_v54 = vld [vmem:[%s1354_s0 + $0x74] sm:$0xf]  ;;  %v166_v55 = vsel %vm124_vm0, %v56_v45, 4286644096 }
  0x10   :  { %758 = vmatprep.subr.bf16.mxu0 %v774_v4  ;;  %v152_v40 = vmax.bf16 %v150_v31, %v148_v32  ;;  %v49_v57 = vld [vmem:[%s1354_s0 + $0x84] sm:$0xf]  ;;  %v64_v58 = vld [vmem:[%s1354_s0 + $0xc0] sm:$0xf]  ;;  %v257_v60 = vsel %vm124_vm0, %v41_v48, 4286644096 }
  0x11   :  { %v251_v56 = vmax.bf16 %v249_v47, %v247_v50  ;;  %v53_v61 = vld [vmem:[%s1354_s0 + $0x94] sm:$0xf]  ;;  %v68_v62 = vld [vmem:[%s1354_s0 + $0xd0] sm:$0xf]  ;;  %v72_v63 = vld [vmem:[%s1354_s0 + $0xe0] sm:$0xf] }
  0x12   :  { %v156_v46 = vmax.bf16 %v154_v37, %v152_v40  ;;  %v170_v0 = vsel %vm124_vm0, %v60_v51, 4286644096  ;;  %v76_v2 = vld [vmem:[%s1354_s0 + $0xf0] sm:$0xf]  ;;  %v80_v3 = vld [vmem:[%s1354_s0 + $0x100] sm:$0xf] }
  0x13   :  { %759 = vmatpush3.bf16.msra.mxu0 %v774_v4  ;;  %v255_v1 = vmax.bf16 %v253_v53, %v251_v56  ;;  %v84_v4 = vld [vmem:[%s1354_s0 + $0x110] sm:$0xf]  ;;  %v57_v7 = vld [vmem:[%s1354_s0 + $0xa4] sm:$0xf]  ;;  %v88_v8 = vld [vmem:[%s1354_s0 + $0x120] sm:$0xf] }
  0x14   :  { %760 = vmatprep.subr.bf16.mxu0 %v775_v5  ;;  %v160_v52 = vmax.bf16 %v158_v43, %v156_v46  ;;  %v92_v9 = vld [vmem:[%s1354_s0 + $0x130] sm:$0xf]  ;;  %v96_v12 = vld [vmem:[%s1354_s0 + $0x140] sm:$0xf]  ;;  %v265_v16 = vsel %vm124_vm0, %v49_v57, 4286644096 }
  0x15   :  { %v259_v11 = vmax.bf16 %v257_v60, %v255_v1  ;;  %v100_v13 = vld [vmem:[%s1354_s0 + $0x150] sm:$0xf]  ;;  %v104_v14 = vld [vmem:[%s1354_s0 + $0x160] sm:$0xf]  ;;  %v61_v17 = vld [vmem:[%s1354_s0 + $0xb4] sm:$0xf] }
  0x16   :  { %v164_v59 = vmax.bf16 %v162_v49, %v160_v52  ;;  %v108_v18 = vld [vmem:[%s1354_s0 + $0x170] sm:$0xf]  ;;  %v112_v19 = vld [vmem:[%s1354_s0 + $0x180] sm:$0xf]  ;;  %v178_v20 = vsel %vm124_vm0, %v68_v62, 4286644096 }
  0x17   :  { %761 = vmatpush3.bf16.msra.mxu0 %v775_v5  ;;  %v65_v22 = vld [vmem:[%s1354_s0 + $0xc4] sm:$0xf]  ;;  %v116_v23 = vld [vmem:[%s1354_s0 + $0x190] sm:$0xf]  ;;  %v120_v24 = vld [vmem:[%s1354_s0 + $0x1a0] sm:$0xf] }
  0x18   :  { %762 = vmatprep.subr.bf16.mxu0 %v776_v6  ;;  %v168_v5 = vmax.bf16 %v166_v55, %v164_v59  ;;  %v182_v26 = vsel %vm124_vm0, %v72_v63, 4286644096  ;;  %v269_v27 = vsel %vm124_vm0, %v53_v61, 4286644096  ;;  %v69_v28 = vld [vmem:[%s1354_s0 + $0xd4] sm:$0xf] }
  0x19   :  { %v73_v29 = vld [vmem:[%s1354_s0 + $0xe4] sm:$0xf]  ;;  %v77_v30 = vld [vmem:[%s1354_s0 + $0xf4] sm:$0xf]  ;;  %v186_v31 = vsel %vm124_vm0, %v76_v2, 4286644096 }
  0x1a   :  { %v172_v15 = vmax.bf16 %v170_v0, %v168_v5  ;;  %v190_v32 = vsel %vm124_vm0, %v80_v3, 4286644096  ;;  %v194_v33 = vsel %vm124_vm0, %v84_v4, 4286644096  ;;  %v81_v35 = vld [vmem:[%s1354_s0 + $0x104] sm:$0xf] }
  0x1b   :  { %763 = vmatpush3.bf16.msra.mxu0 %v776_v6  ;;  %v261_v6 = vsel %vm124_vm0, %v45_v54, 4286644096  ;;  %v85_v36 = vld [vmem:[%s1354_s0 + $0x114] sm:$0xf]  ;;  %v89_v37 = vld [vmem:[%s1354_s0 + $0x124] sm:$0xf] }
  0x1c   :  { %764 = vmatprep.subr.bf16.mxu0 %v777_v10  ;;  %v263_v21 = vmax.bf16 %v261_v6, %v259_v11  ;;  %v198_v39 = vsel %vm124_vm0, %v88_v8, 4286644096  ;;  %v990_v40 = vsel %vm124_vm0, %v92_v9, 4286644096  ;;  %v273_v41 = vsel %vm124_vm0, %v57_v7, 4286644096 }
  0x1d   :  { %v93_v42 = vld [vmem:[%s1354_s0 + $0x134] sm:$0xf]  ;;  %v97_v43 = vld [vmem:[%s1354_s0 + $0x144] sm:$0xf]  ;;  %v206_v45 = vsel %vm124_vm0, %v96_v12, 4286644096 }
  0x1e   :  { %v267_v34 = vmax.bf16 %v265_v16, %v263_v21  ;;  %v101_v44 = vld [vmem:[%s1354_s0 + $0x154] sm:$0xf]  ;;  %v1004_v46 = vsel %vm124_vm0, %v100_v13, 4286644096  ;;  %v1007_v47 = vsel %vm124_vm0, %v104_v14, 4286644096 }
  0x1f   :  { %765 = vmatpush3.bf16.msra.mxu0 %v777_v10  ;;  %v174_v10 = vsel %vm124_vm0, %v64_v58, 4286644096  ;;  %v105_v49 = vld [vmem:[%s1354_s0 + $0x164] sm:$0xf]  ;;  %v109_v50 = vld [vmem:[%s1354_s0 + $0x174] sm:$0xf] }
  0x20   :  { %v176_v25 = vmax.bf16 %v174_v10, %v172_v15  ;;  %v271_v48 = vmax.bf16 %v269_v27, %v267_v34  ;;  %v113_v51 = vld [vmem:[%s1354_s0 + $0x184] sm:$0xf]  ;;  %v1019_v53 = vsel %vm124_vm0, %v108_v18, 4286644096  ;;  %v1022_v54 = vsel %vm124_vm0, %v112_v19, 4286644096 }
  0x21   :  { %v277_v55 = vsel %vm124_vm0, %v61_v17, 4286644096  ;;  %v1026_v56 = vsel %vm124_vm0, %v116_v23, 4286644096  ;;  %v1029_v57 = vsel %vm124_vm0, %v120_v24, 4286644096 }
  0x22   :  { %v180_v38 = vmax.bf16 %v178_v20, %v176_v25  ;;  %v275_v58 = vmax.bf16 %v273_v41, %v271_v48  ;;  %v281_v59 = vsel %vm124_vm0, %v65_v22, 4286644096  ;;  %v117_v60 = vld [vmem:[%s1354_s0 + $0x194] sm:$0xf]  ;;  %v121_v61 = vld [vmem:[%s1354_s0 + $0x1a4] sm:$0xf] }
  0x23   :  { %v285_v63 = vsel %vm124_vm0, %v69_v28, 4286644096  ;;  %v289_v0 = vsel %vm124_vm0, %v73_v29, 4286644096  ;;  %v293_v1 = vsel %vm124_vm0, %v77_v30, 4286644096 }
  0x24   :  { %v184_v52 = vmax.bf16 %v182_v26, %v180_v38  ;;  %v279_v2 = vmax.bf16 %v277_v55, %v275_v58  ;;  %v297_v3 = vsel %vm124_vm0, %v81_v35, 4286644096  ;;  %v1043_v4 = vsel %vm124_vm0, %v85_v36, 4286644096  ;;  %v18_v15 = vld [vmem:[%s1354_s0 + $0x8] sm:$0xf] }
  0x25   :  { %v1046_v5 = vsel %vm124_vm0, %v89_v37, 4286644096  ;;  %v1049_v7 = vsel %vm124_vm0, %v93_v42, 4286644096  ;;  %v1052_v8 = vsel %vm124_vm0, %v97_v43, 4286644096 }
  0x26   :  { %v188_v62 = vmax.bf16 %v186_v31, %v184_v52  ;;  %v1055_v9 = vsel %vm124_vm0, %v101_v44, 4286644096  ;;  %v283_v10 = vmax.bf16 %v281_v59, %v279_v2  ;;  %v1058_v11 = vsel %vm124_vm0, %v105_v49, 4286644096  ;;  %v22_v16 = vld [vmem:[%s1354_s0 + $0x18] sm:$0xf] }
  0x27   :  { %v1061_v12 = vsel %vm124_vm0, %v109_v50, 4286644096  ;;  %v1064_v13 = vsel %vm124_vm0, %v113_v51, 4286644096  ;;  %v26_v17 = vld [vmem:[%s1354_s0 + $0x28] sm:$0xf] }
  0x28   :  { %v192_v6 = vmax.bf16 %v190_v32, %v188_v62  ;;  %v287_v18 = vmax.bf16 %v285_v63, %v283_v10  ;;  %v1076_v19 = vsel %vm124_vm0, %v117_v60, 4286644096  ;;  %v1079_v20 = vsel %vm124_vm0, %v121_v61, 4286644096  ;;  %v30_v21 = vld [vmem:[%s1354_s0 + $0x38] sm:$0xf] }
  0x29   :  { %v34_v23 = vld [vmem:[%s1354_s0 + $0x48] sm:$0xf]  ;;  %v38_v24 = vld [vmem:[%s1354_s0 + $0x58] sm:$0xf]  ;;  %v341_v29 = vsel %vm124_vm0, %v18_v15, 4286644096 }
  0x2a   :  { %v196_v14 = vmax.bf16 %v194_v33, %v192_v6  ;;  %v42_v25 = vld [vmem:[%s1354_s0 + $0x68] sm:$0xf]  ;;  %v291_v26 = vmax.bf16 %v289_v0, %v287_v18  ;;  %v46_v27 = vld [vmem:[%s1354_s0 + $0x78] sm:$0xf]  ;;  %v344_v30 = vsel %vm124_vm0, %v22_v16, 4286644096 }
  0x2b   :  { %v74_v28 = vld [vmem:[%s1354_s0 + $0xe8] sm:$0xf]  ;;  %v348_v31 = vsel %vm124_vm0, %v26_v17, 4286644096  ;;  %v78_v33 = vld [vmem:[%s1354_s0 + $0xf8] sm:$0xf]  ;;  %v346_v36 = vmax.bf16 %v344_v30, %v341_v29 }
  0x2c   :  { %v200_v22 = vmax.bf16 %v198_v39, %v196_v14  ;;  %v82_v34 = vld [vmem:[%s1354_s0 + $0x108] sm:$0xf]  ;;  %v86_v35 = vld [vmem:[%s1354_s0 + $0x118] sm:$0xf]  ;;  %v295_v37 = vmax.bf16 %v293_v1, %v291_v26  ;;  %v356_v51 = vsel %vm124_vm0, %v34_v23, 4286644096 }
  0x2d   :  { %v90_v38 = vld [vmem:[%s1354_s0 + $0x128] sm:$0xf]  ;;  %v94_v39 = vld [vmem:[%s1354_s0 + $0x138] sm:$0xf]  ;;  %v350_v48 = vmax.bf16 %v348_v31, %v346_v36  ;;  %v360_v52 = vsel %vm124_vm0, %v38_v24, 4286644096 }
  0x2e   :  { %v204_v32 = vmax.bf16 %v990_v40, %v200_v22  ;;  %v352_v40 = vsel %vm124_vm0, %v30_v21, 4286644096  ;;  %v98_v42 = vld [vmem:[%s1354_s0 + $0x148] sm:$0xf]  ;;  %v102_v43 = vld [vmem:[%s1354_s0 + $0x158] sm:$0xf]  ;;  %v299_v49 = vmax.bf16 %v297_v3, %v295_v37 }
  0x2f   :  { %v106_v44 = vld [vmem:[%s1354_s0 + $0x168] sm:$0xf]  ;;  %v110_v50 = vld [vmem:[%s1354_s0 + $0x178] sm:$0xf]  ;;  %v364_v55 = vsel %vm124_vm0, %v42_v25, 4286644096  ;;  %v354_v61 = vmax.bf16 %v352_v40, %v350_v48 }
  0x30   :  { %v208_v41 = vmax.bf16 %v206_v45, %v204_v32  ;;  %v114_v45 = vld [vmem:[%s1354_s0 + $0x188] sm:$0xf]  ;;  %v19_v59 = vld [vmem:[%s1354_s0 + $0xc] sm:$0xf]  ;;  %v118_v60 = vld [vmem:[%s1354_s0 + $0x198] sm:$0xf]  ;;  %v303_v0 = vmax.bf16 %v1043_v4, %v299_v49 }
  0x31   :  { %v368_v62 = vsel %vm124_vm0, %v46_v27, 4286644096  ;;  %v1146_v63 = vsel %vm124_vm0, %v74_v28, 4286644096  ;;  %v27_v1 = vld [vmem:[%s1354_s0 + $0x2c] sm:$0xf]  ;;  %v358_v15 = vmax.bf16 %v356_v51, %v354_v61 }
  0x32   :  { %v212_v58 = vmax.bf16 %v1004_v46, %v208_v41  ;;  %v23_v46 = vld [vmem:[%s1354_s0 + $0x1c] sm:$0xf]  ;;  %v1156_v2 = vsel %vm124_vm0, %v78_v33, 4286644096  ;;  %v1159_v3 = vsel %vm124_vm0, %v82_v34, 4286644096  ;;  %v307_v18 = vmax.bf16 %v1046_v5, %v303_v0 }
  0x33   :  { %v1162_v6 = vsel %vm124_vm0, %v86_v35, 4286644096  ;;  %v50_v4 = vld [vmem:[%s1354_s0 + $0x88] sm:$0xf]  ;;  %v1172_v16 = vsel %vm124_vm0, %v90_v38, 4286644096  ;;  %v362_v28 = vmax.bf16 %v360_v52, %v358_v15 }
  0x34   :  { %v216_v10 = vmax.bf16 %v1007_v47, %v212_v58  ;;  %v122_v14 = vld [vmem:[%s1354_s0 + $0x1a8] sm:$0xf]  ;;  %v1175_v17 = vsel %vm124_vm0, %v94_v39, 4286644096  ;;  %v31_v47 = vld [vmem:[%s1354_s0 + $0x3c] sm:$0xf]  ;;  %v311_v31 = vmax.bf16 %v1049_v7, %v307_v18 }
  0x35   :  { %v54_v21 = vld [vmem:[%s1354_s0 + $0x98] sm:$0xf]  ;;  %v58_v22 = vld [vmem:[%s1354_s0 + $0xa8] sm:$0xf]  ;;  %v1188_v23 = vsel %vm124_vm0, %v98_v42, 4286644096  ;;  %v366_v38 = vmax.bf16 %v364_v55, %v362_v28 }
  0x36   :  { %v1191_v24 = vsel %vm124_vm0, %v102_v43, 4286644096  ;;  %v1194_v5 = vsel %vm124_vm0, %v106_v44, 4286644096  ;;  %v220_v25 = vmax.bf16 %v1019_v53, %v216_v10  ;;  %v62_v26 = vld [vmem:[%s1354_s0 + $0xb8] sm:$0xf]  ;;  %v315_v41 = vmax.bf16 %v1052_v8, %v311_v31 }
  0x37   :  { %v66_v27 = vld [vmem:[%s1354_s0 + $0xc8] sm:$0xf]  ;;  %v1204_v29 = vsel %vm124_vm0, %v110_v50, 4286644096  ;;  %v1207_v30 = vsel %vm124_vm0, %v114_v45, 4286644096  ;;  %v370_v50 = vmax.bf16 %v368_v62, %v366_v38 }
  0x38   :  { %v35_v53 = vld [vmem:[%s1354_s0 + $0x4c] sm:$0xf]  ;;  %v1214_v32 = vsel %vm124_vm0, %v118_v60, 4286644096  ;;  %v1217_v33 = vsel %vm124_vm0, %v122_v14, 4286644096  ;;  %v224_v35 = vmax.bf16 %v1022_v54, %v220_v25  ;;  %v319_v55 = vmax.bf16 %v1055_v9, %v315_v41 }
  0x39   :  { %v448_v34 = vsel %vm124_vm0, %v19_v59, 4286644096  ;;  %v39_v36 = vld [vmem:[%s1354_s0 + $0x5c] sm:$0xf]  ;;  %v43_v7 = vld [vmem:[%s1354_s0 + $0x6c] sm:$0xf] }
  0x3a   :  { %v70_v37 = vld [vmem:[%s1354_s0 + $0xd8] sm:$0xf]  ;;  %v451_v39 = vsel %vm124_vm0, %v23_v46, 4286644096  ;;  %v455_v40 = vsel %vm124_vm0, %v27_v1, 4286644096  ;;  %v228_v46 = vmax.bf16 %v1026_v56, %v224_v35  ;;  %v323_v15 = vmax.bf16 %v1058_v11, %v319_v55 }
  0x3b   :  { %v47_v54 = vld [vmem:[%s1354_s0 + $0x7c] sm:$0xf]  ;;  %v75_v42 = vld [vmem:[%s1354_s0 + $0xec] sm:$0xf]  ;;  %v372_v44 = vsel %vm124_vm0, %v50_v4, 4286644096  ;;  %v453_v48 = vmax.bf16 %v451_v39, %v448_v34 }
  0x3c   :  { %v79_v43 = vld [vmem:[%s1354_s0 + $0xfc] sm:$0xf]  ;;  %v83_v49 = vld [vmem:[%s1354_s0 + $0x10c] sm:$0xf]  ;;  %v376_v45 = vsel %vm124_vm0, %v54_v21, 4286644096  ;;  %v374_v10 = vmax.bf16 %v372_v44, %v370_v50  ;;  %v327_v31 = vmax.bf16 %v1061_v12, %v323_v15 }
  0x3d   :  { %v87_v8 = vld [vmem:[%s1354_s0 + $0x11c] sm:$0xf]  ;;  %v380_v51 = vsel %vm124_vm0, %v58_v22, 4286644096  ;;  %v459_v52 = vsel %vm124_vm0, %v31_v47, 4286644096  ;;  %v457_v0 = vmax.bf16 %v455_v40, %v453_v48 }
  0x3e   :  { %v91_v58 = vld [vmem:[%s1354_s0 + $0x12c] sm:$0xf]  ;;  %v95_v59 = vld [vmem:[%s1354_s0 + $0x13c] sm:$0xf]  ;;  %v384_v61 = vsel %vm124_vm0, %v62_v26, 4286644096  ;;  %v378_v26 = vmax.bf16 %v376_v45, %v374_v10  ;;  %v331_v40 = vmax.bf16 %v1064_v13, %v327_v31 }
  0x3f   :  { %v99_v60 = vld [vmem:[%s1354_s0 + $0x14c] sm:$0xf]  ;;  %v388_v62 = vsel %vm124_vm0, %v66_v27, 4286644096  ;;  %v103_v9 = vld [vmem:[%s1354_s0 + $0x15c] sm:$0xf]  ;;  %v461_v21 = vmax.bf16 %v459_v52, %v457_v0 }
  0x40   :  { %v107_v1 = vld [vmem:[%s1354_s0 + $0x16c] sm:$0xf]  ;;  %v392_v4 = vsel %vm124_vm0, %v70_v37, 4286644096  ;;  %v463_v14 = vsel %vm124_vm0, %v35_v53, 4286644096  ;;  %v382_v37 = vmax.bf16 %v380_v51, %v378_v26  ;;  %v335_v13 = vmax.bf16 %v1076_v19, %v331_v40 }
  0x41   :  { %v111_v18 = vld [vmem:[%s1354_s0 + $0x17c] sm:$0xf]  ;;  %v115_v56 = vld [vmem:[%s1354_s0 + $0x18c] sm:$0xf]  ;;  %v467_v22 = vsel %vm124_vm0, %v39_v36, 4286644096  ;;  %v465_v34 = vmax.bf16 %v463_v14, %v461_v21 }
  0x42   :  { %v119_v47 = vld [vmem:[%s1354_s0 + $0x19c] sm:$0xf]  ;;  %v471_v25 = vsel %vm124_vm0, %v43_v7, 4286644096  ;;  %v475_v11 = vsel %vm124_vm0, %v47_v54, 4286644096 }
  0x43   :  { %v503_v27 = vsel %vm124_vm0, %v75_v42, 4286644096  ;;  %v507_v28 = vsel %vm124_vm0, %v79_v43, 4286644096  ;;  %v123_v53 = vld [vmem:[%s1354_s0 + $0x1ac] sm:$0xf]  ;;  %v469_v41 = vmax.bf16 %v467_v22, %v465_v34  ;;  %v386_v43 = vmax.bf16 %v384_v61, %v382_v37 }
  0x44   :  { %v511_v35 = vsel %vm124_vm0, %v83_v49, 4286644096  ;;  %v515_v36 = vsel %vm124_vm0, %v87_v8, 4286644096  ;;  %v519_v7 = vsel %vm124_vm0, %v91_v58, 4286644096  ;;  %v232_v8 = vmax.bf16 %v1029_v57, %v228_v46 }
  0x45   :  { %v523_v38 = vsel %vm124_vm0, %v95_v59, 4286644096  ;;  %v527_v39 = vsel %vm124_vm0, %v99_v60, 4286644096  ;;  %v51_v12 = vld [vmem:[%s1354_s0 + $0x8c] sm:$0xf]  ;;  %v473_v45 = vmax.bf16 %v471_v25, %v469_v41  ;;  %v390_v52 = vmax.bf16 %v388_v62, %v386_v43 }
  0x46   :  { %v531_v54 = vsel %vm124_vm0, %v103_v9, 4286644096  ;;  %v535_v42 = vsel %vm124_vm0, %v107_v1, 4286644096  ;;  %v539_v44 = vsel %vm124_vm0, %v111_v18, 4286644096  ;;  %v339_v58 = vmax.bf16 %v1079_v20, %v335_v13 }
  0x47   :  { %v543_v48 = vsel %vm124_vm0, %v115_v56, 4286644096  ;;  %v547_v49 = vsel %vm124_vm0, %v119_v47, 4286644096  ;;  %v55_v50 = vld [vmem:[%s1354_s0 + $0x9c] sm:$0xf]  ;;  %v477_v60 = vmax.bf16 %v475_v11, %v473_v45  ;;  %v394_v57 = vmax.bf16 %v392_v4, %v390_v52 }
  0x48   :  { %v551_v51 = vsel %vm124_vm0, %v123_v53, 4286644096  ;;  %v479_v55 = vsel %vm124_vm0, %v51_v12, 4286644096  ;;  %v59_v59 = vld [vmem:[%s1354_s0 + $0xac] sm:$0xf]  ;;  %v711_v61 = vcombine.low %v232_v8, %v339_v58 }
  0x49   :  { %v483_v19 = vsel %vm124_vm0, %v55_v50, 4286644096  ;;  %v63_v0 = vld [vmem:[%s1354_s0 + $0xbc] sm:$0xf]  ;;  %v481_v46 = vmax.bf16 %v479_v55, %v477_v60  ;;  %v398_v62 = vmax.bf16 %v1146_v63, %v394_v57  ;;  %v487_v9 = vsel %vm124_vm0, %v59_v59, 4286644096 }
  0x4a   :  { %766 = vmatprep.mubr.bf16.mxu0 %v711_v61  ;;  %v67_v20 = vld [vmem:[%s1354_s0 + $0xcc] sm:$0xf]  ;;  %v491_v4 = vsel %vm124_vm0, %v63_v0, 4286644096  ;;  %v71_v14 = vld [vmem:[%s1354_s0 + $0xdc] sm:$0xf] }
  0x4b   :  { %v485_v1 = vmax.bf16 %v483_v19, %v481_v46  ;;  %v402_v10 = vmax.bf16 %v1156_v2, %v398_v62  ;;  %v495_v63 = vsel %vm124_vm0, %v67_v20, 4286644096  ;;  %v499_v21 = vsel %vm124_vm0, %v71_v14, 4286644096 }
  0x4d   :  { %v489_v15 = vmax.bf16 %v487_v9, %v485_v1  ;;  %v406_v18 = vmax.bf16 %v1159_v3, %v402_v10 }
  0x4f   :  { %v493_v56 = vmax.bf16 %v491_v4, %v489_v15  ;;  %v410_v47 = vmax.bf16 %v1162_v6, %v406_v18 }
  0x51   :  { %v497_v22 = vmax.bf16 %v495_v63, %v493_v56  ;;  %v414_v25 = vmax.bf16 %v1172_v16, %v410_v47 }
  0x53   :  { %v501_v2 = vmax.bf16 %v499_v21, %v497_v22  ;;  %v418_v26 = vmax.bf16 %v1175_v17, %v414_v25 }
  0x55   :  { %v505_v11 = vmax.bf16 %v503_v27, %v501_v2  ;;  %v422_v31 = vmax.bf16 %v1188_v23, %v418_v26 }
  0x57   :  { %v509_v53 = vmax.bf16 %v507_v28, %v505_v11  ;;  %v426_v34 = vmax.bf16 %v1191_v24, %v422_v31 }
  0x59   :  { %v513_v3 = vmax.bf16 %v511_v35, %v509_v53  ;;  %v430_v37 = vmax.bf16 %v1194_v5, %v426_v34 }
  0x5b   :  { %v517_v40 = vmax.bf16 %v515_v36, %v513_v3  ;;  %v434_v6 = vmax.bf16 %v1204_v29, %v430_v37  ;;  %v710_v29 = vld [vmem:[%s1355_s2] ss:$0 sm:$0xff] }
  0x5d   :  { %v521_v12 = vmax.bf16 %v519_v7, %v517_v40  ;;  %v438_v41 = vmax.bf16 %v1207_v30, %v434_v6 }
  0x5f   :  { %v525_v43 = vmax.bf16 %v523_v38, %v521_v12  ;;  %v442_v16 = vmax.bf16 %v1214_v32, %v438_v41 }
  0x61   :  { %v529_v8 = vmax.bf16 %v527_v39, %v525_v43  ;;  %v446_v17 = vmax.bf16 %v1217_v33, %v442_v16 }
  0x63   :  { %v533_v27 = vmax.bf16 %v531_v54, %v529_v8 }
  0x65   :  { %v537_v23 = vmax.bf16 %v535_v42, %v533_v27 }
  0x67   :  { %v541_v28 = vmax.bf16 %v539_v44, %v537_v23 }
  0x69   :  { %v545_v13 = vmax.bf16 %v543_v48, %v541_v28 }
  0x6b   :  { %v549_v24 = vmax.bf16 %v547_v49, %v545_v13 }
  0x6d   :  { %v553_v35 = vmax.bf16 %v551_v51, %v549_v24 }
  0x6f   :  { %v712_v50 = vcombine.low %v446_v17, %v553_v35 }
  0x71   :  { %767 = vmatmul.mubr.bf16.vlgmr.msra.gmra.mxu0 %v712_v50 }
 0x131   :  { %v768_v5 = vpop.f32.mrf.mxu0 }
 0x132   :  { %v680_v7 = vadd.f32 %v768_v5, %v710_v29 }
 0x133   :  { %v671_v30 = vpop.f32.mrf.mxu0 }
 0x134   :  { %v672_v39 = vadd.f32 %v710_v29, %v671_v30 }
 0x135   :  { %v769_v36 = vpop.f32.mrf.mxu0 }
 0x136   :  { %v683_v32 = vadd.f32 %v769_v36, %v710_v29 }
 0x137   :  { %v674_v38 = vpop.f32.mrf.mxu0 }
 0x138   :  { %v737_v33 = vpack.c.bf16 %v683_v32, %v680_v7  ;;  %v675_v54 = vadd.f32 %v710_v29, %v674_v38 }
 0x13a   :  { %739 = vst [vmem:[%s1356_s3 + $0x8] sm:$0xff] %v737_v33   ;;  %v732_v42 = vpack.c.bf16 %v675_v54, %v672_v39 }
 0x13c   :  { %733 = vst [vmem:[%s1356_s3] sm:$0xff] %v732_v42  }

// kernel: _lambda_.24
= control target key start
LH: loop header
LB: loop body
LE: loop exit
PB: predicated region body
PF: predicated region fallthrough
CT: control target
= control target key end

     0   :  { %s477_s1 = inlined_call_operand.vmem [shape: bf16[256,128], index: 1, kind: input, shape index: {}]   ;;  %s478_s0 = inlined_call_operand.vmem [shape: bf16[32,256], index: 0, kind: input, shape index: {}]   ;;  %s479_s2 = inlined_call_operand.vmem [shape: f32[1,128], index: 2, kind: input, shape index: {}]   ;;  %s480_s3 = inlined_call_operand.vmem [shape: bf16[32,128], index: 3, kind: output, shape index: {}]  }
   0x1   :  { %v366_v0 = vld [vmem:[%s477_s1 + $0x78] sm:$0xff]   ;;  %v368_v2 = vld [vmem:[%s477_s1 + $0x70] sm:$0xff]   ;;  %v370_v4 = vld [vmem:[%s477_s1 + $0x68] sm:$0xff]  }
   0x2   :  { %v367_v1 = vld [vmem:[%s477_s1 + $0x38] sm:$0xff]   ;;  %322 = vmatprep.subr.bf16.mxu0 %v366_v0  ;;  %350 = vmatprep.subr.bf16.mxu1 %v366_v0  ;;  %v369_v3 = vld [vmem:[%s477_s1 + $0x30] sm:$0xff]   ;;  %v371_v5 = vld [vmem:[%s477_s1 + $0x28] sm:$0xff]  }
   0x3   :  { %323 = vmatpush3.bf16.msra.mxu0 %v367_v1  ;;  %358 = vmatpush3.bf16.msra.mxu1 %v367_v1  ;;  %v372_v6 = vld [vmem:[%s477_s1 + $0x60] sm:$0xff]   ;;  %v374_v8 = vld [vmem:[%s477_s1 + $0x58] sm:$0xff]   ;;  %v376_v10 = vld [vmem:[%s477_s1 + $0x50] sm:$0xff]  }
   0x4   :  { %324 = vmatprep.subr.bf16.mxu0 %v368_v2  ;;  %351 = vmatprep.subr.bf16.mxu1 %v368_v2  ;;  %v373_v7 = vld [vmem:[%s477_s1 + $0x20] sm:$0xff]   ;;  %v375_v9 = vld [vmem:[%s477_s1 + $0x18] sm:$0xff]   ;;  %v377_v13 = vld [vmem:[%s477_s1 + $0x10] sm:$0xff]  }
   0x5   :  { %v384_v11 = vld [vmem:[%s478_s0 + $0x4] ss:$8 sps:$4 sm:$0xff]   ;;  %v387_v12 = vld [vmem:[%s478_s0 + $0x14] ss:$8 sps:$4 sm:$0xff]   ;;  %v382_v18 = vld [vmem:[%s478_s0] ss:$8 sps:$4 sm:$0xff]  }
   0x6   :  { %v378_v14 = vld [vmem:[%s477_s1 + $0x48] sm:$0xff]   ;;  %211 = vmatprep.mubr.bf16.mxu0 %v384_v11  ;;  %219 = vmatprep.mubr.bf16.mxu1 %v387_v12  ;;  %v380_v16 = vld [vmem:[%s477_s1 + $0x40] sm:$0xff]   ;;  %v385_v19 = vld [vmem:[%s478_s0 + $0x10] ss:$8 sps:$4 sm:$0xff]  }
   0x7   :  { %325 = vmatpush3.bf16.msra.mxu0 %v369_v3  ;;  %359 = vmatpush3.bf16.msra.mxu1 %v369_v3  ;;  %v379_v15 = vld [vmem:[%s477_s1 + $0x8] sm:$0xff]   ;;  %v381_v17 = vld [vmem:[%s477_s1] sm:$0xff]  }
   0x8   :  { %326 = vmatprep.subr.bf16.mxu0 %v370_v4  ;;  %352 = vmatprep.subr.bf16.mxu1 %v370_v4  ;;  %v302_v26 = vld [vmem:[%s479_s2] ss:$0 sm:$0xff] }
   0xb   :  { %327 = vmatpush3.bf16.msra.mxu0 %v371_v5  ;;  %360 = vmatpush3.bf16.msra.mxu1 %v371_v5 }
   0xc   :  { %328 = vmatprep.subr.bf16.mxu0 %v372_v6  ;;  %353 = vmatprep.subr.bf16.mxu1 %v372_v6 }
   0xf   :  { %329 = vmatpush3.bf16.msra.mxu0 %v373_v7  ;;  %361 = vmatpush3.bf16.msra.mxu1 %v373_v7 }
  0x10   :  { %330 = vmatprep.subr.bf16.mxu0 %v374_v8  ;;  %354 = vmatprep.subr.bf16.mxu1 %v374_v8 }
  0x13   :  { %331 = vmatpush3.bf16.msra.mxu0 %v375_v9  ;;  %362 = vmatpush3.bf16.msra.mxu1 %v375_v9 }
  0x14   :  { %332 = vmatprep.subr.bf16.mxu0 %v376_v10  ;;  %355 = vmatprep.subr.bf16.mxu1 %v376_v10 }
  0x17   :  { %333 = vmatpush3.bf16.msra.mxu0 %v377_v13  ;;  %363 = vmatpush3.bf16.msra.mxu1 %v377_v13 }
  0x18   :  { %334 = vmatprep.subr.bf16.mxu0 %v378_v14  ;;  %356 = vmatprep.subr.bf16.mxu1 %v378_v14 }
  0x1b   :  { %335 = vmatpush3.bf16.msra.mxu0 %v379_v15  ;;  %364 = vmatpush3.bf16.msra.mxu1 %v379_v15 }
  0x1c   :  { %336 = vmatprep.subr.bf16.mxu0 %v380_v16  ;;  %357 = vmatprep.subr.bf16.mxu1 %v380_v16 }
  0x1f   :  { %337 = vmatpush3.bf16.msra.mxu0 %v381_v17  ;;  %365 = vmatpush3.bf16.msra.mxu1 %v381_v17 }
  0x22   :  { %212 = vmatmul.mubr.bf16.vlgmr.msra.gmra.mxu0 %v382_v18  ;;  %220 = vmatmul.mubr.bf16.vlgmr.msra.gmra.mxu1 %v385_v19 }
  0xe2   :  { %v338_v20 = vpop.f32.mrf.mxu0  ;;  %v344_v21 = vpop.f32.mrf.mxu1 }
  0xe4   :  { %v339_v22 = vpop.f32.mrf.mxu0  ;;  %v345_v23 = vpop.f32.mrf.mxu1 }
  0xe5   :  { %v340_v24 = vadd.f32 %v339_v22, %v338_v20  ;;  %v346_v25 = vadd.f32 %v345_v23, %v344_v21 }
  0xe6   :  { %v341_v27 = vpop.f32.mrf.mxu0  ;;  %v347_v28 = vpop.f32.mrf.mxu1 }
  0xe7   :  { %v250_v31 = vadd.f32 %v340_v24, %v302_v26  ;;  %v252_v32 = vadd.f32 %v346_v25, %v302_v26 }
  0xe8   :  { %v342_v29 = vpop.f32.mrf.mxu0  ;;  %v348_v30 = vpop.f32.mrf.mxu1 }
  0xe9   :  { %v343_v33 = vadd.f32 %v342_v29, %v341_v27  ;;  %v349_v34 = vadd.f32 %v348_v30, %v347_v28  ;;  %v254_v37 = vmax.f32 %v250_v31, 0.0  ;;  %v256_v38 = vmax.f32 %v252_v32, 0.0 }
  0xeb   :  { %v251_v35 = vadd.f32 %v343_v33, %v302_v26  ;;  %v253_v36 = vadd.f32 %v349_v34, %v302_v26 }
  0xed   :  { %v255_v39 = vmax.f32 %v251_v35, 0.0  ;;  %v257_v40 = vmax.f32 %v253_v36, 0.0 }
  0xef   :  { %v314_v41 = vpack.c.bf16 %v255_v39, %v254_v37  ;;  %v319_v42 = vpack.c.bf16 %v257_v40, %v256_v38 }
  0xf1   :  { %315 = vst [vmem:[%s480_s3] sm:$0xff] %v314_v41   ;;  %321 = vst [vmem:[%s480_s3 + $0x8] sm:$0xff] %v319_v42  }

// kernel: _lambda_.26
= control target key start
LH: loop header
LB: loop body
LE: loop exit
PB: predicated region body
PF: predicated region fallthrough
CT: control target
= control target key end

     0   :  { %s508_s1 = inlined_call_operand.vmem [shape: bf16[256,128], index: 1, kind: input, shape index: {}]   ;;  %s509_s0 = inlined_call_operand.vmem [shape: bf16[32,256], index: 0, kind: input, shape index: {}]   ;;  %s510_s3 = inlined_call_operand.vmem [shape: bf16[32,128], index: 3, kind: input, shape index: {}]   ;;  %s511_s2 = inlined_call_operand.vmem [shape: f32[1,128], index: 2, kind: input, shape index: {}]   ;;  %s512_s4 = inlined_call_operand.vmem [shape: bf16[32,128], index: 4, kind: output, shape index: {}]  }
   0x1   :  { %v386_v0 = vld [vmem:[%s508_s1 + $0x78] sm:$0xff]   ;;  %v388_v2 = vld [vmem:[%s508_s1 + $0x70] sm:$0xff]   ;;  %v390_v4 = vld [vmem:[%s508_s1 + $0x68] sm:$0xff]  }
   0x2   :  { %v387_v1 = vld [vmem:[%s508_s1 + $0x38] sm:$0xff]   ;;  %342 = vmatprep.subr.bf16.mxu0 %v386_v0  ;;  %370 = vmatprep.subr.bf16.mxu1 %v386_v0  ;;  %v389_v3 = vld [vmem:[%s508_s1 + $0x30] sm:$0xff]   ;;  %v391_v5 = vld [vmem:[%s508_s1 + $0x28] sm:$0xff]  }
   0x3   :  { %343 = vmatpush3.bf16.msra.mxu0 %v387_v1  ;;  %378 = vmatpush3.bf16.msra.mxu1 %v387_v1  ;;  %v392_v6 = vld [vmem:[%s508_s1 + $0x60] sm:$0xff]   ;;  %v394_v8 = vld [vmem:[%s508_s1 + $0x58] sm:$0xff]   ;;  %v396_v10 = vld [vmem:[%s508_s1 + $0x50] sm:$0xff]  }
   0x4   :  { %344 = vmatprep.subr.bf16.mxu0 %v388_v2  ;;  %371 = vmatprep.subr.bf16.mxu1 %v388_v2  ;;  %v393_v7 = vld [vmem:[%s508_s1 + $0x20] sm:$0xff]   ;;  %v395_v9 = vld [vmem:[%s508_s1 + $0x18] sm:$0xff]   ;;  %v397_v13 = vld [vmem:[%s508_s1 + $0x10] sm:$0xff]  }
   0x5   :  { %v404_v11 = vld [vmem:[%s509_s0 + $0x4] ss:$8 sps:$4 sm:$0xff]   ;;  %v407_v12 = vld [vmem:[%s509_s0 + $0x14] ss:$8 sps:$4 sm:$0xff]   ;;  %v402_v18 = vld [vmem:[%s509_s0] ss:$8 sps:$4 sm:$0xff]  }
   0x6   :  { %v398_v14 = vld [vmem:[%s508_s1 + $0x48] sm:$0xff]   ;;  %214 = vmatprep.mubr.bf16.mxu0 %v404_v11  ;;  %222 = vmatprep.mubr.bf16.mxu1 %v407_v12  ;;  %v400_v16 = vld [vmem:[%s508_s1 + $0x40] sm:$0xff]   ;;  %v405_v19 = vld [vmem:[%s509_s0 + $0x10] ss:$8 sps:$4 sm:$0xff]  }
   0x7   :  { %345 = vmatpush3.bf16.msra.mxu0 %v389_v3  ;;  %379 = vmatpush3.bf16.msra.mxu1 %v389_v3  ;;  %v399_v15 = vld [vmem:[%s508_s1 + $0x8] sm:$0xff]   ;;  %v401_v17 = vld [vmem:[%s508_s1] sm:$0xff]  }
   0x8   :  { %346 = vmatprep.subr.bf16.mxu0 %v390_v4  ;;  %372 = vmatprep.subr.bf16.mxu1 %v390_v4  ;;  %v323_v25 = vld [vmem:[%s510_s3] sm:$0xff]   ;;  %v340_v27 = vld [vmem:[%s510_s3 + $0x8] sm:$0xff]  }
   0x9   :  { %v313_v28 = vld [vmem:[%s511_s2] ss:$0 sm:$0xff]  ;;  %v324_v31 = vunpack.c.l.bf16 %v323_v25  ;;  %v328_v32 = vunpack.c.l.bf16 %v340_v27  ;;  %v325_v34 = vunpack.c.h.bf16 %v323_v25  ;;  %v329_v36 = vunpack.c.h.bf16 %v340_v27 }
   0xb   :  { %347 = vmatpush3.bf16.msra.mxu0 %v391_v5  ;;  %380 = vmatpush3.bf16.msra.mxu1 %v391_v5 }
   0xc   :  { %348 = vmatprep.subr.bf16.mxu0 %v392_v6  ;;  %373 = vmatprep.subr.bf16.mxu1 %v392_v6 }
   0xf   :  { %349 = vmatpush3.bf16.msra.mxu0 %v393_v7  ;;  %381 = vmatpush3.bf16.msra.mxu1 %v393_v7 }
  0x10   :  { %350 = vmatprep.subr.bf16.mxu0 %v394_v8  ;;  %374 = vmatprep.subr.bf16.mxu1 %v394_v8 }
  0x13   :  { %351 = vmatpush3.bf16.msra.mxu0 %v395_v9  ;;  %382 = vmatpush3.bf16.msra.mxu1 %v395_v9 }
  0x14   :  { %352 = vmatprep.subr.bf16.mxu0 %v396_v10  ;;  %375 = vmatprep.subr.bf16.mxu1 %v396_v10 }
  0x17   :  { %353 = vmatpush3.bf16.msra.mxu0 %v397_v13  ;;  %383 = vmatpush3.bf16.msra.mxu1 %v397_v13 }
  0x18   :  { %354 = vmatprep.subr.bf16.mxu0 %v398_v14  ;;  %376 = vmatprep.subr.bf16.mxu1 %v398_v14 }
  0x1b   :  { %355 = vmatpush3.bf16.msra.mxu0 %v399_v15  ;;  %384 = vmatpush3.bf16.msra.mxu1 %v399_v15 }
  0x1c   :  { %356 = vmatprep.subr.bf16.mxu0 %v400_v16  ;;  %377 = vmatprep.subr.bf16.mxu1 %v400_v16 }
  0x1f   :  { %357 = vmatpush3.bf16.msra.mxu0 %v401_v17  ;;  %385 = vmatpush3.bf16.msra.mxu1 %v401_v17 }
  0x22   :  { %215 = vmatmul.mubr.bf16.vlgmr.msra.gmra.mxu0 %v402_v18  ;;  %223 = vmatmul.mubr.bf16.vlgmr.msra.gmra.mxu1 %v405_v19 }
  0xe2   :  { %v358_v20 = vpop.f32.mrf.mxu0  ;;  %v364_v21 = vpop.f32.mrf.mxu1 }
  0xe4   :  { %v359_v22 = vpop.f32.mrf.mxu0  ;;  %v365_v23 = vpop.f32.mrf.mxu1 }
  0xe5   :  { %v360_v24 = vadd.f32 %v359_v22, %v358_v20  ;;  %v366_v26 = vadd.f32 %v365_v23, %v364_v21 }
  0xe6   :  { %v361_v29 = vpop.f32.mrf.mxu0  ;;  %v367_v30 = vpop.f32.mrf.mxu1 }
  0xe7   :  { %v253_v37 = vadd.f32 %v360_v24, %v313_v28  ;;  %v255_v38 = vadd.f32 %v366_v26, %v313_v28 }
  0xe8   :  { %v362_v33 = vpop.f32.mrf.mxu0  ;;  %v368_v35 = vpop.f32.mrf.mxu1 }
  0xe9   :  { %v363_v39 = vadd.f32 %v362_v33, %v361_v29  ;;  %v369_v40 = vadd.f32 %v368_v35, %v367_v30  ;;  %v265_v43 = vadd.f32 %v324_v31, %v253_v37  ;;  %v267_v44 = vadd.f32 %v328_v32, %v255_v38 }
  0xeb   :  { %v254_v41 = vadd.f32 %v363_v39, %v313_v28  ;;  %v256_v42 = vadd.f32 %v369_v40, %v313_v28 }
  0xed   :  { %v266_v45 = vadd.f32 %v325_v34, %v254_v41  ;;  %v268_v46 = vadd.f32 %v329_v36, %v256_v42 }
  0xef   :  { %v333_v47 = vpack.c.bf16 %v266_v45, %v265_v43  ;;  %v338_v48 = vpack.c.bf16 %v268_v46, %v267_v44 }
  0xf1   :  { %334 = vst [vmem:[%s512_s4] sm:$0xff] %v333_v47   ;;  %341 = vst [vmem:[%s512_s4 + $0x8] sm:$0xff] %v338_v48  }

// kernel: _lambda_.30
= control target key start
LH: loop header
LB: loop body
LE: loop exit
PB: predicated region body
PF: predicated region fallthrough
CT: control target
= control target key end

     0   :  { %v476_v0 = vmov 0.0   ;;  %vm477_vm0 = vmmov 0   ;;  %vm70_vm1 = vcmask 1043456   ;;  %s744_s1 = inlined_call_operand.vmem [shape: bf16[128,128], index: 1, kind: input, shape index: {}]   ;;  %s745_s0 = inlined_call_operand.vmem [shape: bf16[27,16,128], index: 0, kind: input, shape index: {}]   ;;  %s746_s2 = inlined_call_operand.vmem [shape: f32[1,128], index: 2, kind: input, shape index: {}]   ;;  %s747_s3 = inlined_call_operand.vmem [shape: bf16[16,128], index: 3, kind: output, shape index: {}]  }
   0x1   :  { %446 = vmatprep.subr.bf16.mxu0 %v476_v0  ;;  %v468_v1 = vld [vmem:[%s744_s1 + $0x38] sm:$0xff]   ;;  %462 = vmatprep.mubr.msk.bf16.mxu0 %vm477_vm0, %v476_v0  ;;  %v469_v2 = vld [vmem:[%s744_s1 + $0x30] sm:$0xff]   ;;  %v470_v3 = vld [vmem:[%s744_s1 + $0x28] sm:$0xff]  }
   0x2   :  { %447 = vmatpush3.bf16.msra.mxu0 %v468_v1  ;;  %v471_v4 = vld [vmem:[%s744_s1 + $0x20] sm:$0xff]   ;;  %v472_v5 = vld [vmem:[%s744_s1 + $0x18] sm:$0xff]   ;;  %v473_v6 = vld [vmem:[%s744_s1 + $0x10] sm:$0xff]  }
   0x3   :  { %448 = vmatprep.subr.bf16.mxu0 %v476_v0  ;;  %v474_v7 = vld [vmem:[%s744_s1 + $0x8] sm:$0xff]   ;;  %v16_v8 = vld [vmem:[%s745_s0] sm:$0xf]  ;;  %v20_v10 = vld [vmem:[%s745_s0 + $0x10] sm:$0xf] }
   0x4   :  { %v18_v9 = vld [vmem:[%s745_s0 + $0x8] sm:$0xf]  ;;  %v475_v11 = vld [vmem:[%s744_s1] sm:$0xff]   ;;  %v22_v12 = vld [vmem:[%s745_s0 + $0x18] sm:$0xf] }
   0x5   :  { %v24_v13 = vld [vmem:[%s745_s0 + $0x20] sm:$0xf]  ;;  %v26_v14 = vld [vmem:[%s745_s0 + $0x28] sm:$0xf]  ;;  %v28_v15 = vld [vmem:[%s745_s0 + $0x30] sm:$0xf] }
   0x6   :  { %449 = vmatpush3.bf16.msra.mxu0 %v469_v2  ;;  %v30_v16 = vld [vmem:[%s745_s0 + $0x38] sm:$0xf]  ;;  %v32_v17 = vld [vmem:[%s745_s0 + $0x40] sm:$0xf]  ;;  %v73_v18 = vsel %vm70_vm1, %v16_v8, 4286644096 }
   0x7   :  { %450 = vmatprep.subr.bf16.mxu0 %v476_v0  ;;  %v76_v19 = vsel %vm70_vm1, %v18_v9, 4286644096  ;;  %v79_v20 = vsel %vm70_vm1, %v20_v10, 4286644096  ;;  %v83_v22 = vsel %vm70_vm1, %v22_v12, 4286644096 }
   0x8   :  { %v81_v21 = vmax.bf16 %v79_v20, %v73_v18  ;;  %v87_v23 = vsel %vm70_vm1, %v24_v13, 4286644096  ;;  %v91_v24 = vsel %vm70_vm1, %v26_v14, 4286644096  ;;  %v34_v25 = vld [vmem:[%s745_s0 + $0x48] sm:$0xf]  ;;  %v85_v26 = vmax.bf16 %v83_v22, %v76_v19 }
   0x9   :  { %v95_v27 = vsel %vm70_vm1, %v28_v15, 4286644096  ;;  %v36_v28 = vld [vmem:[%s745_s0 + $0x50] sm:$0xf]  ;;  %v38_v29 = vld [vmem:[%s745_s0 + $0x58] sm:$0xf] }
   0xa   :  { %451 = vmatpush3.bf16.msra.mxu0 %v470_v3  ;;  %v89_v30 = vmax.bf16 %v87_v23, %v81_v21  ;;  %v99_v31 = vsel %vm70_vm1, %v30_v16, 4286644096  ;;  %v17_v32 = vld [vmem:[%s745_s0 + $0x4] sm:$0xf]  ;;  %v19_v33 = vld [vmem:[%s745_s0 + $0xc] sm:$0xf]  ;;  %v93_v37 = vmax.bf16 %v91_v24, %v85_v26 }
   0xb   :  { %452 = vmatprep.subr.bf16.mxu0 %v476_v0  ;;  %v21_v34 = vld [vmem:[%s745_s0 + $0x14] sm:$0xf]  ;;  %v40_v35 = vld [vmem:[%s745_s0 + $0x60] sm:$0xf]  ;;  %v42_v36 = vld [vmem:[%s745_s0 + $0x68] sm:$0xf] }
   0xc   :  { %v103_v38 = vsel %vm70_vm1, %v32_v17, 4286644096  ;;  %v23_v39 = vld [vmem:[%s745_s0 + $0x1c] sm:$0xf]  ;;  %v25_v40 = vld [vmem:[%s745_s0 + $0x24] sm:$0xf]  ;;  %v97_v43 = vmax.bf16 %v95_v27, %v89_v30  ;;  %v101_v47 = vmax.bf16 %v99_v31, %v93_v37 }
   0xd   :  { %v44_v41 = vld [vmem:[%s745_s0 + $0x70] sm:$0xf]  ;;  %v46_v42 = vld [vmem:[%s745_s0 + $0x78] sm:$0xf]  ;;  %v107_v44 = vsel %vm70_vm1, %v34_v25, 4286644096 }
   0xe   :  { %453 = vmatpush3.bf16.msra.mxu0 %v471_v4  ;;  %v27_v45 = vld [vmem:[%s745_s0 + $0x2c] sm:$0xf]  ;;  %v29_v46 = vld [vmem:[%s745_s0 + $0x34] sm:$0xf]  ;;  %v111_v48 = vsel %vm70_vm1, %v36_v28, 4286644096  ;;  %v105_v51 = vmax.bf16 %v103_v38, %v97_v43  ;;  %v109_v55 = vmax.bf16 %v107_v44, %v101_v47 }
   0xf   :  { %454 = vmatprep.subr.bf16.mxu0 %v476_v0  ;;  %v31_v49 = vld [vmem:[%s745_s0 + $0x3c] sm:$0xf]  ;;  %v48_v50 = vld [vmem:[%s745_s0 + $0x80] sm:$0xf]  ;;  %v115_v52 = vsel %vm70_vm1, %v38_v29, 4286644096 }
  0x10   :  { %v119_v53 = vsel %vm70_vm1, %v40_v35, 4286644096  ;;  %v33_v54 = vld [vmem:[%s745_s0 + $0x44] sm:$0xf]  ;;  %v123_v56 = vsel %vm70_vm1, %v42_v36, 4286644096  ;;  %v113_v60 = vmax.bf16 %v111_v48, %v105_v51  ;;  %v117_v2 = vmax.bf16 %v115_v52, %v109_v55 }
  0x11   :  { %v127_v57 = vsel %vm70_vm1, %v44_v41, 4286644096  ;;  %v131_v58 = vsel %vm70_vm1, %v46_v42, 4286644096  ;;  %v35_v59 = vld [vmem:[%s745_s0 + $0x4c] sm:$0xf] }
  0x12   :  { %455 = vmatpush3.bf16.msra.mxu0 %v472_v5  ;;  %v180_v61 = vsel %vm70_vm1, %v17_v32, 4286644096  ;;  %v183_v62 = vsel %vm70_vm1, %v19_v33, 4286644096  ;;  %v186_v63 = vsel %vm70_vm1, %v21_v34, 4286644096  ;;  %v121_v8 = vmax.bf16 %v119_v53, %v113_v60 }
  0x13   :  { %456 = vmatprep.subr.bf16.mxu0 %v476_v0  ;;  %v50_v1 = vld [vmem:[%s745_s0 + $0x88] sm:$0xf]  ;;  %v188_v3 = vmax.bf16 %v186_v63, %v180_v61  ;;  %v190_v4 = vsel %vm70_vm1, %v23_v39, 4286644096  ;;  %v194_v5 = vsel %vm70_vm1, %v25_v40, 4286644096  ;;  %v125_v14 = vmax.bf16 %v123_v56, %v117_v2 }
  0x14   :  { %v192_v9 = vmax.bf16 %v190_v4, %v183_v62  ;;  %v198_v10 = vsel %vm70_vm1, %v27_v45, 4286644096  ;;  %v41_v12 = vld [vmem:[%s745_s0 + $0x64] sm:$0xf]  ;;  %v54_v13 = vld [vmem:[%s745_s0 + $0x98] sm:$0xf]  ;;  %v129_v20 = vmax.bf16 %v127_v57, %v121_v8 }
  0x15   :  { %v135_v15 = vsel %vm70_vm1, %v48_v50, 4286644096  ;;  %v196_v16 = vmax.bf16 %v194_v5, %v188_v3  ;;  %v206_v17 = vsel %vm70_vm1, %v31_v49, 4286644096  ;;  %v43_v18 = vld [vmem:[%s745_s0 + $0x6c] sm:$0xf]  ;;  %v133_v25 = vmax.bf16 %v131_v58, %v125_v14 }
  0x16   :  { %457 = vmatpush3.bf16.msra.mxu0 %v473_v6  ;;  %v39_v6 = vld [vmem:[%s745_s0 + $0x5c] sm:$0xf]  ;;  %v56_v19 = vld [vmem:[%s745_s0 + $0xa0] sm:$0xf]  ;;  %v139_v21 = vsel %vm70_vm1, %v50_v1, 4286644096  ;;  %v200_v22 = vmax.bf16 %v198_v10, %v192_v9  ;;  %v137_v30 = vmax.bf16 %v135_v15, %v129_v20 }
  0x17   :  { %458 = vmatprep.subr.bf16.mxu0 %v476_v0  ;;  %v210_v23 = vsel %vm70_vm1, %v33_v54, 4286644096  ;;  %v45_v24 = vld [vmem:[%s745_s0 + $0x74] sm:$0xf]  ;;  %v214_v28 = vsel %vm70_vm1, %v35_v59, 4286644096  ;;  %v141_v35 = vmax.bf16 %v139_v21, %v133_v25 }
  0x18   :  { %v58_v29 = vld [vmem:[%s745_s0 + $0xa8] sm:$0xf]  ;;  %v147_v31 = vsel %vm70_vm1, %v54_v13, 4286644096  ;;  %v208_v32 = vmax.bf16 %v206_v17, %v200_v22  ;;  %v60_v34 = vld [vmem:[%s745_s0 + $0xb0] sm:$0xf] }
  0x19   :  { %v151_v36 = vsel %vm70_vm1, %v56_v19, 4286644096  ;;  %v222_v38 = vsel %vm70_vm1, %v39_v6, 4286644096  ;;  %v47_v39 = vld [vmem:[%s745_s0 + $0x7c] sm:$0xf]  ;;  %v149_v45 = vmax.bf16 %v147_v31, %v141_v35 }
  0x1a   :  { %459 = vmatpush3.bf16.msra.mxu0 %v474_v7  ;;  %v52_v7 = vld [vmem:[%s745_s0 + $0x90] sm:$0xf]  ;;  %v49_v40 = vld [vmem:[%s745_s0 + $0x84] sm:$0xf]  ;;  %v216_v42 = vmax.bf16 %v214_v28, %v208_v32  ;;  %v226_v43 = vsel %vm70_vm1, %v41_v12, 4286644096 }
  0x1b   :  { %460 = vmatprep.subr.bf16.mxu0 %v476_v0  ;;  %v37_v0 = vld [vmem:[%s745_s0 + $0x54] sm:$0xf]  ;;  %v143_v26 = vsel %vm70_vm1, %v52_v7, 4286644096  ;;  %v51_v44 = vld [vmem:[%s745_s0 + $0x8c] sm:$0xf] }
  0x1c   :  { %v218_v33 = vsel %vm70_vm1, %v37_v0, 4286644096  ;;  %v145_v41 = vmax.bf16 %v143_v26, %v137_v30  ;;  %v230_v48 = vsel %vm70_vm1, %v43_v18, 4286644096  ;;  %v53_v49 = vld [vmem:[%s745_s0 + $0x94] sm:$0xf]  ;;  %v224_v52 = vmax.bf16 %v222_v38, %v216_v42 }
  0x1d   :  { %v159_v51 = vsel %vm70_vm1, %v60_v34, 4286644096  ;;  %v234_v53 = vsel %vm70_vm1, %v45_v24, 4286644096  ;;  %v62_v54 = vld [vmem:[%s745_s0 + $0xb8] sm:$0xf] }
  0x1e   :  { %461 = vmatpush3.bf16.msra.mxu0 %v475_v11  ;;  %v202_v11 = vsel %vm70_vm1, %v29_v46, 4286644096  ;;  %v155_v46 = vsel %vm70_vm1, %v58_v29, 4286644096  ;;  %v153_v50 = vmax.bf16 %v151_v36, %v145_v41  ;;  %v64_v55 = vld [vmem:[%s745_s0 + $0xc0] sm:$0xf]  ;;  %v232_v60 = vmax.bf16 %v230_v48, %v224_v52 }
  0x1f   :  { %v204_v27 = vmax.bf16 %v202_v11, %v196_v16  ;;  %v238_v57 = vsel %vm70_vm1, %v47_v39, 4286644096  ;;  %v55_v58 = vld [vmem:[%s745_s0 + $0x9c] sm:$0xf]  ;;  %v57_v59 = vld [vmem:[%s745_s0 + $0xa4] sm:$0xf]  ;;  %v157_v0 = vmax.bf16 %v155_v46, %v149_v45 }
  0x20   :  { %v242_v61 = vsel %vm70_vm1, %v49_v40, 4286644096  ;;  %v59_v62 = vld [vmem:[%s745_s0 + $0xac] sm:$0xf]  ;;  %v61_v63 = vld [vmem:[%s745_s0 + $0xb4] sm:$0xf]  ;;  %v161_v1 = vmax.bf16 %v159_v51, %v153_v50  ;;  %v240_v6 = vmax.bf16 %v238_v57, %v232_v60 }
  0x21   :  { %v212_v37 = vmax.bf16 %v210_v23, %v204_v27  ;;  %v246_v3 = vsel %vm70_vm1, %v51_v44, 4286644096  ;;  %v163_v4 = vsel %vm70_vm1, %v62_v54, 4286644096  ;;  %v167_v5 = vsel %vm70_vm1, %v64_v55, 4286644096 }
  0x22   :  { %v250_v7 = vsel %vm70_vm1, %v53_v49, 4286644096  ;;  %v66_v8 = vld [vmem:[%s745_s0 + $0xc8] sm:$0xf]  ;;  %v68_v9 = vld [vmem:[%s745_s0 + $0xd0] sm:$0xf]  ;;  %v248_v13 = vmax.bf16 %v246_v3, %v240_v6  ;;  %v165_v17 = vmax.bf16 %v163_v4, %v157_v0  ;;  %v169_v18 = vmax.bf16 %v167_v5, %v161_v1 }
  0x23   :  { %v220_v47 = vmax.bf16 %v218_v33, %v212_v37  ;;  %v254_v11 = vsel %vm70_vm1, %v55_v58, 4286644096  ;;  %v63_v12 = vld [vmem:[%s745_s0 + $0xbc] sm:$0xf]  ;;  %v258_v14 = vsel %vm70_vm1, %v57_v59, 4286644096 }
  0x24   :  { %v65_v15 = vld [vmem:[%s745_s0 + $0xc4] sm:$0xf]  ;;  %v67_v16 = vld [vmem:[%s745_s0 + $0xcc] sm:$0xf]  ;;  %v262_v20 = vsel %vm70_vm1, %v59_v62, 4286644096  ;;  %v256_v23 = vmax.bf16 %v254_v11, %v248_v13 }
  0x25   :  { %v228_v56 = vmax.bf16 %v226_v43, %v220_v47  ;;  %v171_v21 = vsel %vm70_vm1, %v66_v8, 4286644096  ;;  %v175_v22 = vsel %vm70_vm1, %v68_v9, 4286644096  ;;  %v266_v24 = vsel %vm70_vm1, %v61_v63, 4286644096 }
  0x26   :  { %v69_v25 = vld [vmem:[%s745_s0 + $0xd4] sm:$0xf]  ;;  %v270_v27 = vsel %vm70_vm1, %v63_v12, 4286644096  ;;  %v264_v28 = vmax.bf16 %v262_v20, %v256_v23  ;;  %v274_v29 = vsel %vm70_vm1, %v65_v15, 4286644096  ;;  %v173_v30 = vmax.bf16 %v171_v21, %v165_v17 }
  0x27   :  { %v236_v2 = vmax.bf16 %v234_v53, %v228_v56  ;;  %v177_v31 = vmax.bf16 %v175_v22, %v169_v18  ;;  %v278_v33 = vsel %vm70_vm1, %v67_v16, 4286644096  ;;  %v282_v35 = vsel %vm70_vm1, %v69_v25, 4286644096  ;;  %v418_v43 = vld [vmem:[%s746_s2] ss:$0 sm:$0xff] }
  0x28   :  { %v272_v34 = vmax.bf16 %v270_v27, %v264_v28 }
  0x29   :  { %v244_v10 = vmax.bf16 %v242_v61, %v236_v2  ;;  %v178_v38 = vmax.bf16 %v177_v31, %v173_v30 }
  0x2a   :  { %v280_v37 = vmax.bf16 %v278_v33, %v272_v34 }
  0x2b   :  { %v252_v19 = vmax.bf16 %v250_v7, %v244_v10 }
  0x2d   :  { %v260_v26 = vmax.bf16 %v258_v14, %v252_v19 }
  0x2f   :  { %v268_v32 = vmax.bf16 %v266_v24, %v260_v26 }
  0x31   :  { %v276_v36 = vmax.bf16 %v274_v29, %v268_v32 }
  0x33   :  { %v284_v39 = vmax.bf16 %v282_v35, %v276_v36 }
  0x35   :  { %v285_v40 = vmax.bf16 %v284_v39, %v280_v37 }
  0x37   :  { %v419_v41 = vcombine.low %v178_v38, %v285_v40 }
  0x39   :  { %463 = vmatmul.mubr.bf16.vlgmr.msra.gmra.mxu0 %v419_v41 }
  0xf9   :  { %v397_v42 = vpop.f32.mrf.mxu0 }
  0xfa   :  { %v398_v46 = vadd.f32 %v418_v43, %v397_v42 }
  0xfb   :  { %v464_v44 = vpop.f32.mrf.mxu0 }
  0xfd   :  { %v400_v45 = vpop.f32.mrf.mxu0 }
  0xfe   :  { %v401_v47 = vadd.f32 %v418_v43, %v400_v45 }
  0xff   :  { %v465_v48 = vpop.f32.mrf.mxu0 }
 0x100   :  { %v435_v49 = vpack.c.bf16 %v401_v47, %v398_v46 }
 0x102   :  { %436 = vst [vmem:[%s747_s3] sm:$0xff] %v435_v49  }

// kernel: _lambda_.29
= control target key start
LH: loop header
LB: loop body
LE: loop exit
PB: predicated region body
PF: predicated region fallthrough
CT: control target
= control target key end

     0   :  { %s387_s1 = inlined_call_operand.vmem [shape: bf16[256,128], index: 1, kind: input, shape index: {}]   ;;  %s388_s0 = inlined_call_operand.vmem [shape: bf16[16,256], index: 0, kind: input, shape index: {}]   ;;  %s389_s2 = inlined_call_operand.vmem [shape: f32[1,128], index: 2, kind: input, shape index: {}]   ;;  %s390_s3 = inlined_call_operand.vmem [shape: bf16[16,128], index: 3, kind: output, shape index: {}]  }
   0x1   :  { %v288_v0 = vld [vmem:[%s387_s1 + $0x78] sm:$0xff]   ;;  %v290_v2 = vld [vmem:[%s387_s1 + $0x70] sm:$0xff]   ;;  %v292_v4 = vld [vmem:[%s387_s1 + $0x68] sm:$0xff]  }
   0x2   :  { %v289_v1 = vld [vmem:[%s387_s1 + $0x38] sm:$0xff]   ;;  %266 = vmatprep.subr.bf16.mxu0 %v288_v0  ;;  %v291_v3 = vld [vmem:[%s387_s1 + $0x30] sm:$0xff]   ;;  %v293_v5 = vld [vmem:[%s387_s1 + $0x28] sm:$0xff]  }
   0x3   :  { %267 = vmatpush3.bf16.msra.mxu0 %v289_v1  ;;  %v294_v6 = vld [vmem:[%s387_s1 + $0x60] sm:$0xff]   ;;  %v296_v8 = vld [vmem:[%s387_s1 + $0x58] sm:$0xff]   ;;  %v298_v10 = vld [vmem:[%s387_s1 + $0x50] sm:$0xff]  }
   0x4   :  { %268 = vmatprep.subr.bf16.mxu0 %v290_v2  ;;  %v295_v7 = vld [vmem:[%s387_s1 + $0x20] sm:$0xff]   ;;  %v297_v9 = vld [vmem:[%s387_s1 + $0x18] sm:$0xff]   ;;  %v299_v12 = vld [vmem:[%s387_s1 + $0x10] sm:$0xff]  }
   0x5   :  { %v306_v11 = vld [vmem:[%s388_s0 + $0x4] ss:$8 sps:$4 sm:$0xff]   ;;  %v304_v17 = vld [vmem:[%s388_s0] ss:$8 sps:$4 sm:$0xff]  }
   0x6   :  { %195 = vmatprep.mubr.bf16.mxu0 %v306_v11  ;;  %v300_v13 = vld [vmem:[%s387_s1 + $0x48] sm:$0xff]   ;;  %v302_v15 = vld [vmem:[%s387_s1 + $0x40] sm:$0xff]  }
   0x7   :  { %269 = vmatpush3.bf16.msra.mxu0 %v291_v3  ;;  %v301_v14 = vld [vmem:[%s387_s1 + $0x8] sm:$0xff]   ;;  %v303_v16 = vld [vmem:[%s387_s1] sm:$0xff]  }
   0x8   :  { %270 = vmatprep.subr.bf16.mxu0 %v292_v4  ;;  %v256_v21 = vld [vmem:[%s389_s2] ss:$0 sm:$0xff] }
   0xb   :  { %271 = vmatpush3.bf16.msra.mxu0 %v293_v5 }
   0xc   :  { %272 = vmatprep.subr.bf16.mxu0 %v294_v6 }
   0xf   :  { %273 = vmatpush3.bf16.msra.mxu0 %v295_v7 }
  0x10   :  { %274 = vmatprep.subr.bf16.mxu0 %v296_v8 }
  0x13   :  { %275 = vmatpush3.bf16.msra.mxu0 %v297_v9 }
  0x14   :  { %276 = vmatprep.subr.bf16.mxu0 %v298_v10 }
  0x17   :  { %277 = vmatpush3.bf16.msra.mxu0 %v299_v12 }
  0x18   :  { %278 = vmatprep.subr.bf16.mxu0 %v300_v13 }
  0x1b   :  { %279 = vmatpush3.bf16.msra.mxu0 %v301_v14 }
  0x1c   :  { %280 = vmatprep.subr.bf16.mxu0 %v302_v15 }
  0x1f   :  { %281 = vmatpush3.bf16.msra.mxu0 %v303_v16 }
  0x22   :  { %196 = vmatmul.mubr.bf16.vlgmr.msra.gmra.mxu0 %v304_v17 }
  0xe2   :  { %v282_v18 = vpop.f32.mrf.mxu0 }
  0xe4   :  { %v283_v19 = vpop.f32.mrf.mxu0 }
  0xe5   :  { %v284_v20 = vadd.f32 %v283_v19, %v282_v18 }
  0xe6   :  { %v285_v22 = vpop.f32.mrf.mxu0 }
  0xe7   :  { %v220_v24 = vadd.f32 %v284_v20, %v256_v21 }
  0xe8   :  { %v286_v23 = vpop.f32.mrf.mxu0 }
  0xe9   :  { %v287_v25 = vadd.f32 %v286_v23, %v285_v22  ;;  %v222_v27 = vmax.f32 %v220_v24, 0.0 }
  0xeb   :  { %v221_v26 = vadd.f32 %v287_v25, %v256_v21 }
  0xed   :  { %v223_v28 = vmax.f32 %v221_v26, 0.0 }
  0xef   :  { %v264_v29 = vpack.c.bf16 %v223_v28, %v222_v27 }
  0xf1   :  { %265 = vst [vmem:[%s390_s3] sm:$0xff] %v264_v29  }

// kernel: _lambda_.32
= control target key start
LH: loop header
LB: loop body
LE: loop exit
PB: predicated region body
PF: predicated region fallthrough
CT: control target
= control target key end

     0   :  { %s681_s1 = inlined_call_operand.vmem [shape: bf16[512,128], index: 1, kind: input, shape index: {}]   ;;  %s682_s0 = inlined_call_operand.vmem [shape: bf16[16,512], index: 0, kind: input, shape index: {}]   ;;  %s683_s2 = inlined_call_operand.vmem [shape: f32[1,128], index: 2, kind: input, shape index: {}]   ;;  %s684_s3 = inlined_call_operand.vmem [shape: bf16[16,128], index: 3, kind: output, shape index: {}]  }
   0x1   :  { %v509_v0 = vld [vmem:[%s681_s1 + $0x78] sm:$0xff]   ;;  %v513_v4 = vld [vmem:[%s681_s1 + $0x70] sm:$0xff]   ;;  %v517_v8 = vld [vmem:[%s681_s1 + $0x68] sm:$0xff]  }
   0x2   :  { %v510_v1 = vld [vmem:[%s681_s1 + $0xf8] sm:$0xff]   ;;  %465 = vmatprep.subr.bf16.mxu0 %v509_v0  ;;  %v514_v5 = vld [vmem:[%s681_s1 + $0xf0] sm:$0xff]   ;;  %v518_v9 = vld [vmem:[%s681_s1 + $0xe8] sm:$0xff]  }
   0x3   :  { %v511_v2 = vld [vmem:[%s681_s1 + $0x38] sm:$0xff]   ;;  %487 = vmatprep.subr.bf16.mxu1 %v510_v1  ;;  %v515_v6 = vld [vmem:[%s681_s1 + $0x30] sm:$0xff]   ;;  %v519_v10 = vld [vmem:[%s681_s1 + $0x28] sm:$0xff]  }
   0x4   :  { %v512_v3 = vld [vmem:[%s681_s1 + $0xb8] sm:$0xff]   ;;  %466 = vmatpush3.bf16.msra.mxu0 %v511_v2  ;;  %v516_v7 = vld [vmem:[%s681_s1 + $0xb0] sm:$0xff]   ;;  %v520_v11 = vld [vmem:[%s681_s1 + $0xa8] sm:$0xff]  }
   0x5   :  { %488 = vmatpush3.bf16.msra.mxu1 %v512_v3  ;;  %467 = vmatprep.subr.bf16.mxu0 %v513_v4  ;;  %v521_v12 = vld [vmem:[%s681_s1 + $0x60] sm:$0xff]   ;;  %v525_v16 = vld [vmem:[%s681_s1 + $0x58] sm:$0xff]   ;;  %v529_v20 = vld [vmem:[%s681_s1 + $0x50] sm:$0xff]  }
   0x6   :  { %489 = vmatprep.subr.bf16.mxu1 %v514_v5  ;;  %v522_v13 = vld [vmem:[%s681_s1 + $0xe0] sm:$0xff]   ;;  %v526_v17 = vld [vmem:[%s681_s1 + $0xd8] sm:$0xff]   ;;  %v530_v21 = vld [vmem:[%s681_s1 + $0xd0] sm:$0xff]  }
   0x7   :  { %v523_v14 = vld [vmem:[%s681_s1 + $0x20] sm:$0xff]   ;;  %v527_v18 = vld [vmem:[%s681_s1 + $0x18] sm:$0xff]   ;;  %v531_v22 = vld [vmem:[%s681_s1 + $0x10] sm:$0xff]  }
   0x8   :  { %468 = vmatpush3.bf16.msra.mxu0 %v515_v6  ;;  %v524_v15 = vld [vmem:[%s681_s1 + $0xa0] sm:$0xff]   ;;  %v528_v19 = vld [vmem:[%s681_s1 + $0x98] sm:$0xff]   ;;  %v532_v23 = vld [vmem:[%s681_s1 + $0x90] sm:$0xff]  }
   0x9   :  { %490 = vmatpush3.bf16.msra.mxu1 %v516_v7  ;;  %469 = vmatprep.subr.bf16.mxu0 %v517_v8  ;;  %v533_v24 = vld [vmem:[%s681_s1 + $0x48] sm:$0xff]   ;;  %v537_v28 = vld [vmem:[%s681_s1 + $0x40] sm:$0xff]  }
   0xa   :  { %491 = vmatprep.subr.bf16.mxu1 %v518_v9  ;;  %v534_v25 = vld [vmem:[%s681_s1 + $0xc8] sm:$0xff]   ;;  %v538_v29 = vld [vmem:[%s681_s1 + $0xc0] sm:$0xff]  }
   0xb   :  { %v535_v26 = vld [vmem:[%s681_s1 + $0x8] sm:$0xff]   ;;  %v539_v30 = vld [vmem:[%s681_s1] sm:$0xff]  }
   0xc   :  { %470 = vmatpush3.bf16.msra.mxu0 %v519_v10  ;;  %v536_v27 = vld [vmem:[%s681_s1 + $0x88] sm:$0xff]   ;;  %v540_v31 = vld [vmem:[%s681_s1 + $0x80] sm:$0xff]  }
   0xd   :  { %492 = vmatpush3.bf16.msra.mxu1 %v520_v11  ;;  %471 = vmatprep.subr.bf16.mxu0 %v521_v12  ;;  %v541_v32 = vld [vmem:[%s682_s0] ss:$16 sps:$4 sm:$0xff]   ;;  %v543_v33 = vld [vmem:[%s682_s0 + $0x4] ss:$16 sps:$4 sm:$0xff]   ;;  %v544_v34 = vld [vmem:[%s682_s0 + $0x8] ss:$16 sps:$4 sm:$0xff]  }
   0xe   :  { %493 = vmatprep.subr.bf16.mxu1 %v522_v13  ;;  %v546_v35 = vld [vmem:[%s682_s0 + $0xc] ss:$16 sps:$4 sm:$0xff]   ;;  %335 = vmatprep.mubr.bf16.mxu0 %v543_v33  ;;  %v455_v46 = vld [vmem:[%s683_s2] ss:$0 sm:$0xff] }
   0xf   :  { %376 = vmatprep.mubr.bf16.mxu1 %v546_v35 }
  0x10   :  { %472 = vmatpush3.bf16.msra.mxu0 %v523_v14 }
  0x11   :  { %494 = vmatpush3.bf16.msra.mxu1 %v524_v15  ;;  %473 = vmatprep.subr.bf16.mxu0 %v525_v16 }
  0x12   :  { %495 = vmatprep.subr.bf16.mxu1 %v526_v17 }
  0x14   :  { %474 = vmatpush3.bf16.msra.mxu0 %v527_v18 }
  0x15   :  { %496 = vmatpush3.bf16.msra.mxu1 %v528_v19  ;;  %475 = vmatprep.subr.bf16.mxu0 %v529_v20 }
  0x16   :  { %497 = vmatprep.subr.bf16.mxu1 %v530_v21 }
  0x18   :  { %476 = vmatpush3.bf16.msra.mxu0 %v531_v22 }
  0x19   :  { %498 = vmatpush3.bf16.msra.mxu1 %v532_v23  ;;  %477 = vmatprep.subr.bf16.mxu0 %v533_v24 }
  0x1a   :  { %499 = vmatprep.subr.bf16.mxu1 %v534_v25 }
  0x1c   :  { %478 = vmatpush3.bf16.msra.mxu0 %v535_v26 }
  0x1d   :  { %500 = vmatpush3.bf16.msra.mxu1 %v536_v27  ;;  %479 = vmatprep.subr.bf16.mxu0 %v537_v28 }
  0x1e   :  { %501 = vmatprep.subr.bf16.mxu1 %v538_v29 }
  0x20   :  { %480 = vmatpush3.bf16.msra.mxu0 %v539_v30 }
  0x21   :  { %502 = vmatpush3.bf16.msra.mxu1 %v540_v31 }
  0x23   :  { %336 = vmatmul.mubr.bf16.vlgmr.msra.gmra.mxu0 %v541_v32 }
  0x24   :  { %377 = vmatmul.mubr.bf16.vlgmr.msra.gmra.mxu1 %v544_v34 }
  0xe3   :  { %v481_v36 = vpop.f32.mrf.mxu0 }
  0xe4   :  { %v503_v37 = vpop.f32.mrf.mxu1 }
  0xe5   :  { %v482_v38 = vpop.f32.mrf.mxu0 }
  0xe6   :  { %v483_v39 = vadd.f32 %v482_v38, %v481_v36  ;;  %v504_v40 = vpop.f32.mrf.mxu1 }
  0xe7   :  { %v505_v41 = vadd.f32 %v504_v40, %v503_v37  ;;  %v484_v42 = vpop.f32.mrf.mxu0 }
  0xe8   :  { %v506_v43 = vpop.f32.mrf.mxu1 }
  0xe9   :  { %v379_v44 = vadd.f32 %v505_v41, %v483_v39  ;;  %v485_v45 = vpop.f32.mrf.mxu0 }
  0xea   :  { %v486_v47 = vadd.f32 %v485_v45, %v484_v42  ;;  %v507_v48 = vpop.f32.mrf.mxu1 }
  0xeb   :  { %v508_v49 = vadd.f32 %v507_v48, %v506_v43  ;;  %v401_v50 = vadd.f32 %v455_v46, %v379_v44 }
  0xed   :  { %v382_v51 = vadd.f32 %v508_v49, %v486_v47  ;;  %v403_v53 = vmax.f32 %v401_v50, 0.0 }
  0xef   :  { %v402_v52 = vadd.f32 %v455_v46, %v382_v51 }
  0xf1   :  { %v404_v54 = vmax.f32 %v402_v52, 0.0 }
  0xf3   :  { %v463_v55 = vpack.c.bf16 %v404_v54, %v403_v53 }
  0xf5   :  { %464 = vst [vmem:[%s684_s3] sm:$0xff] %v463_v55  }

// kernel: _lambda_.31
= control target key start
LH: loop header
LB: loop body
LE: loop exit
PB: predicated region body
PF: predicated region fallthrough
CT: control target
= control target key end

     0   :  { %s700_s1 = inlined_call_operand.vmem [shape: bf16[512,128], index: 1, kind: input, shape index: {}]   ;;  %s701_s0 = inlined_call_operand.vmem [shape: bf16[16,512], index: 0, kind: input, shape index: {}]   ;;  %s702_s2 = inlined_call_operand.vmem [shape: f32[1,128], index: 2, kind: input, shape index: {}]   ;;  %s703_s3 = inlined_call_operand.vmem [shape: bf16[16,128], index: 3, kind: input, shape index: {}]   ;;  %s704_s4 = inlined_call_operand.vmem [shape: bf16[16,128], index: 4, kind: output, shape index: {}]  }
   0x1   :  { %v520_v0 = vld [vmem:[%s700_s1 + $0x78] sm:$0xff]   ;;  %v524_v4 = vld [vmem:[%s700_s1 + $0x70] sm:$0xff]   ;;  %v528_v8 = vld [vmem:[%s700_s1 + $0x68] sm:$0xff]  }
   0x2   :  { %v521_v1 = vld [vmem:[%s700_s1 + $0xf8] sm:$0xff]   ;;  %476 = vmatprep.subr.bf16.mxu0 %v520_v0  ;;  %v525_v5 = vld [vmem:[%s700_s1 + $0xf0] sm:$0xff]   ;;  %v529_v9 = vld [vmem:[%s700_s1 + $0xe8] sm:$0xff]  }
   0x3   :  { %v522_v2 = vld [vmem:[%s700_s1 + $0x38] sm:$0xff]   ;;  %498 = vmatprep.subr.bf16.mxu1 %v521_v1  ;;  %v526_v6 = vld [vmem:[%s700_s1 + $0x30] sm:$0xff]   ;;  %v530_v10 = vld [vmem:[%s700_s1 + $0x28] sm:$0xff]  }
   0x4   :  { %v523_v3 = vld [vmem:[%s700_s1 + $0xb8] sm:$0xff]   ;;  %477 = vmatpush3.bf16.msra.mxu0 %v522_v2  ;;  %v527_v7 = vld [vmem:[%s700_s1 + $0xb0] sm:$0xff]   ;;  %v531_v11 = vld [vmem:[%s700_s1 + $0xa8] sm:$0xff]  }
   0x5   :  { %499 = vmatpush3.bf16.msra.mxu1 %v523_v3  ;;  %478 = vmatprep.subr.bf16.mxu0 %v524_v4  ;;  %v532_v12 = vld [vmem:[%s700_s1 + $0x60] sm:$0xff]   ;;  %v536_v16 = vld [vmem:[%s700_s1 + $0x58] sm:$0xff]   ;;  %v540_v20 = vld [vmem:[%s700_s1 + $0x50] sm:$0xff]  }
   0x6   :  { %500 = vmatprep.subr.bf16.mxu1 %v525_v5  ;;  %v533_v13 = vld [vmem:[%s700_s1 + $0xe0] sm:$0xff]   ;;  %v537_v17 = vld [vmem:[%s700_s1 + $0xd8] sm:$0xff]   ;;  %v541_v21 = vld [vmem:[%s700_s1 + $0xd0] sm:$0xff]  }
   0x7   :  { %v534_v14 = vld [vmem:[%s700_s1 + $0x20] sm:$0xff]   ;;  %v538_v18 = vld [vmem:[%s700_s1 + $0x18] sm:$0xff]   ;;  %v542_v22 = vld [vmem:[%s700_s1 + $0x10] sm:$0xff]  }
   0x8   :  { %479 = vmatpush3.bf16.msra.mxu0 %v526_v6  ;;  %v535_v15 = vld [vmem:[%s700_s1 + $0xa0] sm:$0xff]   ;;  %v539_v19 = vld [vmem:[%s700_s1 + $0x98] sm:$0xff]   ;;  %v543_v23 = vld [vmem:[%s700_s1 + $0x90] sm:$0xff]  }
   0x9   :  { %501 = vmatpush3.bf16.msra.mxu1 %v527_v7  ;;  %480 = vmatprep.subr.bf16.mxu0 %v528_v8  ;;  %v544_v24 = vld [vmem:[%s700_s1 + $0x48] sm:$0xff]   ;;  %v548_v28 = vld [vmem:[%s700_s1 + $0x40] sm:$0xff]  }
   0xa   :  { %502 = vmatprep.subr.bf16.mxu1 %v529_v9  ;;  %v545_v25 = vld [vmem:[%s700_s1 + $0xc8] sm:$0xff]   ;;  %v549_v29 = vld [vmem:[%s700_s1 + $0xc0] sm:$0xff]  }
   0xb   :  { %v546_v26 = vld [vmem:[%s700_s1 + $0x8] sm:$0xff]   ;;  %v550_v30 = vld [vmem:[%s700_s1] sm:$0xff]  }
   0xc   :  { %481 = vmatpush3.bf16.msra.mxu0 %v530_v10  ;;  %v547_v27 = vld [vmem:[%s700_s1 + $0x88] sm:$0xff]   ;;  %v551_v31 = vld [vmem:[%s700_s1 + $0x80] sm:$0xff]  }
   0xd   :  { %503 = vmatpush3.bf16.msra.mxu1 %v531_v11  ;;  %482 = vmatprep.subr.bf16.mxu0 %v532_v12  ;;  %v552_v32 = vld [vmem:[%s701_s0] ss:$16 sps:$4 sm:$0xff]   ;;  %v554_v33 = vld [vmem:[%s701_s0 + $0x4] ss:$16 sps:$4 sm:$0xff]   ;;  %v555_v34 = vld [vmem:[%s701_s0 + $0x8] ss:$16 sps:$4 sm:$0xff]  }
   0xe   :  { %504 = vmatprep.subr.bf16.mxu1 %v533_v13  ;;  %v557_v35 = vld [vmem:[%s701_s0 + $0xc] ss:$16 sps:$4 sm:$0xff]   ;;  %338 = vmatprep.mubr.bf16.mxu0 %v554_v33  ;;  %v462_v46 = vld [vmem:[%s702_s2] ss:$0 sm:$0xff] }
   0xf   :  { %379 = vmatprep.mubr.bf16.mxu1 %v557_v35  ;;  %v468_v47 = vld [vmem:[%s703_s3] sm:$0xff]  }
  0x10   :  { %483 = vmatpush3.bf16.msra.mxu0 %v534_v14  ;;  %v469_v52 = vunpack.c.l.bf16 %v468_v47  ;;  %v470_v54 = vunpack.c.h.bf16 %v468_v47 }
  0x11   :  { %505 = vmatpush3.bf16.msra.mxu1 %v535_v15  ;;  %484 = vmatprep.subr.bf16.mxu0 %v536_v16 }
  0x12   :  { %506 = vmatprep.subr.bf16.mxu1 %v537_v17 }
  0x14   :  { %485 = vmatpush3.bf16.msra.mxu0 %v538_v18 }
  0x15   :  { %507 = vmatpush3.bf16.msra.mxu1 %v539_v19  ;;  %486 = vmatprep.subr.bf16.mxu0 %v540_v20 }
  0x16   :  { %508 = vmatprep.subr.bf16.mxu1 %v541_v21 }
  0x18   :  { %487 = vmatpush3.bf16.msra.mxu0 %v542_v22 }
  0x19   :  { %509 = vmatpush3.bf16.msra.mxu1 %v543_v23  ;;  %488 = vmatprep.subr.bf16.mxu0 %v544_v24 }
  0x1a   :  { %510 = vmatprep.subr.bf16.mxu1 %v545_v25 }
  0x1c   :  { %489 = vmatpush3.bf16.msra.mxu0 %v546_v26 }
  0x1d   :  { %511 = vmatpush3.bf16.msra.mxu1 %v547_v27  ;;  %490 = vmatprep.subr.bf16.mxu0 %v548_v28 }
  0x1e   :  { %512 = vmatprep.subr.bf16.mxu1 %v549_v29 }
  0x20   :  { %491 = vmatpush3.bf16.msra.mxu0 %v550_v30 }
  0x21   :  { %513 = vmatpush3.bf16.msra.mxu1 %v551_v31 }
  0x23   :  { %339 = vmatmul.mubr.bf16.vlgmr.msra.gmra.mxu0 %v552_v32 }
  0x24   :  { %380 = vmatmul.mubr.bf16.vlgmr.msra.gmra.mxu1 %v555_v34 }
  0xe3   :  { %v492_v36 = vpop.f32.mrf.mxu0 }
  0xe4   :  { %v514_v37 = vpop.f32.mrf.mxu1 }
  0xe5   :  { %v493_v38 = vpop.f32.mrf.mxu0 }
  0xe6   :  { %v494_v39 = vadd.f32 %v493_v38, %v492_v36  ;;  %v515_v40 = vpop.f32.mrf.mxu1 }
  0xe7   :  { %v516_v41 = vadd.f32 %v515_v40, %v514_v37  ;;  %v495_v42 = vpop.f32.mrf.mxu0 }
  0xe8   :  { %v517_v43 = vpop.f32.mrf.mxu1 }
  0xe9   :  { %v382_v44 = vadd.f32 %v516_v41, %v494_v39  ;;  %v496_v45 = vpop.f32.mrf.mxu0 }
  0xea   :  { %v497_v48 = vadd.f32 %v496_v45, %v495_v42  ;;  %v518_v49 = vpop.f32.mrf.mxu1 }
  0xeb   :  { %v519_v50 = vadd.f32 %v518_v49, %v517_v43  ;;  %v404_v51 = vadd.f32 %v462_v46, %v382_v44 }
  0xed   :  { %v385_v53 = vadd.f32 %v519_v50, %v497_v48  ;;  %v410_v56 = vadd.f32 %v469_v52, %v404_v51 }
  0xef   :  { %v405_v55 = vadd.f32 %v462_v46, %v385_v53 }
  0xf1   :  { %v411_v57 = vadd.f32 %v470_v54, %v405_v55 }
  0xf3   :  { %v474_v58 = vpack.c.bf16 %v411_v57, %v410_v56 }
  0xf5   :  { %475 = vst [vmem:[%s704_s4] sm:$0xff] %v474_v58  }

// kernel: _lambda_.36
= control target key start
LH: loop header
LB: loop body
LE: loop exit
PB: predicated region body
PF: predicated region fallthrough
CT: control target
= control target key end

     0   :  { %v960_v36 = vmov 0.0   ;;  %vm961_vm0 = vmmov 0   ;;  %s1185_s1 = inlined_call_operand.vmem [shape: bf16[896,128], index: 1, kind: input, shape index: {}]   ;;  %s1186_s0 = inlined_call_operand.vmem [shape: bf16[16,896], index: 0, kind: input, shape index: {}]   ;;  %s1187_s2 = inlined_call_operand.vmem [shape: f32[1,128], index: 2, kind: input, shape index: {}]   ;;  %s1188_s3 = inlined_call_operand.vmem [shape: bf16[16,128], index: 3, kind: input, shape index: {}]   ;;  %s1189_s4 = inlined_call_operand.vmem [shape: bf16[16,128], index: 4, kind: output, shape index: {}]  }
   0x1   :  { %v894_v0 = vld [vmem:[%s1185_s1 + $0x78] sm:$0xff]   ;;  %v898_v4 = vld [vmem:[%s1185_s1 + $0x70] sm:$0xff]   ;;  %v902_v8 = vld [vmem:[%s1185_s1 + $0x68] sm:$0xff]  }
   0x2   :  { %v895_v1 = vld [vmem:[%s1185_s1 + $0xf8] sm:$0xff]   ;;  %797 = vmatprep.subr.bf16.mxu0 %v894_v0  ;;  %v899_v5 = vld [vmem:[%s1185_s1 + $0xf0] sm:$0xff]   ;;  %v903_v9 = vld [vmem:[%s1185_s1 + $0xe8] sm:$0xff]  }
   0x3   :  { %v896_v2 = vld [vmem:[%s1185_s1 + $0x38] sm:$0xff]   ;;  %819 = vmatprep.subr.bf16.mxu1 %v895_v1  ;;  %v900_v6 = vld [vmem:[%s1185_s1 + $0x30] sm:$0xff]   ;;  %v904_v10 = vld [vmem:[%s1185_s1 + $0x28] sm:$0xff]  }
   0x4   :  { %v897_v3 = vld [vmem:[%s1185_s1 + $0xb8] sm:$0xff]   ;;  %798 = vmatpush3.bf16.msra.mxu0 %v896_v2  ;;  %v901_v7 = vld [vmem:[%s1185_s1 + $0xb0] sm:$0xff]   ;;  %v905_v11 = vld [vmem:[%s1185_s1 + $0xa8] sm:$0xff]  }
   0x5   :  { %820 = vmatpush3.bf16.msra.mxu1 %v897_v3  ;;  %799 = vmatprep.subr.bf16.mxu0 %v898_v4  ;;  %v906_v12 = vld [vmem:[%s1185_s1 + $0x60] sm:$0xff]   ;;  %v910_v16 = vld [vmem:[%s1185_s1 + $0x58] sm:$0xff]   ;;  %v914_v20 = vld [vmem:[%s1185_s1 + $0x50] sm:$0xff]  }
   0x6   :  { %821 = vmatprep.subr.bf16.mxu1 %v899_v5  ;;  %v907_v13 = vld [vmem:[%s1185_s1 + $0xe0] sm:$0xff]   ;;  %v911_v17 = vld [vmem:[%s1185_s1 + $0xd8] sm:$0xff]   ;;  %v915_v21 = vld [vmem:[%s1185_s1 + $0xd0] sm:$0xff]  }
   0x7   :  { %v908_v14 = vld [vmem:[%s1185_s1 + $0x20] sm:$0xff]   ;;  %v912_v18 = vld [vmem:[%s1185_s1 + $0x18] sm:$0xff]   ;;  %v916_v22 = vld [vmem:[%s1185_s1 + $0x10] sm:$0xff]  }
   0x8   :  { %800 = vmatpush3.bf16.msra.mxu0 %v900_v6  ;;  %v909_v15 = vld [vmem:[%s1185_s1 + $0xa0] sm:$0xff]   ;;  %v913_v19 = vld [vmem:[%s1185_s1 + $0x98] sm:$0xff]   ;;  %v917_v23 = vld [vmem:[%s1185_s1 + $0x90] sm:$0xff]  }
   0x9   :  { %822 = vmatpush3.bf16.msra.mxu1 %v901_v7  ;;  %801 = vmatprep.subr.bf16.mxu0 %v902_v8  ;;  %v918_v24 = vld [vmem:[%s1185_s1 + $0x48] sm:$0xff]   ;;  %v922_v28 = vld [vmem:[%s1185_s1 + $0x40] sm:$0xff]   ;;  %v932_v37 = vld [vmem:[%s1185_s1 + $0x178] sm:$0xff]  }
   0xa   :  { %823 = vmatprep.subr.bf16.mxu1 %v903_v9  ;;  %v919_v25 = vld [vmem:[%s1185_s1 + $0xc8] sm:$0xff]   ;;  %v923_v29 = vld [vmem:[%s1185_s1 + $0xc0] sm:$0xff]   ;;  %v933_v38 = vld [vmem:[%s1185_s1 + $0x138] sm:$0xff]  }
   0xb   :  { %v920_v26 = vld [vmem:[%s1185_s1 + $0x8] sm:$0xff]   ;;  %v924_v30 = vld [vmem:[%s1185_s1] sm:$0xff]   ;;  %v934_v39 = vld [vmem:[%s1185_s1 + $0x1b8] sm:$0xff]  }
   0xc   :  { %802 = vmatpush3.bf16.msra.mxu0 %v904_v10  ;;  %v921_v27 = vld [vmem:[%s1185_s1 + $0x88] sm:$0xff]   ;;  %v925_v31 = vld [vmem:[%s1185_s1 + $0x80] sm:$0xff]   ;;  %v935_v40 = vld [vmem:[%s1185_s1 + $0x170] sm:$0xff]  }
   0xd   :  { %824 = vmatpush3.bf16.msra.mxu1 %v905_v11  ;;  %803 = vmatprep.subr.bf16.mxu0 %v906_v12  ;;  %v926_v32 = vld [vmem:[%s1186_s0] ss:$28 sps:$4 sm:$0xff]   ;;  %v929_v34 = vld [vmem:[%s1186_s0 + $0x8] ss:$28 sps:$4 sm:$0xff]   ;;  %v936_v41 = vld [vmem:[%s1185_s1 + $0x130] sm:$0xff]  }
   0xe   :  { %825 = vmatprep.subr.bf16.mxu1 %v907_v13  ;;  %v928_v33 = vld [vmem:[%s1186_s0 + $0x4] ss:$28 sps:$4 sm:$0xff]   ;;  %v931_v35 = vld [vmem:[%s1186_s0 + $0xc] ss:$28 sps:$4 sm:$0xff]   ;;  %v937_v42 = vld [vmem:[%s1185_s1 + $0x1b0] sm:$0xff]  }
   0xf   :  { %550 = vmatprep.mubr.bf16.mxu0 %v928_v33  ;;  %591 = vmatprep.mubr.bf16.mxu1 %v931_v35  ;;  %v938_v43 = vld [vmem:[%s1185_s1 + $0x168] sm:$0xff]   ;;  %v941_v46 = vld [vmem:[%s1185_s1 + $0x160] sm:$0xff]   ;;  %v944_v49 = vld [vmem:[%s1185_s1 + $0x158] sm:$0xff]  }
  0x10   :  { %804 = vmatpush3.bf16.msra.mxu0 %v908_v14  ;;  %v939_v44 = vld [vmem:[%s1185_s1 + $0x128] sm:$0xff]   ;;  %v942_v47 = vld [vmem:[%s1185_s1 + $0x120] sm:$0xff]   ;;  %v945_v50 = vld [vmem:[%s1185_s1 + $0x118] sm:$0xff]  }
  0x11   :  { %826 = vmatpush3.bf16.msra.mxu1 %v909_v15  ;;  %805 = vmatprep.subr.bf16.mxu0 %v910_v16  ;;  %v940_v45 = vld [vmem:[%s1185_s1 + $0x1a8] sm:$0xff]   ;;  %v943_v48 = vld [vmem:[%s1185_s1 + $0x1a0] sm:$0xff]   ;;  %v946_v51 = vld [vmem:[%s1185_s1 + $0x198] sm:$0xff]  }
  0x12   :  { %827 = vmatprep.subr.bf16.mxu1 %v911_v17  ;;  %v947_v52 = vld [vmem:[%s1185_s1 + $0x150] sm:$0xff]   ;;  %v950_v55 = vld [vmem:[%s1185_s1 + $0x148] sm:$0xff]   ;;  %v953_v58 = vld [vmem:[%s1185_s1 + $0x140] sm:$0xff]  }
  0x13   :  { %v948_v53 = vld [vmem:[%s1185_s1 + $0x110] sm:$0xff]   ;;  %v951_v56 = vld [vmem:[%s1185_s1 + $0x108] sm:$0xff]   ;;  %v954_v60 = vld [vmem:[%s1185_s1 + $0x100] sm:$0xff]  }
  0x14   :  { %806 = vmatpush3.bf16.msra.mxu0 %v912_v18  ;;  %v949_v54 = vld [vmem:[%s1185_s1 + $0x190] sm:$0xff]   ;;  %v952_v57 = vld [vmem:[%s1185_s1 + $0x188] sm:$0xff]   ;;  %v955_v61 = vld [vmem:[%s1185_s1 + $0x180] sm:$0xff]  }
  0x15   :  { %828 = vmatpush3.bf16.msra.mxu1 %v913_v19  ;;  %807 = vmatprep.subr.bf16.mxu0 %v914_v20  ;;  %v958_v59 = vld [vmem:[%s1186_s0 + $0x14] ss:$28 sps:$4 sm:$0xff]  }
  0x16   :  { %829 = vmatprep.subr.bf16.mxu1 %v915_v21  ;;  %v956_v62 = vld [vmem:[%s1186_s0 + $0x10] ss:$28 sps:$4 sm:$0xff]   ;;  %v959_v63 = vld [vmem:[%s1186_s0 + $0x18] ss:$28 sps:$4 sm:$0xff]  }
  0x18   :  { %808 = vmatpush3.bf16.msra.mxu0 %v916_v22 }
  0x19   :  { %830 = vmatpush3.bf16.msra.mxu1 %v917_v23  ;;  %809 = vmatprep.subr.bf16.mxu0 %v918_v24 }
  0x1a   :  { %831 = vmatprep.subr.bf16.mxu1 %v919_v25 }
  0x1c   :  { %810 = vmatpush3.bf16.msra.mxu0 %v920_v26  ;;  %v783_v26 = vld [vmem:[%s1187_s2] ss:$0 sm:$0xff] }
  0x1d   :  { %832 = vmatpush3.bf16.msra.mxu1 %v921_v27  ;;  %811 = vmatprep.subr.bf16.mxu0 %v922_v28  ;;  %v789_v27 = vld [vmem:[%s1188_s3] sm:$0xff]  }
  0x1e   :  { %833 = vmatprep.subr.bf16.mxu1 %v923_v29 }
  0x20   :  { %812 = vmatpush3.bf16.msra.mxu0 %v924_v30  ;;  %v790_v30 = vunpack.c.l.bf16 %v789_v27 }
  0x21   :  { %834 = vmatpush3.bf16.msra.mxu1 %v925_v31  ;;  %841 = vmatprep.subr.bf16.mxu0 %v932_v37 }
  0x22   :  { %872 = vmatprep.subr.bf16.mxu1 %v960_v36 }
  0x23   :  { %551 = vmatmul.mubr.bf16.vlgmr.msra.gmra.mxu0 %v926_v32  ;;  %v791_v32 = vunpack.c.h.bf16 %v789_v27 }
  0x24   :  { %592 = vmatmul.mubr.bf16.vlgmr.msra.gmra.mxu1 %v929_v34  ;;  %842 = vmatpush3.bf16.msra.mxu0 %v933_v38 }
  0x25   :  { %888 = vmatprep.mubr.msk.bf16.mxu1 %vm961_vm0, %v960_v36  ;;  %873 = vmatpush3.bf16.msra.mxu1 %v934_v39 }
  0x26   :  { %843 = vmatprep.subr.bf16.mxu0 %v935_v40  ;;  %874 = vmatprep.subr.bf16.mxu1 %v960_v36 }
  0x27   :  { %632 = vmatprep.mubr.bf16.mxu0 %v958_v59 }
  0x28   :  { %844 = vmatpush3.bf16.msra.mxu0 %v936_v41 }
  0x29   :  { %875 = vmatpush3.bf16.msra.mxu1 %v937_v42  ;;  %845 = vmatprep.subr.bf16.mxu0 %v938_v43 }
  0x2a   :  { %876 = vmatprep.subr.bf16.mxu1 %v960_v36 }
  0x2c   :  { %846 = vmatpush3.bf16.msra.mxu0 %v939_v44 }
  0x2d   :  { %877 = vmatpush3.bf16.msra.mxu1 %v940_v45  ;;  %847 = vmatprep.subr.bf16.mxu0 %v941_v46 }
  0x2e   :  { %878 = vmatprep.subr.bf16.mxu1 %v960_v36 }
  0x30   :  { %848 = vmatpush3.bf16.msra.mxu0 %v942_v47 }
  0x31   :  { %879 = vmatpush3.bf16.msra.mxu1 %v943_v48  ;;  %849 = vmatprep.subr.bf16.mxu0 %v944_v49 }
  0x32   :  { %880 = vmatprep.subr.bf16.mxu1 %v960_v36 }
  0x34   :  { %850 = vmatpush3.bf16.msra.mxu0 %v945_v50 }
  0x35   :  { %881 = vmatpush3.bf16.msra.mxu1 %v946_v51  ;;  %851 = vmatprep.subr.bf16.mxu0 %v947_v52 }
  0x36   :  { %882 = vmatprep.subr.bf16.mxu1 %v960_v36 }
  0x38   :  { %852 = vmatpush3.bf16.msra.mxu0 %v948_v53 }
  0x39   :  { %883 = vmatpush3.bf16.msra.mxu1 %v949_v54  ;;  %853 = vmatprep.subr.bf16.mxu0 %v950_v55 }
  0x3a   :  { %884 = vmatprep.subr.bf16.mxu1 %v960_v36 }
  0x3c   :  { %854 = vmatpush3.bf16.msra.mxu0 %v951_v56 }
  0x3d   :  { %885 = vmatpush3.bf16.msra.mxu1 %v952_v57  ;;  %855 = vmatprep.subr.bf16.mxu0 %v953_v58 }
  0x3e   :  { %886 = vmatprep.subr.bf16.mxu1 %v960_v36 }
  0x40   :  { %856 = vmatpush3.bf16.msra.mxu0 %v954_v60 }
  0x41   :  { %887 = vmatpush3.bf16.msra.mxu1 %v955_v61 }
  0x43   :  { %633 = vmatmul.mubr.bf16.vlgmr.msra.gmra.mxu0 %v956_v62 }
  0x44   :  { %889 = vmatmul.mubr.bf16.vlgmr.msra.gmra.mxu1 %v959_v63 }
  0xe3   :  { %v813_v0 = vpop.f32.mrf.mxu0 }
  0xe4   :  { %v835_v1 = vpop.f32.mrf.mxu1 }
  0xe5   :  { %v814_v2 = vpop.f32.mrf.mxu0 }
  0xe6   :  { %v836_v3 = vpop.f32.mrf.mxu1  ;;  %v815_v7 = vadd.f32 %v814_v2, %v813_v0 }
  0xe7   :  { %v816_v4 = vpop.f32.mrf.mxu0  ;;  %v837_v8 = vadd.f32 %v836_v3, %v835_v1 }
  0xe8   :  { %v838_v5 = vpop.f32.mrf.mxu1 }
  0xe9   :  { %v817_v6 = vpop.f32.mrf.mxu0  ;;  %v594_v13 = vadd.f32 %v837_v8, %v815_v7 }
  0xea   :  { %v839_v9 = vpop.f32.mrf.mxu1  ;;  %v818_v14 = vadd.f32 %v817_v6, %v816_v4 }
  0xeb   :  { %v840_v15 = vadd.f32 %v839_v9, %v838_v5 }
  0xed   :  { %v597_v22 = vadd.f32 %v840_v15, %v818_v14 }
 0x103   :  { %v857_v10 = vpop.f32.mrf.mxu0 }
 0x104   :  { %v675_v11 = vpop.f32.mrf.mxu1 }
 0x105   :  { %v858_v12 = vpop.f32.mrf.mxu0 }
 0x106   :  { %v859_v16 = vadd.f32 %v858_v12, %v857_v10  ;;  %v890_v17 = vpop.f32.mrf.mxu1 }
 0x107   :  { %v860_v18 = vpop.f32.mrf.mxu0 }
 0x108   :  { %v635_v19 = vadd.f32 %v859_v16, %v594_v13  ;;  %v678_v20 = vpop.f32.mrf.mxu1 }
 0x109   :  { %v861_v21 = vpop.f32.mrf.mxu0 }
 0x10a   :  { %v676_v23 = vadd.f32 %v675_v11, %v635_v19  ;;  %v862_v24 = vadd.f32 %v861_v21, %v860_v18  ;;  %v891_v25 = vpop.f32.mrf.mxu1 }
 0x10c   :  { %v638_v28 = vadd.f32 %v862_v24, %v597_v22  ;;  %v698_v29 = vadd.f32 %v783_v26, %v676_v23 }
 0x10e   :  { %v679_v31 = vadd.f32 %v678_v20, %v638_v28  ;;  %v704_v34 = vadd.f32 %v790_v30, %v698_v29 }
 0x110   :  { %v699_v33 = vadd.f32 %v783_v26, %v679_v31 }
 0x112   :  { %v705_v35 = vadd.f32 %v791_v32, %v699_v33 }
 0x114   :  { %v795_v36 = vpack.c.bf16 %v705_v35, %v704_v34 }
 0x116   :  { %796 = vst [vmem:[%s1189_s4] sm:$0xff] %v795_v36  }

// kernel: _lambda_.37
= control target key start
LH: loop header
LB: loop body
LE: loop exit
PB: predicated region body
PF: predicated region fallthrough
CT: control target
= control target key end

     0   :  { %v949_v36 = vmov 0.0   ;;  %vm950_vm0 = vmmov 0   ;;  %s1166_s1 = inlined_call_operand.vmem [shape: bf16[896,128], index: 1, kind: input, shape index: {}]   ;;  %s1167_s0 = inlined_call_operand.vmem [shape: bf16[16,896], index: 0, kind: input, shape index: {}]   ;;  %s1168_s2 = inlined_call_operand.vmem [shape: f32[1,128], index: 2, kind: input, shape index: {}]   ;;  %s1169_s3 = inlined_call_operand.vmem [shape: bf16[16,128], index: 3, kind: output, shape index: {}]  }
   0x1   :  { %v883_v0 = vld [vmem:[%s1166_s1 + $0x78] sm:$0xff]   ;;  %v887_v4 = vld [vmem:[%s1166_s1 + $0x70] sm:$0xff]   ;;  %v891_v8 = vld [vmem:[%s1166_s1 + $0x68] sm:$0xff]  }
   0x2   :  { %v884_v1 = vld [vmem:[%s1166_s1 + $0xf8] sm:$0xff]   ;;  %786 = vmatprep.subr.bf16.mxu0 %v883_v0  ;;  %v888_v5 = vld [vmem:[%s1166_s1 + $0xf0] sm:$0xff]   ;;  %v892_v9 = vld [vmem:[%s1166_s1 + $0xe8] sm:$0xff]  }
   0x3   :  { %v885_v2 = vld [vmem:[%s1166_s1 + $0x38] sm:$0xff]   ;;  %808 = vmatprep.subr.bf16.mxu1 %v884_v1  ;;  %v889_v6 = vld [vmem:[%s1166_s1 + $0x30] sm:$0xff]   ;;  %v893_v10 = vld [vmem:[%s1166_s1 + $0x28] sm:$0xff]  }
   0x4   :  { %v886_v3 = vld [vmem:[%s1166_s1 + $0xb8] sm:$0xff]   ;;  %787 = vmatpush3.bf16.msra.mxu0 %v885_v2  ;;  %v890_v7 = vld [vmem:[%s1166_s1 + $0xb0] sm:$0xff]   ;;  %v894_v11 = vld [vmem:[%s1166_s1 + $0xa8] sm:$0xff]  }
   0x5   :  { %809 = vmatpush3.bf16.msra.mxu1 %v886_v3  ;;  %788 = vmatprep.subr.bf16.mxu0 %v887_v4  ;;  %v895_v12 = vld [vmem:[%s1166_s1 + $0x60] sm:$0xff]   ;;  %v899_v16 = vld [vmem:[%s1166_s1 + $0x58] sm:$0xff]   ;;  %v903_v20 = vld [vmem:[%s1166_s1 + $0x50] sm:$0xff]  }
   0x6   :  { %810 = vmatprep.subr.bf16.mxu1 %v888_v5  ;;  %v896_v13 = vld [vmem:[%s1166_s1 + $0xe0] sm:$0xff]   ;;  %v900_v17 = vld [vmem:[%s1166_s1 + $0xd8] sm:$0xff]   ;;  %v904_v21 = vld [vmem:[%s1166_s1 + $0xd0] sm:$0xff]  }
   0x7   :  { %v897_v14 = vld [vmem:[%s1166_s1 + $0x20] sm:$0xff]   ;;  %v901_v18 = vld [vmem:[%s1166_s1 + $0x18] sm:$0xff]   ;;  %v905_v22 = vld [vmem:[%s1166_s1 + $0x10] sm:$0xff]  }
   0x8   :  { %789 = vmatpush3.bf16.msra.mxu0 %v889_v6  ;;  %v898_v15 = vld [vmem:[%s1166_s1 + $0xa0] sm:$0xff]   ;;  %v902_v19 = vld [vmem:[%s1166_s1 + $0x98] sm:$0xff]   ;;  %v906_v23 = vld [vmem:[%s1166_s1 + $0x90] sm:$0xff]  }
   0x9   :  { %811 = vmatpush3.bf16.msra.mxu1 %v890_v7  ;;  %790 = vmatprep.subr.bf16.mxu0 %v891_v8  ;;  %v907_v24 = vld [vmem:[%s1166_s1 + $0x48] sm:$0xff]   ;;  %v911_v28 = vld [vmem:[%s1166_s1 + $0x40] sm:$0xff]   ;;  %v921_v37 = vld [vmem:[%s1166_s1 + $0x178] sm:$0xff]  }
   0xa   :  { %812 = vmatprep.subr.bf16.mxu1 %v892_v9  ;;  %v908_v25 = vld [vmem:[%s1166_s1 + $0xc8] sm:$0xff]   ;;  %v912_v29 = vld [vmem:[%s1166_s1 + $0xc0] sm:$0xff]   ;;  %v922_v38 = vld [vmem:[%s1166_s1 + $0x138] sm:$0xff]  }
   0xb   :  { %v909_v26 = vld [vmem:[%s1166_s1 + $0x8] sm:$0xff]   ;;  %v913_v30 = vld [vmem:[%s1166_s1] sm:$0xff]   ;;  %v923_v39 = vld [vmem:[%s1166_s1 + $0x1b8] sm:$0xff]  }
   0xc   :  { %791 = vmatpush3.bf16.msra.mxu0 %v893_v10  ;;  %v910_v27 = vld [vmem:[%s1166_s1 + $0x88] sm:$0xff]   ;;  %v914_v31 = vld [vmem:[%s1166_s1 + $0x80] sm:$0xff]   ;;  %v924_v40 = vld [vmem:[%s1166_s1 + $0x170] sm:$0xff]  }
   0xd   :  { %813 = vmatpush3.bf16.msra.mxu1 %v894_v11  ;;  %792 = vmatprep.subr.bf16.mxu0 %v895_v12  ;;  %v915_v32 = vld [vmem:[%s1167_s0] ss:$28 sps:$4 sm:$0xff]   ;;  %v918_v34 = vld [vmem:[%s1167_s0 + $0x8] ss:$28 sps:$4 sm:$0xff]   ;;  %v925_v41 = vld [vmem:[%s1166_s1 + $0x130] sm:$0xff]  }
   0xe   :  { %814 = vmatprep.subr.bf16.mxu1 %v896_v13  ;;  %v917_v33 = vld [vmem:[%s1167_s0 + $0x4] ss:$28 sps:$4 sm:$0xff]   ;;  %v920_v35 = vld [vmem:[%s1167_s0 + $0xc] ss:$28 sps:$4 sm:$0xff]   ;;  %v926_v42 = vld [vmem:[%s1166_s1 + $0x1b0] sm:$0xff]  }
   0xf   :  { %547 = vmatprep.mubr.bf16.mxu0 %v917_v33  ;;  %588 = vmatprep.mubr.bf16.mxu1 %v920_v35  ;;  %v927_v43 = vld [vmem:[%s1166_s1 + $0x168] sm:$0xff]   ;;  %v930_v46 = vld [vmem:[%s1166_s1 + $0x160] sm:$0xff]   ;;  %v933_v49 = vld [vmem:[%s1166_s1 + $0x158] sm:$0xff]  }
  0x10   :  { %793 = vmatpush3.bf16.msra.mxu0 %v897_v14  ;;  %v928_v44 = vld [vmem:[%s1166_s1 + $0x128] sm:$0xff]   ;;  %v931_v47 = vld [vmem:[%s1166_s1 + $0x120] sm:$0xff]   ;;  %v934_v50 = vld [vmem:[%s1166_s1 + $0x118] sm:$0xff]  }
  0x11   :  { %815 = vmatpush3.bf16.msra.mxu1 %v898_v15  ;;  %794 = vmatprep.subr.bf16.mxu0 %v899_v16  ;;  %v929_v45 = vld [vmem:[%s1166_s1 + $0x1a8] sm:$0xff]   ;;  %v932_v48 = vld [vmem:[%s1166_s1 + $0x1a0] sm:$0xff]   ;;  %v935_v51 = vld [vmem:[%s1166_s1 + $0x198] sm:$0xff]  }
  0x12   :  { %816 = vmatprep.subr.bf16.mxu1 %v900_v17  ;;  %v936_v52 = vld [vmem:[%s1166_s1 + $0x150] sm:$0xff]   ;;  %v939_v55 = vld [vmem:[%s1166_s1 + $0x148] sm:$0xff]   ;;  %v942_v58 = vld [vmem:[%s1166_s1 + $0x140] sm:$0xff]  }
  0x13   :  { %v937_v53 = vld [vmem:[%s1166_s1 + $0x110] sm:$0xff]   ;;  %v940_v56 = vld [vmem:[%s1166_s1 + $0x108] sm:$0xff]   ;;  %v943_v60 = vld [vmem:[%s1166_s1 + $0x100] sm:$0xff]  }
  0x14   :  { %795 = vmatpush3.bf16.msra.mxu0 %v901_v18  ;;  %v938_v54 = vld [vmem:[%s1166_s1 + $0x190] sm:$0xff]   ;;  %v941_v57 = vld [vmem:[%s1166_s1 + $0x188] sm:$0xff]   ;;  %v944_v61 = vld [vmem:[%s1166_s1 + $0x180] sm:$0xff]  }
  0x15   :  { %817 = vmatpush3.bf16.msra.mxu1 %v902_v19  ;;  %796 = vmatprep.subr.bf16.mxu0 %v903_v20  ;;  %v947_v59 = vld [vmem:[%s1167_s0 + $0x14] ss:$28 sps:$4 sm:$0xff]  }
  0x16   :  { %818 = vmatprep.subr.bf16.mxu1 %v904_v21  ;;  %v945_v62 = vld [vmem:[%s1167_s0 + $0x10] ss:$28 sps:$4 sm:$0xff]   ;;  %v948_v63 = vld [vmem:[%s1167_s0 + $0x18] ss:$28 sps:$4 sm:$0xff]  }
  0x18   :  { %797 = vmatpush3.bf16.msra.mxu0 %v905_v22 }
  0x19   :  { %819 = vmatpush3.bf16.msra.mxu1 %v906_v23  ;;  %798 = vmatprep.subr.bf16.mxu0 %v907_v24 }
  0x1a   :  { %820 = vmatprep.subr.bf16.mxu1 %v908_v25 }
  0x1c   :  { %799 = vmatpush3.bf16.msra.mxu0 %v909_v26  ;;  %v776_v26 = vld [vmem:[%s1168_s2] ss:$0 sm:$0xff] }
  0x1d   :  { %821 = vmatpush3.bf16.msra.mxu1 %v910_v27  ;;  %800 = vmatprep.subr.bf16.mxu0 %v911_v28 }
  0x1e   :  { %822 = vmatprep.subr.bf16.mxu1 %v912_v29 }
  0x20   :  { %801 = vmatpush3.bf16.msra.mxu0 %v913_v30 }
  0x21   :  { %823 = vmatpush3.bf16.msra.mxu1 %v914_v31  ;;  %830 = vmatprep.subr.bf16.mxu0 %v921_v37 }
  0x22   :  { %861 = vmatprep.subr.bf16.mxu1 %v949_v36 }
  0x23   :  { %548 = vmatmul.mubr.bf16.vlgmr.msra.gmra.mxu0 %v915_v32 }
  0x24   :  { %589 = vmatmul.mubr.bf16.vlgmr.msra.gmra.mxu1 %v918_v34  ;;  %831 = vmatpush3.bf16.msra.mxu0 %v922_v38 }
  0x25   :  { %877 = vmatprep.mubr.msk.bf16.mxu1 %vm950_vm0, %v949_v36  ;;  %862 = vmatpush3.bf16.msra.mxu1 %v923_v39 }
  0x26   :  { %832 = vmatprep.subr.bf16.mxu0 %v924_v40  ;;  %863 = vmatprep.subr.bf16.mxu1 %v949_v36 }
  0x27   :  { %629 = vmatprep.mubr.bf16.mxu0 %v947_v59 }
  0x28   :  { %833 = vmatpush3.bf16.msra.mxu0 %v925_v41 }
  0x29   :  { %864 = vmatpush3.bf16.msra.mxu1 %v926_v42  ;;  %834 = vmatprep.subr.bf16.mxu0 %v927_v43 }
  0x2a   :  { %865 = vmatprep.subr.bf16.mxu1 %v949_v36 }
  0x2c   :  { %835 = vmatpush3.bf16.msra.mxu0 %v928_v44 }
  0x2d   :  { %866 = vmatpush3.bf16.msra.mxu1 %v929_v45  ;;  %836 = vmatprep.subr.bf16.mxu0 %v930_v46 }
  0x2e   :  { %867 = vmatprep.subr.bf16.mxu1 %v949_v36 }
  0x30   :  { %837 = vmatpush3.bf16.msra.mxu0 %v931_v47 }
  0x31   :  { %868 = vmatpush3.bf16.msra.mxu1 %v932_v48  ;;  %838 = vmatprep.subr.bf16.mxu0 %v933_v49 }
  0x32   :  { %869 = vmatprep.subr.bf16.mxu1 %v949_v36 }
  0x34   :  { %839 = vmatpush3.bf16.msra.mxu0 %v934_v50 }
  0x35   :  { %870 = vmatpush3.bf16.msra.mxu1 %v935_v51  ;;  %840 = vmatprep.subr.bf16.mxu0 %v936_v52 }
  0x36   :  { %871 = vmatprep.subr.bf16.mxu1 %v949_v36 }
  0x38   :  { %841 = vmatpush3.bf16.msra.mxu0 %v937_v53 }
  0x39   :  { %872 = vmatpush3.bf16.msra.mxu1 %v938_v54  ;;  %842 = vmatprep.subr.bf16.mxu0 %v939_v55 }
  0x3a   :  { %873 = vmatprep.subr.bf16.mxu1 %v949_v36 }
  0x3c   :  { %843 = vmatpush3.bf16.msra.mxu0 %v940_v56 }
  0x3d   :  { %874 = vmatpush3.bf16.msra.mxu1 %v941_v57  ;;  %844 = vmatprep.subr.bf16.mxu0 %v942_v58 }
  0x3e   :  { %875 = vmatprep.subr.bf16.mxu1 %v949_v36 }
  0x40   :  { %845 = vmatpush3.bf16.msra.mxu0 %v943_v60 }
  0x41   :  { %876 = vmatpush3.bf16.msra.mxu1 %v944_v61 }
  0x43   :  { %630 = vmatmul.mubr.bf16.vlgmr.msra.gmra.mxu0 %v945_v62 }
  0x44   :  { %878 = vmatmul.mubr.bf16.vlgmr.msra.gmra.mxu1 %v948_v63 }
  0xe3   :  { %v802_v0 = vpop.f32.mrf.mxu0 }
  0xe4   :  { %v824_v1 = vpop.f32.mrf.mxu1 }
  0xe5   :  { %v803_v2 = vpop.f32.mrf.mxu0 }
  0xe6   :  { %v825_v3 = vpop.f32.mrf.mxu1  ;;  %v804_v7 = vadd.f32 %v803_v2, %v802_v0 }
  0xe7   :  { %v805_v4 = vpop.f32.mrf.mxu0  ;;  %v826_v8 = vadd.f32 %v825_v3, %v824_v1 }
  0xe8   :  { %v827_v5 = vpop.f32.mrf.mxu1 }
  0xe9   :  { %v806_v6 = vpop.f32.mrf.mxu0  ;;  %v591_v13 = vadd.f32 %v826_v8, %v804_v7 }
  0xea   :  { %v828_v9 = vpop.f32.mrf.mxu1  ;;  %v807_v14 = vadd.f32 %v806_v6, %v805_v4 }
  0xeb   :  { %v829_v15 = vadd.f32 %v828_v9, %v827_v5 }
  0xed   :  { %v594_v22 = vadd.f32 %v829_v15, %v807_v14 }
 0x103   :  { %v846_v10 = vpop.f32.mrf.mxu0 }
 0x104   :  { %v672_v11 = vpop.f32.mrf.mxu1 }
 0x105   :  { %v847_v12 = vpop.f32.mrf.mxu0 }
 0x106   :  { %v848_v16 = vadd.f32 %v847_v12, %v846_v10  ;;  %v879_v17 = vpop.f32.mrf.mxu1 }
 0x107   :  { %v849_v18 = vpop.f32.mrf.mxu0 }
 0x108   :  { %v632_v19 = vadd.f32 %v848_v16, %v591_v13  ;;  %v675_v20 = vpop.f32.mrf.mxu1 }
 0x109   :  { %v850_v21 = vpop.f32.mrf.mxu0 }
 0x10a   :  { %v673_v23 = vadd.f32 %v672_v11, %v632_v19  ;;  %v851_v24 = vadd.f32 %v850_v21, %v849_v18  ;;  %v880_v25 = vpop.f32.mrf.mxu1 }
 0x10c   :  { %v635_v27 = vadd.f32 %v851_v24, %v594_v22  ;;  %v695_v28 = vadd.f32 %v776_v26, %v673_v23 }
 0x10e   :  { %v676_v29 = vadd.f32 %v675_v20, %v635_v27  ;;  %v697_v31 = vmax.f32 %v695_v28, 0.0 }
 0x110   :  { %v696_v30 = vadd.f32 %v776_v26, %v676_v29 }
 0x112   :  { %v698_v32 = vmax.f32 %v696_v30, 0.0 }
 0x114   :  { %v784_v33 = vpack.c.bf16 %v698_v32, %v697_v31 }
 0x116   :  { %785 = vst [vmem:[%s1169_s3] sm:$0xff] %v784_v33  }

// kernel: _lambda_.41
= control target key start
LH: loop header
LB: loop body
LE: loop exit
PB: predicated region body
PF: predicated region fallthrough
CT: control target
= control target key end

     0   :  { %s2170_s1 = inlined_call_operand.vmem [shape: bf16[1792,128], index: 1, kind: input, shape index: {}]   ;;  %s2171_s0 = inlined_call_operand.vmem [shape: bf16[16,1792], index: 0, kind: input, shape index: {}]   ;;  %s2172_s2 = inlined_call_operand.vmem [shape: f32[1,128], index: 2, kind: input, shape index: {}]   ;;  %s2173_s3 = inlined_call_operand.vmem [shape: bf16[16,128], index: 3, kind: input, shape index: {}]   ;;  %s2174_s4 = inlined_call_operand.vmem [shape: bf16[16,128], index: 4, kind: output, shape index: {}]  }
   0x1   :  { %v1625_v0 = vld [vmem:[%s2170_s1 + $0x78] sm:$0xff]   ;;  %v1629_v4 = vld [vmem:[%s2170_s1 + $0x70] sm:$0xff]   ;;  %v1633_v8 = vld [vmem:[%s2170_s1 + $0x68] sm:$0xff]  }
   0x2   :  { %v1626_v1 = vld [vmem:[%s2170_s1 + $0xf8] sm:$0xff]   ;;  %1471 = vmatprep.subr.bf16.mxu0 %v1625_v0  ;;  %v1630_v5 = vld [vmem:[%s2170_s1 + $0xf0] sm:$0xff]   ;;  %v1634_v9 = vld [vmem:[%s2170_s1 + $0xe8] sm:$0xff]  }
   0x3   :  { %v1627_v2 = vld [vmem:[%s2170_s1 + $0x38] sm:$0xff]   ;;  %1493 = vmatprep.subr.bf16.mxu1 %v1626_v1  ;;  %v1631_v6 = vld [vmem:[%s2170_s1 + $0x30] sm:$0xff]   ;;  %v1635_v10 = vld [vmem:[%s2170_s1 + $0x28] sm:$0xff]  }
   0x4   :  { %v1628_v3 = vld [vmem:[%s2170_s1 + $0xb8] sm:$0xff]   ;;  %1472 = vmatpush3.bf16.msra.mxu0 %v1627_v2  ;;  %v1632_v7 = vld [vmem:[%s2170_s1 + $0xb0] sm:$0xff]   ;;  %v1636_v11 = vld [vmem:[%s2170_s1 + $0xa8] sm:$0xff]  }
   0x5   :  { %1494 = vmatpush3.bf16.msra.mxu1 %v1628_v3  ;;  %1473 = vmatprep.subr.bf16.mxu0 %v1629_v4  ;;  %v1637_v12 = vld [vmem:[%s2170_s1 + $0x60] sm:$0xff]   ;;  %v1641_v16 = vld [vmem:[%s2170_s1 + $0x58] sm:$0xff]   ;;  %v1645_v20 = vld [vmem:[%s2170_s1 + $0x50] sm:$0xff]  }
   0x6   :  { %1495 = vmatprep.subr.bf16.mxu1 %v1630_v5  ;;  %v1638_v13 = vld [vmem:[%s2170_s1 + $0xe0] sm:$0xff]   ;;  %v1642_v17 = vld [vmem:[%s2170_s1 + $0xd8] sm:$0xff]   ;;  %v1646_v21 = vld [vmem:[%s2170_s1 + $0xd0] sm:$0xff]  }
   0x7   :  { %v1639_v14 = vld [vmem:[%s2170_s1 + $0x20] sm:$0xff]   ;;  %v1643_v18 = vld [vmem:[%s2170_s1 + $0x18] sm:$0xff]   ;;  %v1647_v22 = vld [vmem:[%s2170_s1 + $0x10] sm:$0xff]  }
   0x8   :  { %1474 = vmatpush3.bf16.msra.mxu0 %v1631_v6  ;;  %v1640_v15 = vld [vmem:[%s2170_s1 + $0xa0] sm:$0xff]   ;;  %v1644_v19 = vld [vmem:[%s2170_s1 + $0x98] sm:$0xff]   ;;  %v1648_v23 = vld [vmem:[%s2170_s1 + $0x90] sm:$0xff]  }
   0x9   :  { %1496 = vmatpush3.bf16.msra.mxu1 %v1632_v7  ;;  %1475 = vmatprep.subr.bf16.mxu0 %v1633_v8  ;;  %v1649_v24 = vld [vmem:[%s2170_s1 + $0x48] sm:$0xff]   ;;  %v1653_v28 = vld [vmem:[%s2170_s1 + $0x40] sm:$0xff]   ;;  %v1663_v36 = vld [vmem:[%s2170_s1 + $0x178] sm:$0xff]  }
   0xa   :  { %1497 = vmatprep.subr.bf16.mxu1 %v1634_v9  ;;  %v1650_v25 = vld [vmem:[%s2170_s1 + $0xc8] sm:$0xff]   ;;  %v1654_v29 = vld [vmem:[%s2170_s1 + $0xc0] sm:$0xff]   ;;  %v1664_v37 = vld [vmem:[%s2170_s1 + $0x138] sm:$0xff]  }
   0xb   :  { %v1651_v26 = vld [vmem:[%s2170_s1 + $0x8] sm:$0xff]   ;;  %v1655_v30 = vld [vmem:[%s2170_s1] sm:$0xff]   ;;  %v1665_v38 = vld [vmem:[%s2170_s1 + $0x1f8] sm:$0xff]  }
   0xc   :  { %1476 = vmatpush3.bf16.msra.mxu0 %v1635_v10  ;;  %v1652_v27 = vld [vmem:[%s2170_s1 + $0x88] sm:$0xff]   ;;  %v1656_v31 = vld [vmem:[%s2170_s1 + $0x80] sm:$0xff]   ;;  %v1666_v39 = vld [vmem:[%s2170_s1 + $0x1b8] sm:$0xff]  }
   0xd   :  { %1498 = vmatpush3.bf16.msra.mxu1 %v1636_v11  ;;  %1477 = vmatprep.subr.bf16.mxu0 %v1637_v12  ;;  %v1657_v32 = vld [vmem:[%s2171_s0] ss:$56 sps:$4 sm:$0xff]   ;;  %v1659_v33 = vld [vmem:[%s2171_s0 + $0x4] ss:$56 sps:$4 sm:$0xff]   ;;  %v1667_v40 = vld [vmem:[%s2170_s1 + $0x170] sm:$0xff]  }
   0xe   :  { %1499 = vmatprep.subr.bf16.mxu1 %v1638_v13  ;;  %v1660_v34 = vld [vmem:[%s2171_s0 + $0x8] ss:$56 sps:$4 sm:$0xff]   ;;  %v1662_v35 = vld [vmem:[%s2171_s0 + $0xc] ss:$56 sps:$4 sm:$0xff]   ;;  %1038 = vmatprep.mubr.bf16.mxu0 %v1659_v33  ;;  %v1668_v41 = vld [vmem:[%s2170_s1 + $0x130] sm:$0xff]  }
   0xf   :  { %1079 = vmatprep.mubr.bf16.mxu1 %v1662_v35  ;;  %v1669_v42 = vld [vmem:[%s2170_s1 + $0x1f0] sm:$0xff]   ;;  %v1671_v44 = vld [vmem:[%s2170_s1 + $0x168] sm:$0xff]   ;;  %v1675_v48 = vld [vmem:[%s2170_s1 + $0x160] sm:$0xff]  }
  0x10   :  { %1478 = vmatpush3.bf16.msra.mxu0 %v1639_v14  ;;  %v1670_v43 = vld [vmem:[%s2170_s1 + $0x1b0] sm:$0xff]   ;;  %v1672_v45 = vld [vmem:[%s2170_s1 + $0x128] sm:$0xff]   ;;  %v1676_v49 = vld [vmem:[%s2170_s1 + $0x120] sm:$0xff]  }
  0x11   :  { %1500 = vmatpush3.bf16.msra.mxu1 %v1640_v15  ;;  %1479 = vmatprep.subr.bf16.mxu0 %v1641_v16  ;;  %v1673_v46 = vld [vmem:[%s2170_s1 + $0x1e8] sm:$0xff]   ;;  %v1677_v50 = vld [vmem:[%s2170_s1 + $0x1e0] sm:$0xff]   ;;  %v1679_v52 = vld [vmem:[%s2170_s1 + $0x158] sm:$0xff]  }
  0x12   :  { %1501 = vmatprep.subr.bf16.mxu1 %v1642_v17  ;;  %v1674_v47 = vld [vmem:[%s2170_s1 + $0x1a8] sm:$0xff]   ;;  %v1678_v51 = vld [vmem:[%s2170_s1 + $0x1a0] sm:$0xff]   ;;  %v1680_v53 = vld [vmem:[%s2170_s1 + $0x118] sm:$0xff]  }
  0x13   :  { %v1681_v54 = vld [vmem:[%s2170_s1 + $0x1d8] sm:$0xff]   ;;  %v1683_v56 = vld [vmem:[%s2170_s1 + $0x150] sm:$0xff]   ;;  %v1687_v60 = vld [vmem:[%s2170_s1 + $0x148] sm:$0xff]  }
  0x14   :  { %1480 = vmatpush3.bf16.msra.mxu0 %v1643_v18  ;;  %v1682_v55 = vld [vmem:[%s2170_s1 + $0x198] sm:$0xff]   ;;  %v1684_v57 = vld [vmem:[%s2170_s1 + $0x110] sm:$0xff]   ;;  %v1688_v61 = vld [vmem:[%s2170_s1 + $0x108] sm:$0xff]  }
  0x15   :  { %1502 = vmatpush3.bf16.msra.mxu1 %v1644_v19  ;;  %1481 = vmatprep.subr.bf16.mxu0 %v1645_v20  ;;  %v1685_v58 = vld [vmem:[%s2170_s1 + $0x1d0] sm:$0xff]   ;;  %v1689_v62 = vld [vmem:[%s2170_s1 + $0x1c8] sm:$0xff]   ;;  %v1691_v0 = vld [vmem:[%s2170_s1 + $0x140] sm:$0xff]  }
  0x16   :  { %1503 = vmatprep.subr.bf16.mxu1 %v1646_v21  ;;  %v1686_v59 = vld [vmem:[%s2170_s1 + $0x190] sm:$0xff]   ;;  %v1690_v63 = vld [vmem:[%s2170_s1 + $0x188] sm:$0xff]   ;;  %v1692_v1 = vld [vmem:[%s2170_s1 + $0x100] sm:$0xff]  }
  0x17   :  { %v1693_v2 = vld [vmem:[%s2170_s1 + $0x1c0] sm:$0xff]   ;;  %v1694_v3 = vld [vmem:[%s2171_s0 + $0x10] ss:$56 sps:$4 sm:$0xff]   ;;  %v1696_v4 = vld [vmem:[%s2171_s0 + $0x14] ss:$56 sps:$4 sm:$0xff]  }
  0x18   :  { %1482 = vmatpush3.bf16.msra.mxu0 %v1647_v22  ;;  %v1697_v5 = vld [vmem:[%s2170_s1 + $0x180] sm:$0xff]   ;;  %v1698_v6 = vld [vmem:[%s2170_s1 + $0x278] sm:$0xff]   ;;  %v1705_v12 = vld [vmem:[%s2170_s1 + $0x270] sm:$0xff]  }
  0x19   :  { %1504 = vmatpush3.bf16.msra.mxu1 %v1648_v23  ;;  %1483 = vmatprep.subr.bf16.mxu0 %v1649_v24  ;;  %v1699_v7 = vld [vmem:[%s2171_s0 + $0x18] ss:$56 sps:$4 sm:$0xff]   ;;  %v1701_v8 = vld [vmem:[%s2171_s0 + $0x1c] ss:$56 sps:$4 sm:$0xff]   ;;  %v1709_v16 = vld [vmem:[%s2170_s1 + $0x268] sm:$0xff]  }
  0x1a   :  { %1505 = vmatprep.subr.bf16.mxu1 %v1650_v25  ;;  %v1702_v9 = vld [vmem:[%s2170_s1 + $0x238] sm:$0xff]   ;;  %v1706_v13 = vld [vmem:[%s2170_s1 + $0x230] sm:$0xff]   ;;  %v1710_v17 = vld [vmem:[%s2170_s1 + $0x228] sm:$0xff]  }
  0x1b   :  { %v1703_v10 = vld [vmem:[%s2170_s1 + $0x2f8] sm:$0xff]   ;;  %v1707_v14 = vld [vmem:[%s2170_s1 + $0x2f0] sm:$0xff]   ;;  %v1711_v18 = vld [vmem:[%s2170_s1 + $0x2e8] sm:$0xff]  }
  0x1c   :  { %1484 = vmatpush3.bf16.msra.mxu0 %v1651_v26  ;;  %v1704_v11 = vld [vmem:[%s2170_s1 + $0x2b8] sm:$0xff]   ;;  %v1708_v15 = vld [vmem:[%s2170_s1 + $0x2b0] sm:$0xff]   ;;  %v1712_v19 = vld [vmem:[%s2170_s1 + $0x2a8] sm:$0xff]  }
  0x1d   :  { %1506 = vmatpush3.bf16.msra.mxu1 %v1652_v27  ;;  %1485 = vmatprep.subr.bf16.mxu0 %v1653_v28  ;;  %v1713_v20 = vld [vmem:[%s2170_s1 + $0x260] sm:$0xff]   ;;  %v1717_v24 = vld [vmem:[%s2170_s1 + $0x258] sm:$0xff]   ;;  %v1721_v28 = vld [vmem:[%s2170_s1 + $0x250] sm:$0xff]  }
  0x1e   :  { %1507 = vmatprep.subr.bf16.mxu1 %v1654_v29  ;;  %v1714_v21 = vld [vmem:[%s2170_s1 + $0x220] sm:$0xff]   ;;  %v1718_v25 = vld [vmem:[%s2170_s1 + $0x218] sm:$0xff]   ;;  %v1722_v29 = vld [vmem:[%s2170_s1 + $0x210] sm:$0xff]  }
  0x1f   :  { %v1715_v22 = vld [vmem:[%s2170_s1 + $0x2e0] sm:$0xff]   ;;  %v1719_v26 = vld [vmem:[%s2170_s1 + $0x2d8] sm:$0xff]   ;;  %v1726_v33 = vld [vmem:[%s2170_s1 + $0x208] sm:$0xff]  }
  0x20   :  { %1486 = vmatpush3.bf16.msra.mxu0 %v1655_v30  ;;  %v1716_v23 = vld [vmem:[%s2170_s1 + $0x2a0] sm:$0xff]   ;;  %v1720_v27 = vld [vmem:[%s2170_s1 + $0x298] sm:$0xff]   ;;  %v1723_v30 = vld [vmem:[%s2170_s1 + $0x2d0] sm:$0xff]  }
  0x21   :  { %1508 = vmatpush3.bf16.msra.mxu1 %v1656_v31  ;;  %1515 = vmatprep.subr.bf16.mxu0 %v1663_v36  ;;  %v1724_v31 = vld [vmem:[%s2170_s1 + $0x290] sm:$0xff]   ;;  %v1728_v35 = vld [vmem:[%s2170_s1 + $0x288] sm:$0xff]   ;;  %v1729_v36 = vld [vmem:[%s2170_s1 + $0x240] sm:$0xff]  }
  0x22   :  { %1537 = vmatprep.subr.bf16.mxu1 %v1665_v38  ;;  %v1731_v38 = vld [vmem:[%s2170_s1 + $0x2c0] sm:$0xff]  }
  0x23   :  { %1039 = vmatmul.mubr.bf16.vlgmr.msra.gmra.mxu0 %v1657_v32  ;;  %v1725_v32 = vld [vmem:[%s2170_s1 + $0x248] sm:$0xff]  }
  0x24   :  { %1080 = vmatmul.mubr.bf16.vlgmr.msra.gmra.mxu1 %v1660_v34  ;;  %1516 = vmatpush3.bf16.msra.mxu0 %v1664_v37  ;;  %v1727_v34 = vld [vmem:[%s2170_s1 + $0x2c8] sm:$0xff]   ;;  %v1730_v37 = vld [vmem:[%s2170_s1 + $0x200] sm:$0xff]  }
  0x25   :  { %1538 = vmatpush3.bf16.msra.mxu1 %v1666_v39  ;;  %1517 = vmatprep.subr.bf16.mxu0 %v1667_v40  ;;  %v1732_v39 = vld [vmem:[%s2171_s0 + $0x20] ss:$56 sps:$4 sm:$0xff]   ;;  %v1734_v40 = vld [vmem:[%s2171_s0 + $0x24] ss:$56 sps:$4 sm:$0xff]  }
  0x26   :  { %1539 = vmatprep.subr.bf16.mxu1 %v1669_v42  ;;  %1120 = vmatprep.mubr.bf16.mxu0 %v1696_v4  ;;  %v1736_v42 = vld [vmem:[%s2170_s1 + $0x378] sm:$0xff]  }
  0x27   :  { %1161 = vmatprep.mubr.bf16.mxu1 %v1701_v8 }
  0x28   :  { %1518 = vmatpush3.bf16.msra.mxu0 %v1668_v41  ;;  %v1735_v41 = vld [vmem:[%s2170_s1 + $0x280] sm:$0xff]  }
  0x29   :  { %1540 = vmatpush3.bf16.msra.mxu1 %v1670_v43  ;;  %1519 = vmatprep.subr.bf16.mxu0 %v1671_v44  ;;  %v1737_v43 = vld [vmem:[%s2171_s0 + $0x28] ss:$56 sps:$4 sm:$0xff]   ;;  %v1739_v44 = vld [vmem:[%s2171_s0 + $0x2c] ss:$56 sps:$4 sm:$0xff]  }
  0x2a   :  { %1541 = vmatprep.subr.bf16.mxu1 %v1673_v46  ;;  %v1741_v46 = vld [vmem:[%s2170_s1 + $0x370] sm:$0xff]  }
  0x2c   :  { %1520 = vmatpush3.bf16.msra.mxu0 %v1672_v45  ;;  %v1740_v45 = vld [vmem:[%s2170_s1 + $0x338] sm:$0xff]  }
  0x2d   :  { %1542 = vmatpush3.bf16.msra.mxu1 %v1674_v47  ;;  %1521 = vmatprep.subr.bf16.mxu0 %v1675_v48  ;;  %v1742_v47 = vld [vmem:[%s2170_s1 + $0x330] sm:$0xff]   ;;  %v1743_v48 = vld [vmem:[%s2170_s1 + $0x368] sm:$0xff]  }
  0x2e   :  { %1543 = vmatprep.subr.bf16.mxu1 %v1677_v50  ;;  %v1745_v50 = vld [vmem:[%s2170_s1 + $0x360] sm:$0xff]  }
  0x30   :  { %1522 = vmatpush3.bf16.msra.mxu0 %v1676_v49  ;;  %v1744_v49 = vld [vmem:[%s2170_s1 + $0x328] sm:$0xff]  }
  0x31   :  { %1544 = vmatpush3.bf16.msra.mxu1 %v1678_v51  ;;  %1523 = vmatprep.subr.bf16.mxu0 %v1679_v52  ;;  %v1746_v51 = vld [vmem:[%s2170_s1 + $0x320] sm:$0xff]   ;;  %v1747_v52 = vld [vmem:[%s2170_s1 + $0x358] sm:$0xff]  }
  0x32   :  { %1545 = vmatprep.subr.bf16.mxu1 %v1681_v54  ;;  %v1749_v54 = vld [vmem:[%s2170_s1 + $0x350] sm:$0xff]  }
  0x34   :  { %1524 = vmatpush3.bf16.msra.mxu0 %v1680_v53  ;;  %v1748_v53 = vld [vmem:[%s2170_s1 + $0x318] sm:$0xff]  }
  0x35   :  { %1546 = vmatpush3.bf16.msra.mxu1 %v1682_v55  ;;  %1525 = vmatprep.subr.bf16.mxu0 %v1683_v56  ;;  %v1757_v55 = vld [vmem:[%s2171_s0 + $0x34] ss:$56 sps:$4 sm:$0xff]  }
  0x36   :  { %1547 = vmatprep.subr.bf16.mxu1 %v1685_v58  ;;  %v1750_v56 = vld [vmem:[%s2170_s1 + $0x310] sm:$0xff]   ;;  %v1752_v58 = vld [vmem:[%s2170_s1 + $0x308] sm:$0xff]  }
  0x38   :  { %1526 = vmatpush3.bf16.msra.mxu0 %v1684_v57  ;;  %v1751_v57 = vld [vmem:[%s2170_s1 + $0x348] sm:$0xff]  }
  0x39   :  { %1548 = vmatpush3.bf16.msra.mxu1 %v1686_v59  ;;  %1527 = vmatprep.subr.bf16.mxu0 %v1687_v60  ;;  %v1753_v59 = vld [vmem:[%s2170_s1 + $0x340] sm:$0xff]  }
  0x3a   :  { %1549 = vmatprep.subr.bf16.mxu1 %v1689_v62  ;;  %v1754_v60 = vld [vmem:[%s2170_s1 + $0x300] sm:$0xff]  }
  0x3c   :  { %1528 = vmatpush3.bf16.msra.mxu0 %v1688_v61  ;;  %v1755_v61 = vld [vmem:[%s2171_s0 + $0x30] ss:$56 sps:$4 sm:$0xff]  }
  0x3d   :  { %1550 = vmatpush3.bf16.msra.mxu1 %v1690_v63  ;;  %1529 = vmatprep.subr.bf16.mxu0 %v1691_v0 }
  0x3e   :  { %1551 = vmatprep.subr.bf16.mxu1 %v1693_v2 }
  0x40   :  { %1530 = vmatpush3.bf16.msra.mxu0 %v1692_v1 }
  0x41   :  { %1552 = vmatpush3.bf16.msra.mxu1 %v1697_v5  ;;  %1559 = vmatprep.subr.bf16.mxu0 %v1698_v6 }
  0x42   :  { %1581 = vmatprep.subr.bf16.mxu1 %v1703_v10 }
  0x43   :  { %1121 = vmatmul.mubr.bf16.vlgmr.msra.gmra.mxu0 %v1694_v3 }
  0x44   :  { %1560 = vmatpush3.bf16.msra.mxu0 %v1702_v9  ;;  %1162 = vmatmul.mubr.bf16.vlgmr.msra.gmra.mxu1 %v1699_v7 }
  0x45   :  { %1582 = vmatpush3.bf16.msra.mxu1 %v1704_v11  ;;  %1561 = vmatprep.subr.bf16.mxu0 %v1705_v12 }
  0x46   :  { %1583 = vmatprep.subr.bf16.mxu1 %v1707_v14  ;;  %1202 = vmatprep.mubr.bf16.mxu0 %v1734_v40 }
  0x47   :  { %1243 = vmatprep.mubr.bf16.mxu1 %v1739_v44 }
  0x48   :  { %1562 = vmatpush3.bf16.msra.mxu0 %v1706_v13 }
  0x49   :  { %1584 = vmatpush3.bf16.msra.mxu1 %v1708_v15  ;;  %1563 = vmatprep.subr.bf16.mxu0 %v1709_v16 }
  0x4a   :  { %1585 = vmatprep.subr.bf16.mxu1 %v1711_v18 }
  0x4c   :  { %1564 = vmatpush3.bf16.msra.mxu0 %v1710_v17 }
  0x4d   :  { %1586 = vmatpush3.bf16.msra.mxu1 %v1712_v19  ;;  %1565 = vmatprep.subr.bf16.mxu0 %v1713_v20 }
  0x4e   :  { %1587 = vmatprep.subr.bf16.mxu1 %v1715_v22 }
  0x50   :  { %1566 = vmatpush3.bf16.msra.mxu0 %v1714_v21 }
  0x51   :  { %1588 = vmatpush3.bf16.msra.mxu1 %v1716_v23  ;;  %1567 = vmatprep.subr.bf16.mxu0 %v1717_v24 }
  0x52   :  { %1589 = vmatprep.subr.bf16.mxu1 %v1719_v26 }
  0x54   :  { %1568 = vmatpush3.bf16.msra.mxu0 %v1718_v25 }
  0x55   :  { %1590 = vmatpush3.bf16.msra.mxu1 %v1720_v27  ;;  %1569 = vmatprep.subr.bf16.mxu0 %v1721_v28 }
  0x56   :  { %1591 = vmatprep.subr.bf16.mxu1 %v1723_v30 }
  0x58   :  { %1570 = vmatpush3.bf16.msra.mxu0 %v1722_v29 }
  0x59   :  { %1592 = vmatpush3.bf16.msra.mxu1 %v1724_v31  ;;  %1571 = vmatprep.subr.bf16.mxu0 %v1725_v32 }
  0x5a   :  { %1593 = vmatprep.subr.bf16.mxu1 %v1727_v34 }
  0x5c   :  { %1572 = vmatpush3.bf16.msra.mxu0 %v1726_v33 }
  0x5d   :  { %1594 = vmatpush3.bf16.msra.mxu1 %v1728_v35  ;;  %1573 = vmatprep.subr.bf16.mxu0 %v1729_v36 }
  0x5e   :  { %1595 = vmatprep.subr.bf16.mxu1 %v1731_v38 }
  0x60   :  { %1574 = vmatpush3.bf16.msra.mxu0 %v1730_v37 }
  0x61   :  { %1596 = vmatpush3.bf16.msra.mxu1 %v1735_v41  ;;  %1603 = vmatprep.subr.bf16.mxu0 %v1736_v42 }
  0x63   :  { %1203 = vmatmul.mubr.bf16.vlgmr.msra.gmra.mxu0 %v1732_v39 }
  0x64   :  { %1604 = vmatpush3.bf16.msra.mxu0 %v1740_v45  ;;  %1244 = vmatmul.mubr.bf16.vlgmr.msra.gmra.mxu1 %v1737_v43 }
  0x65   :  { %1605 = vmatprep.subr.bf16.mxu0 %v1741_v46  ;;  %1284 = vmatprep.mubr.bf16.mxu0 %v1757_v55 }
  0x68   :  { %1606 = vmatpush3.bf16.msra.mxu0 %v1742_v47 }
  0x69   :  { %1607 = vmatprep.subr.bf16.mxu0 %v1743_v48  ;;  %v1457_v48 = vld [vmem:[%s2172_s2] ss:$0 sm:$0xff] }
  0x6c   :  { %1608 = vmatpush3.bf16.msra.mxu0 %v1744_v49  ;;  %v1463_v49 = vld [vmem:[%s2173_s3] sm:$0xff]  }
  0x6d   :  { %1609 = vmatprep.subr.bf16.mxu0 %v1745_v50 }
  0x70   :  { %1610 = vmatpush3.bf16.msra.mxu0 %v1746_v51 }
  0x71   :  { %1611 = vmatprep.subr.bf16.mxu0 %v1747_v52 }
  0x74   :  { %1612 = vmatpush3.bf16.msra.mxu0 %v1748_v53 }
  0x75   :  { %1613 = vmatprep.subr.bf16.mxu0 %v1749_v54  ;;  %v1464_v54 = vunpack.c.l.bf16 %v1463_v49 }
  0x78   :  { %1614 = vmatpush3.bf16.msra.mxu0 %v1750_v56  ;;  %v1465_v56 = vunpack.c.h.bf16 %v1463_v49 }
  0x79   :  { %1615 = vmatprep.subr.bf16.mxu0 %v1751_v57 }
  0x7c   :  { %1616 = vmatpush3.bf16.msra.mxu0 %v1752_v58 }
  0x7d   :  { %1617 = vmatprep.subr.bf16.mxu0 %v1753_v59 }
  0x80   :  { %1618 = vmatpush3.bf16.msra.mxu0 %v1754_v60 }
  0x83   :  { %1285 = vmatmul.mubr.bf16.vlgmr.msra.gmra.mxu0 %v1755_v61 }
  0xe3   :  { %v1487_v62 = vpop.f32.mrf.mxu0 }
  0xe4   :  { %v1509_v63 = vpop.f32.mrf.mxu1 }
  0xe5   :  { %v1488_v0 = vpop.f32.mrf.mxu0 }
  0xe6   :  { %v1510_v1 = vpop.f32.mrf.mxu1  ;;  %v1489_v15 = vadd.f32 %v1488_v0, %v1487_v62 }
  0xe7   :  { %v1490_v2 = vpop.f32.mrf.mxu0  ;;  %v1511_v16 = vadd.f32 %v1510_v1, %v1509_v63 }
  0xe8   :  { %v1512_v3 = vpop.f32.mrf.mxu1 }
  0xe9   :  { %v1491_v4 = vpop.f32.mrf.mxu0  ;;  %v1082_v20 = vadd.f32 %v1511_v16, %v1489_v15 }
  0xea   :  { %v1513_v6 = vpop.f32.mrf.mxu1  ;;  %v1492_v21 = vadd.f32 %v1491_v4, %v1490_v2 }
  0xeb   :  { %v1514_v22 = vadd.f32 %v1513_v6, %v1512_v3 }
  0xed   :  { %v1085_v28 = vadd.f32 %v1514_v22, %v1492_v21 }
 0x103   :  { %v1531_v5 = vpop.f32.mrf.mxu0 }
 0x104   :  { %v1553_v8 = vpop.f32.mrf.mxu1 }
 0x105   :  { %v1532_v7 = vpop.f32.mrf.mxu0 }
 0x106   :  { %v1554_v10 = vpop.f32.mrf.mxu1  ;;  %v1533_v19 = vadd.f32 %v1532_v7, %v1531_v5 }
 0x107   :  { %v1534_v9 = vpop.f32.mrf.mxu0  ;;  %v1555_v26 = vadd.f32 %v1554_v10, %v1553_v8 }
 0x108   :  { %v1556_v12 = vpop.f32.mrf.mxu1  ;;  %v1123_v25 = vadd.f32 %v1533_v19, %v1082_v20 }
 0x109   :  { %v1535_v11 = vpop.f32.mrf.mxu0 }
 0x10a   :  { %v1557_v14 = vpop.f32.mrf.mxu1  ;;  %v1536_v27 = vadd.f32 %v1535_v11, %v1534_v9  ;;  %v1164_v32 = vadd.f32 %v1555_v26, %v1123_v25 }
 0x10b   :  { %v1558_v34 = vadd.f32 %v1557_v14, %v1556_v12 }
 0x10c   :  { %v1126_v33 = vadd.f32 %v1536_v27, %v1085_v28 }
 0x10e   :  { %v1167_v40 = vadd.f32 %v1558_v34, %v1126_v33 }
 0x123   :  { %v1575_v13 = vpop.f32.mrf.mxu0 }
 0x124   :  { %v1597_v18 = vpop.f32.mrf.mxu1 }
 0x125   :  { %v1576_v17 = vpop.f32.mrf.mxu0 }
 0x126   :  { %v1598_v24 = vpop.f32.mrf.mxu1  ;;  %v1577_v29 = vadd.f32 %v1576_v17, %v1575_v13 }
 0x127   :  { %v1578_v23 = vpop.f32.mrf.mxu0  ;;  %v1599_v36 = vadd.f32 %v1598_v24, %v1597_v18 }
 0x128   :  { %v1600_v31 = vpop.f32.mrf.mxu1  ;;  %v1205_v35 = vadd.f32 %v1577_v29, %v1164_v32 }
 0x129   :  { %v1579_v30 = vpop.f32.mrf.mxu0 }
 0x12a   :  { %v1580_v37 = vadd.f32 %v1579_v30, %v1578_v23  ;;  %v1601_v38 = vpop.f32.mrf.mxu1  ;;  %v1246_v42 = vadd.f32 %v1599_v36, %v1205_v35 }
 0x12b   :  { %v1602_v44 = vadd.f32 %v1601_v38, %v1600_v31 }
 0x12c   :  { %v1208_v43 = vadd.f32 %v1580_v37, %v1167_v40 }
 0x12e   :  { %v1249_v51 = vadd.f32 %v1602_v44, %v1208_v43 }
 0x143   :  { %v1619_v39 = vpop.f32.mrf.mxu0 }
 0x145   :  { %v1620_v41 = vpop.f32.mrf.mxu0 }
 0x146   :  { %v1621_v45 = vadd.f32 %v1620_v41, %v1619_v39 }
 0x147   :  { %v1622_v46 = vpop.f32.mrf.mxu0 }
 0x148   :  { %v1287_v47 = vadd.f32 %v1621_v45, %v1246_v42 }
 0x149   :  { %v1623_v50 = vpop.f32.mrf.mxu0 }
 0x14a   :  { %v1624_v52 = vadd.f32 %v1623_v50, %v1622_v46  ;;  %v1309_v53 = vadd.f32 %v1457_v48, %v1287_v47 }
 0x14c   :  { %v1290_v55 = vadd.f32 %v1624_v52, %v1249_v51  ;;  %v1315_v58 = vadd.f32 %v1464_v54, %v1309_v53 }
 0x14e   :  { %v1310_v57 = vadd.f32 %v1457_v48, %v1290_v55 }
 0x150   :  { %v1316_v59 = vadd.f32 %v1465_v56, %v1310_v57 }
 0x152   :  { %v1469_v60 = vpack.c.bf16 %v1316_v59, %v1315_v58 }
 0x154   :  { %1470 = vst [vmem:[%s2174_s4] sm:$0xff] %v1469_v60  }

// kernel: _lambda_.42
= control target key start
LH: loop header
LB: loop body
LE: loop exit
PB: predicated region body
PF: predicated region fallthrough
CT: control target
= control target key end

     0   :  { %s2151_s1 = inlined_call_operand.vmem [shape: bf16[1792,128], index: 1, kind: input, shape index: {}]   ;;  %s2152_s0 = inlined_call_operand.vmem [shape: bf16[16,1792], index: 0, kind: input, shape index: {}]   ;;  %s2153_s2 = inlined_call_operand.vmem [shape: f32[1,128], index: 2, kind: input, shape index: {}]   ;;  %s2154_s3 = inlined_call_operand.vmem [shape: bf16[16,128], index: 3, kind: output, shape index: {}]  }
   0x1   :  { %v1614_v0 = vld [vmem:[%s2151_s1 + $0x78] sm:$0xff]   ;;  %v1618_v4 = vld [vmem:[%s2151_s1 + $0x70] sm:$0xff]   ;;  %v1622_v8 = vld [vmem:[%s2151_s1 + $0x68] sm:$0xff]  }
   0x2   :  { %v1615_v1 = vld [vmem:[%s2151_s1 + $0xf8] sm:$0xff]   ;;  %1460 = vmatprep.subr.bf16.mxu0 %v1614_v0  ;;  %v1619_v5 = vld [vmem:[%s2151_s1 + $0xf0] sm:$0xff]   ;;  %v1623_v9 = vld [vmem:[%s2151_s1 + $0xe8] sm:$0xff]  }
   0x3   :  { %v1616_v2 = vld [vmem:[%s2151_s1 + $0x38] sm:$0xff]   ;;  %1482 = vmatprep.subr.bf16.mxu1 %v1615_v1  ;;  %v1620_v6 = vld [vmem:[%s2151_s1 + $0x30] sm:$0xff]   ;;  %v1624_v10 = vld [vmem:[%s2151_s1 + $0x28] sm:$0xff]  }
   0x4   :  { %v1617_v3 = vld [vmem:[%s2151_s1 + $0xb8] sm:$0xff]   ;;  %1461 = vmatpush3.bf16.msra.mxu0 %v1616_v2  ;;  %v1621_v7 = vld [vmem:[%s2151_s1 + $0xb0] sm:$0xff]   ;;  %v1625_v11 = vld [vmem:[%s2151_s1 + $0xa8] sm:$0xff]  }
   0x5   :  { %1483 = vmatpush3.bf16.msra.mxu1 %v1617_v3  ;;  %1462 = vmatprep.subr.bf16.mxu0 %v1618_v4  ;;  %v1626_v12 = vld [vmem:[%s2151_s1 + $0x60] sm:$0xff]   ;;  %v1630_v16 = vld [vmem:[%s2151_s1 + $0x58] sm:$0xff]   ;;  %v1634_v20 = vld [vmem:[%s2151_s1 + $0x50] sm:$0xff]  }
   0x6   :  { %1484 = vmatprep.subr.bf16.mxu1 %v1619_v5  ;;  %v1627_v13 = vld [vmem:[%s2151_s1 + $0xe0] sm:$0xff]   ;;  %v1631_v17 = vld [vmem:[%s2151_s1 + $0xd8] sm:$0xff]   ;;  %v1635_v21 = vld [vmem:[%s2151_s1 + $0xd0] sm:$0xff]  }
   0x7   :  { %v1628_v14 = vld [vmem:[%s2151_s1 + $0x20] sm:$0xff]   ;;  %v1632_v18 = vld [vmem:[%s2151_s1 + $0x18] sm:$0xff]   ;;  %v1636_v22 = vld [vmem:[%s2151_s1 + $0x10] sm:$0xff]  }
   0x8   :  { %1463 = vmatpush3.bf16.msra.mxu0 %v1620_v6  ;;  %v1629_v15 = vld [vmem:[%s2151_s1 + $0xa0] sm:$0xff]   ;;  %v1633_v19 = vld [vmem:[%s2151_s1 + $0x98] sm:$0xff]   ;;  %v1637_v23 = vld [vmem:[%s2151_s1 + $0x90] sm:$0xff]  }
   0x9   :  { %1485 = vmatpush3.bf16.msra.mxu1 %v1621_v7  ;;  %1464 = vmatprep.subr.bf16.mxu0 %v1622_v8  ;;  %v1638_v24 = vld [vmem:[%s2151_s1 + $0x48] sm:$0xff]   ;;  %v1642_v28 = vld [vmem:[%s2151_s1 + $0x40] sm:$0xff]   ;;  %v1652_v36 = vld [vmem:[%s2151_s1 + $0x178] sm:$0xff]  }
   0xa   :  { %1486 = vmatprep.subr.bf16.mxu1 %v1623_v9  ;;  %v1639_v25 = vld [vmem:[%s2151_s1 + $0xc8] sm:$0xff]   ;;  %v1643_v29 = vld [vmem:[%s2151_s1 + $0xc0] sm:$0xff]   ;;  %v1653_v37 = vld [vmem:[%s2151_s1 + $0x138] sm:$0xff]  }
   0xb   :  { %v1640_v26 = vld [vmem:[%s2151_s1 + $0x8] sm:$0xff]   ;;  %v1644_v30 = vld [vmem:[%s2151_s1] sm:$0xff]   ;;  %v1654_v38 = vld [vmem:[%s2151_s1 + $0x1f8] sm:$0xff]  }
   0xc   :  { %1465 = vmatpush3.bf16.msra.mxu0 %v1624_v10  ;;  %v1641_v27 = vld [vmem:[%s2151_s1 + $0x88] sm:$0xff]   ;;  %v1645_v31 = vld [vmem:[%s2151_s1 + $0x80] sm:$0xff]   ;;  %v1655_v39 = vld [vmem:[%s2151_s1 + $0x1b8] sm:$0xff]  }
   0xd   :  { %1487 = vmatpush3.bf16.msra.mxu1 %v1625_v11  ;;  %1466 = vmatprep.subr.bf16.mxu0 %v1626_v12  ;;  %v1646_v32 = vld [vmem:[%s2152_s0] ss:$56 sps:$4 sm:$0xff]   ;;  %v1648_v33 = vld [vmem:[%s2152_s0 + $0x4] ss:$56 sps:$4 sm:$0xff]   ;;  %v1656_v40 = vld [vmem:[%s2151_s1 + $0x170] sm:$0xff]  }
   0xe   :  { %1488 = vmatprep.subr.bf16.mxu1 %v1627_v13  ;;  %v1649_v34 = vld [vmem:[%s2152_s0 + $0x8] ss:$56 sps:$4 sm:$0xff]   ;;  %v1651_v35 = vld [vmem:[%s2152_s0 + $0xc] ss:$56 sps:$4 sm:$0xff]   ;;  %1035 = vmatprep.mubr.bf16.mxu0 %v1648_v33  ;;  %v1657_v41 = vld [vmem:[%s2151_s1 + $0x130] sm:$0xff]  }
   0xf   :  { %1076 = vmatprep.mubr.bf16.mxu1 %v1651_v35  ;;  %v1658_v42 = vld [vmem:[%s2151_s1 + $0x1f0] sm:$0xff]   ;;  %v1660_v44 = vld [vmem:[%s2151_s1 + $0x168] sm:$0xff]   ;;  %v1664_v48 = vld [vmem:[%s2151_s1 + $0x160] sm:$0xff]  }
  0x10   :  { %1467 = vmatpush3.bf16.msra.mxu0 %v1628_v14  ;;  %v1659_v43 = vld [vmem:[%s2151_s1 + $0x1b0] sm:$0xff]   ;;  %v1661_v45 = vld [vmem:[%s2151_s1 + $0x128] sm:$0xff]   ;;  %v1665_v49 = vld [vmem:[%s2151_s1 + $0x120] sm:$0xff]  }
  0x11   :  { %1489 = vmatpush3.bf16.msra.mxu1 %v1629_v15  ;;  %1468 = vmatprep.subr.bf16.mxu0 %v1630_v16  ;;  %v1662_v46 = vld [vmem:[%s2151_s1 + $0x1e8] sm:$0xff]   ;;  %v1666_v50 = vld [vmem:[%s2151_s1 + $0x1e0] sm:$0xff]   ;;  %v1668_v52 = vld [vmem:[%s2151_s1 + $0x158] sm:$0xff]  }
  0x12   :  { %1490 = vmatprep.subr.bf16.mxu1 %v1631_v17  ;;  %v1663_v47 = vld [vmem:[%s2151_s1 + $0x1a8] sm:$0xff]   ;;  %v1667_v51 = vld [vmem:[%s2151_s1 + $0x1a0] sm:$0xff]   ;;  %v1669_v53 = vld [vmem:[%s2151_s1 + $0x118] sm:$0xff]  }
  0x13   :  { %v1670_v54 = vld [vmem:[%s2151_s1 + $0x1d8] sm:$0xff]   ;;  %v1672_v56 = vld [vmem:[%s2151_s1 + $0x150] sm:$0xff]   ;;  %v1676_v60 = vld [vmem:[%s2151_s1 + $0x148] sm:$0xff]  }
  0x14   :  { %1469 = vmatpush3.bf16.msra.mxu0 %v1632_v18  ;;  %v1671_v55 = vld [vmem:[%s2151_s1 + $0x198] sm:$0xff]   ;;  %v1673_v57 = vld [vmem:[%s2151_s1 + $0x110] sm:$0xff]   ;;  %v1677_v61 = vld [vmem:[%s2151_s1 + $0x108] sm:$0xff]  }
  0x15   :  { %1491 = vmatpush3.bf16.msra.mxu1 %v1633_v19  ;;  %1470 = vmatprep.subr.bf16.mxu0 %v1634_v20  ;;  %v1674_v58 = vld [vmem:[%s2151_s1 + $0x1d0] sm:$0xff]   ;;  %v1678_v62 = vld [vmem:[%s2151_s1 + $0x1c8] sm:$0xff]   ;;  %v1680_v0 = vld [vmem:[%s2151_s1 + $0x140] sm:$0xff]  }
  0x16   :  { %1492 = vmatprep.subr.bf16.mxu1 %v1635_v21  ;;  %v1675_v59 = vld [vmem:[%s2151_s1 + $0x190] sm:$0xff]   ;;  %v1679_v63 = vld [vmem:[%s2151_s1 + $0x188] sm:$0xff]   ;;  %v1681_v1 = vld [vmem:[%s2151_s1 + $0x100] sm:$0xff]  }
  0x17   :  { %v1682_v2 = vld [vmem:[%s2151_s1 + $0x1c0] sm:$0xff]   ;;  %v1683_v3 = vld [vmem:[%s2152_s0 + $0x10] ss:$56 sps:$4 sm:$0xff]   ;;  %v1685_v4 = vld [vmem:[%s2152_s0 + $0x14] ss:$56 sps:$4 sm:$0xff]  }
  0x18   :  { %1471 = vmatpush3.bf16.msra.mxu0 %v1636_v22  ;;  %v1686_v5 = vld [vmem:[%s2151_s1 + $0x180] sm:$0xff]   ;;  %v1687_v6 = vld [vmem:[%s2151_s1 + $0x278] sm:$0xff]   ;;  %v1694_v12 = vld [vmem:[%s2151_s1 + $0x270] sm:$0xff]  }
  0x19   :  { %1493 = vmatpush3.bf16.msra.mxu1 %v1637_v23  ;;  %1472 = vmatprep.subr.bf16.mxu0 %v1638_v24  ;;  %v1688_v7 = vld [vmem:[%s2152_s0 + $0x18] ss:$56 sps:$4 sm:$0xff]   ;;  %v1690_v8 = vld [vmem:[%s2152_s0 + $0x1c] ss:$56 sps:$4 sm:$0xff]   ;;  %v1698_v16 = vld [vmem:[%s2151_s1 + $0x268] sm:$0xff]  }
  0x1a   :  { %1494 = vmatprep.subr.bf16.mxu1 %v1639_v25  ;;  %v1691_v9 = vld [vmem:[%s2151_s1 + $0x238] sm:$0xff]   ;;  %v1695_v13 = vld [vmem:[%s2151_s1 + $0x230] sm:$0xff]   ;;  %v1699_v17 = vld [vmem:[%s2151_s1 + $0x228] sm:$0xff]  }
  0x1b   :  { %v1692_v10 = vld [vmem:[%s2151_s1 + $0x2f8] sm:$0xff]   ;;  %v1696_v14 = vld [vmem:[%s2151_s1 + $0x2f0] sm:$0xff]   ;;  %v1700_v18 = vld [vmem:[%s2151_s1 + $0x2e8] sm:$0xff]  }
  0x1c   :  { %1473 = vmatpush3.bf16.msra.mxu0 %v1640_v26  ;;  %v1693_v11 = vld [vmem:[%s2151_s1 + $0x2b8] sm:$0xff]   ;;  %v1697_v15 = vld [vmem:[%s2151_s1 + $0x2b0] sm:$0xff]   ;;  %v1701_v19 = vld [vmem:[%s2151_s1 + $0x2a8] sm:$0xff]  }
  0x1d   :  { %1495 = vmatpush3.bf16.msra.mxu1 %v1641_v27  ;;  %1474 = vmatprep.subr.bf16.mxu0 %v1642_v28  ;;  %v1702_v20 = vld [vmem:[%s2151_s1 + $0x260] sm:$0xff]   ;;  %v1706_v24 = vld [vmem:[%s2151_s1 + $0x258] sm:$0xff]   ;;  %v1710_v28 = vld [vmem:[%s2151_s1 + $0x250] sm:$0xff]  }
  0x1e   :  { %1496 = vmatprep.subr.bf16.mxu1 %v1643_v29  ;;  %v1703_v21 = vld [vmem:[%s2151_s1 + $0x220] sm:$0xff]   ;;  %v1707_v25 = vld [vmem:[%s2151_s1 + $0x218] sm:$0xff]   ;;  %v1711_v29 = vld [vmem:[%s2151_s1 + $0x210] sm:$0xff]  }
  0x1f   :  { %v1704_v22 = vld [vmem:[%s2151_s1 + $0x2e0] sm:$0xff]   ;;  %v1708_v26 = vld [vmem:[%s2151_s1 + $0x2d8] sm:$0xff]   ;;  %v1715_v33 = vld [vmem:[%s2151_s1 + $0x208] sm:$0xff]  }
  0x20   :  { %1475 = vmatpush3.bf16.msra.mxu0 %v1644_v30  ;;  %v1705_v23 = vld [vmem:[%s2151_s1 + $0x2a0] sm:$0xff]   ;;  %v1709_v27 = vld [vmem:[%s2151_s1 + $0x298] sm:$0xff]   ;;  %v1712_v30 = vld [vmem:[%s2151_s1 + $0x2d0] sm:$0xff]  }
  0x21   :  { %1497 = vmatpush3.bf16.msra.mxu1 %v1645_v31  ;;  %1504 = vmatprep.subr.bf16.mxu0 %v1652_v36  ;;  %v1713_v31 = vld [vmem:[%s2151_s1 + $0x290] sm:$0xff]   ;;  %v1717_v35 = vld [vmem:[%s2151_s1 + $0x288] sm:$0xff]   ;;  %v1718_v36 = vld [vmem:[%s2151_s1 + $0x240] sm:$0xff]  }
  0x22   :  { %1526 = vmatprep.subr.bf16.mxu1 %v1654_v38  ;;  %v1720_v38 = vld [vmem:[%s2151_s1 + $0x2c0] sm:$0xff]  }
  0x23   :  { %1036 = vmatmul.mubr.bf16.vlgmr.msra.gmra.mxu0 %v1646_v32  ;;  %v1714_v32 = vld [vmem:[%s2151_s1 + $0x248] sm:$0xff]  }
  0x24   :  { %1077 = vmatmul.mubr.bf16.vlgmr.msra.gmra.mxu1 %v1649_v34  ;;  %1505 = vmatpush3.bf16.msra.mxu0 %v1653_v37  ;;  %v1716_v34 = vld [vmem:[%s2151_s1 + $0x2c8] sm:$0xff]   ;;  %v1719_v37 = vld [vmem:[%s2151_s1 + $0x200] sm:$0xff]  }
  0x25   :  { %1527 = vmatpush3.bf16.msra.mxu1 %v1655_v39  ;;  %1506 = vmatprep.subr.bf16.mxu0 %v1656_v40  ;;  %v1721_v39 = vld [vmem:[%s2152_s0 + $0x20] ss:$56 sps:$4 sm:$0xff]   ;;  %v1723_v40 = vld [vmem:[%s2152_s0 + $0x24] ss:$56 sps:$4 sm:$0xff]  }
  0x26   :  { %1528 = vmatprep.subr.bf16.mxu1 %v1658_v42  ;;  %1117 = vmatprep.mubr.bf16.mxu0 %v1685_v4  ;;  %v1725_v42 = vld [vmem:[%s2151_s1 + $0x378] sm:$0xff]  }
  0x27   :  { %1158 = vmatprep.mubr.bf16.mxu1 %v1690_v8 }
  0x28   :  { %1507 = vmatpush3.bf16.msra.mxu0 %v1657_v41  ;;  %v1724_v41 = vld [vmem:[%s2151_s1 + $0x280] sm:$0xff]  }
  0x29   :  { %1529 = vmatpush3.bf16.msra.mxu1 %v1659_v43  ;;  %1508 = vmatprep.subr.bf16.mxu0 %v1660_v44  ;;  %v1726_v43 = vld [vmem:[%s2152_s0 + $0x28] ss:$56 sps:$4 sm:$0xff]   ;;  %v1728_v44 = vld [vmem:[%s2152_s0 + $0x2c] ss:$56 sps:$4 sm:$0xff]  }
  0x2a   :  { %1530 = vmatprep.subr.bf16.mxu1 %v1662_v46  ;;  %v1730_v46 = vld [vmem:[%s2151_s1 + $0x370] sm:$0xff]  }
  0x2c   :  { %1509 = vmatpush3.bf16.msra.mxu0 %v1661_v45  ;;  %v1729_v45 = vld [vmem:[%s2151_s1 + $0x338] sm:$0xff]  }
  0x2d   :  { %1531 = vmatpush3.bf16.msra.mxu1 %v1663_v47  ;;  %1510 = vmatprep.subr.bf16.mxu0 %v1664_v48  ;;  %v1731_v47 = vld [vmem:[%s2151_s1 + $0x330] sm:$0xff]   ;;  %v1732_v48 = vld [vmem:[%s2151_s1 + $0x368] sm:$0xff]  }
  0x2e   :  { %1532 = vmatprep.subr.bf16.mxu1 %v1666_v50  ;;  %v1734_v50 = vld [vmem:[%s2151_s1 + $0x360] sm:$0xff]  }
  0x30   :  { %1511 = vmatpush3.bf16.msra.mxu0 %v1665_v49  ;;  %v1733_v49 = vld [vmem:[%s2151_s1 + $0x328] sm:$0xff]  }
  0x31   :  { %1533 = vmatpush3.bf16.msra.mxu1 %v1667_v51  ;;  %1512 = vmatprep.subr.bf16.mxu0 %v1668_v52  ;;  %v1735_v51 = vld [vmem:[%s2151_s1 + $0x320] sm:$0xff]   ;;  %v1736_v52 = vld [vmem:[%s2151_s1 + $0x358] sm:$0xff]  }
  0x32   :  { %1534 = vmatprep.subr.bf16.mxu1 %v1670_v54  ;;  %v1738_v54 = vld [vmem:[%s2151_s1 + $0x350] sm:$0xff]  }
  0x34   :  { %1513 = vmatpush3.bf16.msra.mxu0 %v1669_v53  ;;  %v1737_v53 = vld [vmem:[%s2151_s1 + $0x318] sm:$0xff]  }
  0x35   :  { %1535 = vmatpush3.bf16.msra.mxu1 %v1671_v55  ;;  %1514 = vmatprep.subr.bf16.mxu0 %v1672_v56  ;;  %v1746_v55 = vld [vmem:[%s2152_s0 + $0x34] ss:$56 sps:$4 sm:$0xff]  }
  0x36   :  { %1536 = vmatprep.subr.bf16.mxu1 %v1674_v58  ;;  %v1739_v56 = vld [vmem:[%s2151_s1 + $0x310] sm:$0xff]   ;;  %v1741_v58 = vld [vmem:[%s2151_s1 + $0x308] sm:$0xff]  }
  0x38   :  { %1515 = vmatpush3.bf16.msra.mxu0 %v1673_v57  ;;  %v1740_v57 = vld [vmem:[%s2151_s1 + $0x348] sm:$0xff]  }
  0x39   :  { %1537 = vmatpush3.bf16.msra.mxu1 %v1675_v59  ;;  %1516 = vmatprep.subr.bf16.mxu0 %v1676_v60  ;;  %v1742_v59 = vld [vmem:[%s2151_s1 + $0x340] sm:$0xff]  }
  0x3a   :  { %1538 = vmatprep.subr.bf16.mxu1 %v1678_v62  ;;  %v1743_v60 = vld [vmem:[%s2151_s1 + $0x300] sm:$0xff]  }
  0x3c   :  { %1517 = vmatpush3.bf16.msra.mxu0 %v1677_v61  ;;  %v1744_v61 = vld [vmem:[%s2152_s0 + $0x30] ss:$56 sps:$4 sm:$0xff]  }
  0x3d   :  { %1539 = vmatpush3.bf16.msra.mxu1 %v1679_v63  ;;  %1518 = vmatprep.subr.bf16.mxu0 %v1680_v0 }
  0x3e   :  { %1540 = vmatprep.subr.bf16.mxu1 %v1682_v2 }
  0x40   :  { %1519 = vmatpush3.bf16.msra.mxu0 %v1681_v1 }
  0x41   :  { %1541 = vmatpush3.bf16.msra.mxu1 %v1686_v5  ;;  %1548 = vmatprep.subr.bf16.mxu0 %v1687_v6 }
  0x42   :  { %1570 = vmatprep.subr.bf16.mxu1 %v1692_v10 }
  0x43   :  { %1118 = vmatmul.mubr.bf16.vlgmr.msra.gmra.mxu0 %v1683_v3 }
  0x44   :  { %1549 = vmatpush3.bf16.msra.mxu0 %v1691_v9  ;;  %1159 = vmatmul.mubr.bf16.vlgmr.msra.gmra.mxu1 %v1688_v7 }
  0x45   :  { %1571 = vmatpush3.bf16.msra.mxu1 %v1693_v11  ;;  %1550 = vmatprep.subr.bf16.mxu0 %v1694_v12 }
  0x46   :  { %1572 = vmatprep.subr.bf16.mxu1 %v1696_v14  ;;  %1199 = vmatprep.mubr.bf16.mxu0 %v1723_v40 }
  0x47   :  { %1240 = vmatprep.mubr.bf16.mxu1 %v1728_v44 }
  0x48   :  { %1551 = vmatpush3.bf16.msra.mxu0 %v1695_v13 }
  0x49   :  { %1573 = vmatpush3.bf16.msra.mxu1 %v1697_v15  ;;  %1552 = vmatprep.subr.bf16.mxu0 %v1698_v16 }
  0x4a   :  { %1574 = vmatprep.subr.bf16.mxu1 %v1700_v18 }
  0x4c   :  { %1553 = vmatpush3.bf16.msra.mxu0 %v1699_v17 }
  0x4d   :  { %1575 = vmatpush3.bf16.msra.mxu1 %v1701_v19  ;;  %1554 = vmatprep.subr.bf16.mxu0 %v1702_v20 }
  0x4e   :  { %1576 = vmatprep.subr.bf16.mxu1 %v1704_v22 }
  0x50   :  { %1555 = vmatpush3.bf16.msra.mxu0 %v1703_v21 }
  0x51   :  { %1577 = vmatpush3.bf16.msra.mxu1 %v1705_v23  ;;  %1556 = vmatprep.subr.bf16.mxu0 %v1706_v24 }
  0x52   :  { %1578 = vmatprep.subr.bf16.mxu1 %v1708_v26 }
  0x54   :  { %1557 = vmatpush3.bf16.msra.mxu0 %v1707_v25 }
  0x55   :  { %1579 = vmatpush3.bf16.msra.mxu1 %v1709_v27  ;;  %1558 = vmatprep.subr.bf16.mxu0 %v1710_v28 }
  0x56   :  { %1580 = vmatprep.subr.bf16.mxu1 %v1712_v30 }
  0x58   :  { %1559 = vmatpush3.bf16.msra.mxu0 %v1711_v29 }
  0x59   :  { %1581 = vmatpush3.bf16.msra.mxu1 %v1713_v31  ;;  %1560 = vmatprep.subr.bf16.mxu0 %v1714_v32 }
  0x5a   :  { %1582 = vmatprep.subr.bf16.mxu1 %v1716_v34 }
  0x5c   :  { %1561 = vmatpush3.bf16.msra.mxu0 %v1715_v33 }
  0x5d   :  { %1583 = vmatpush3.bf16.msra.mxu1 %v1717_v35  ;;  %1562 = vmatprep.subr.bf16.mxu0 %v1718_v36 }
  0x5e   :  { %1584 = vmatprep.subr.bf16.mxu1 %v1720_v38 }
  0x60   :  { %1563 = vmatpush3.bf16.msra.mxu0 %v1719_v37 }
  0x61   :  { %1585 = vmatpush3.bf16.msra.mxu1 %v1724_v41  ;;  %1592 = vmatprep.subr.bf16.mxu0 %v1725_v42 }
  0x63   :  { %1200 = vmatmul.mubr.bf16.vlgmr.msra.gmra.mxu0 %v1721_v39 }
  0x64   :  { %1593 = vmatpush3.bf16.msra.mxu0 %v1729_v45  ;;  %1241 = vmatmul.mubr.bf16.vlgmr.msra.gmra.mxu1 %v1726_v43 }
  0x65   :  { %1594 = vmatprep.subr.bf16.mxu0 %v1730_v46  ;;  %1281 = vmatprep.mubr.bf16.mxu0 %v1746_v55 }
  0x68   :  { %1595 = vmatpush3.bf16.msra.mxu0 %v1731_v47 }
  0x69   :  { %1596 = vmatprep.subr.bf16.mxu0 %v1732_v48  ;;  %v1450_v48 = vld [vmem:[%s2153_s2] ss:$0 sm:$0xff] }
  0x6c   :  { %1597 = vmatpush3.bf16.msra.mxu0 %v1733_v49 }
  0x6d   :  { %1598 = vmatprep.subr.bf16.mxu0 %v1734_v50 }
  0x70   :  { %1599 = vmatpush3.bf16.msra.mxu0 %v1735_v51 }
  0x71   :  { %1600 = vmatprep.subr.bf16.mxu0 %v1736_v52 }
  0x74   :  { %1601 = vmatpush3.bf16.msra.mxu0 %v1737_v53 }
  0x75   :  { %1602 = vmatprep.subr.bf16.mxu0 %v1738_v54 }
  0x78   :  { %1603 = vmatpush3.bf16.msra.mxu0 %v1739_v56 }
  0x79   :  { %1604 = vmatprep.subr.bf16.mxu0 %v1740_v57 }
  0x7c   :  { %1605 = vmatpush3.bf16.msra.mxu0 %v1741_v58 }
  0x7d   :  { %1606 = vmatprep.subr.bf16.mxu0 %v1742_v59 }
  0x80   :  { %1607 = vmatpush3.bf16.msra.mxu0 %v1743_v60 }
  0x83   :  { %1282 = vmatmul.mubr.bf16.vlgmr.msra.gmra.mxu0 %v1744_v61 }
  0xe3   :  { %v1476_v62 = vpop.f32.mrf.mxu0 }
  0xe4   :  { %v1498_v63 = vpop.f32.mrf.mxu1 }
  0xe5   :  { %v1477_v0 = vpop.f32.mrf.mxu0 }
  0xe6   :  { %v1499_v1 = vpop.f32.mrf.mxu1  ;;  %v1478_v15 = vadd.f32 %v1477_v0, %v1476_v62 }
  0xe7   :  { %v1479_v2 = vpop.f32.mrf.mxu0  ;;  %v1500_v16 = vadd.f32 %v1499_v1, %v1498_v63 }
  0xe8   :  { %v1501_v3 = vpop.f32.mrf.mxu1 }
  0xe9   :  { %v1480_v4 = vpop.f32.mrf.mxu0  ;;  %v1079_v20 = vadd.f32 %v1500_v16, %v1478_v15 }
  0xea   :  { %v1502_v6 = vpop.f32.mrf.mxu1  ;;  %v1481_v21 = vadd.f32 %v1480_v4, %v1479_v2 }
  0xeb   :  { %v1503_v22 = vadd.f32 %v1502_v6, %v1501_v3 }
  0xed   :  { %v1082_v28 = vadd.f32 %v1503_v22, %v1481_v21 }
 0x103   :  { %v1520_v5 = vpop.f32.mrf.mxu0 }
 0x104   :  { %v1542_v8 = vpop.f32.mrf.mxu1 }
 0x105   :  { %v1521_v7 = vpop.f32.mrf.mxu0 }
 0x106   :  { %v1543_v10 = vpop.f32.mrf.mxu1  ;;  %v1522_v19 = vadd.f32 %v1521_v7, %v1520_v5 }
 0x107   :  { %v1523_v9 = vpop.f32.mrf.mxu0  ;;  %v1544_v26 = vadd.f32 %v1543_v10, %v1542_v8 }
 0x108   :  { %v1545_v12 = vpop.f32.mrf.mxu1  ;;  %v1120_v25 = vadd.f32 %v1522_v19, %v1079_v20 }
 0x109   :  { %v1524_v11 = vpop.f32.mrf.mxu0 }
 0x10a   :  { %v1546_v14 = vpop.f32.mrf.mxu1  ;;  %v1525_v27 = vadd.f32 %v1524_v11, %v1523_v9  ;;  %v1161_v32 = vadd.f32 %v1544_v26, %v1120_v25 }
 0x10b   :  { %v1547_v34 = vadd.f32 %v1546_v14, %v1545_v12 }
 0x10c   :  { %v1123_v33 = vadd.f32 %v1525_v27, %v1082_v28 }
 0x10e   :  { %v1164_v40 = vadd.f32 %v1547_v34, %v1123_v33 }
 0x123   :  { %v1564_v13 = vpop.f32.mrf.mxu0 }
 0x124   :  { %v1586_v18 = vpop.f32.mrf.mxu1 }
 0x125   :  { %v1565_v17 = vpop.f32.mrf.mxu0 }
 0x126   :  { %v1587_v24 = vpop.f32.mrf.mxu1  ;;  %v1566_v29 = vadd.f32 %v1565_v17, %v1564_v13 }
 0x127   :  { %v1567_v23 = vpop.f32.mrf.mxu0  ;;  %v1588_v36 = vadd.f32 %v1587_v24, %v1586_v18 }
 0x128   :  { %v1589_v31 = vpop.f32.mrf.mxu1  ;;  %v1202_v35 = vadd.f32 %v1566_v29, %v1161_v32 }
 0x129   :  { %v1568_v30 = vpop.f32.mrf.mxu0 }
 0x12a   :  { %v1569_v37 = vadd.f32 %v1568_v30, %v1567_v23  ;;  %v1590_v38 = vpop.f32.mrf.mxu1  ;;  %v1243_v42 = vadd.f32 %v1588_v36, %v1202_v35 }
 0x12b   :  { %v1591_v44 = vadd.f32 %v1590_v38, %v1589_v31 }
 0x12c   :  { %v1205_v43 = vadd.f32 %v1569_v37, %v1164_v40 }
 0x12e   :  { %v1246_v50 = vadd.f32 %v1591_v44, %v1205_v43 }
 0x143   :  { %v1608_v39 = vpop.f32.mrf.mxu0 }
 0x145   :  { %v1609_v41 = vpop.f32.mrf.mxu0 }
 0x146   :  { %v1610_v45 = vadd.f32 %v1609_v41, %v1608_v39 }
 0x147   :  { %v1611_v46 = vpop.f32.mrf.mxu0 }
 0x148   :  { %v1284_v47 = vadd.f32 %v1610_v45, %v1243_v42 }
 0x149   :  { %v1612_v49 = vpop.f32.mrf.mxu0 }
 0x14a   :  { %v1613_v51 = vadd.f32 %v1612_v49, %v1611_v46  ;;  %v1306_v52 = vadd.f32 %v1450_v48, %v1284_v47 }
 0x14c   :  { %v1287_v53 = vadd.f32 %v1613_v51, %v1246_v50  ;;  %v1308_v55 = vmax.f32 %v1306_v52, 0.0 }
 0x14e   :  { %v1307_v54 = vadd.f32 %v1450_v48, %v1287_v53 }
 0x150   :  { %v1309_v56 = vmax.f32 %v1307_v54, 0.0 }
 0x152   :  { %v1458_v57 = vpack.c.bf16 %v1309_v56, %v1308_v55 }
 0x154   :  { %1459 = vst [vmem:[%s2154_s3] sm:$0xff] %v1458_v57  }

</bundles_post_ra>
